<compile_context>
chip_gen: v7x
topology: tpu7x:2x2x1
jax: 0.10.0
libtpu: 0.0.40
codegen_flags: <defaults>
</compile_context>

<pallas_src>
import functools

import jax
import jax.numpy as jnp
from jax import lax
from jax.experimental import pallas as pl
from jax.experimental.pallas import tpu as pltpu


def _round_up(x, m):
    return (x + m - 1) // m * m


# ----------------------------- Pallas kernel ---------------------------------
def _single_task_kernel(p_ref, w1_ref, b1_ref, w2_ref, b2_ref, awb_ref, ah_ref, o_ref):
    # Per grid step (one image):
    #   p_ref  : (Mf, Kp)      bf16  im2col patches (rows H-major: m = hf*Wf + wf)
    #   w1_ref : (Kp, Cmid_p)  bf16  backbone 3x3/s2 conv as a matmul
    #   b1_ref : (1, Cmid_p)   f32
    #   w2_ref : (Cmid_p, Cp)  bf16  decoder 1x1 conv
    #   b2_ref : (1, Cp)       f32
    #   awb_ref: (Hf, W, Wf)   bf16  W-axis interp matrix broadcast over Hf (batched-matmul lhs)
    #   ah_ref : (H, Hf)       f32   H-axis interp matrix (SMEM, scalar reads)
    #   o_ref  : (H, W, Cp)    f32   lane-dense output; wrapper slices Cout & permutes to NCHW
    hf, w_out, wf = awb_ref.shape
    h_out = o_ref.shape[0]
    cp = o_ref.shape[2]

    # backbone conv (as matmul) + bias + ReLU   (bias/ReLU kept in f32 on the VPU)
    feats = jnp.dot(p_ref[...], w1_ref[...], preferred_element_type=jnp.float32)
    feats = jnp.maximum(feats + b1_ref[...], 0.0)                       # (Mf, Cmid_p)

    # decoder 1x1 conv + bias
    dec = jnp.dot(feats.astype(jnp.bfloat16), w2_ref[...],
                  preferred_element_type=jnp.float32) + b2_ref[...]     # (Mf, Cp)

    # (Mf, Cp) -> (Hf, Wf, Cp): pure leading-dim split (layout preserving for f32 tiles).
    dec3 = dec.reshape(hf, wf, cp).astype(jnp.bfloat16)

    # --- separable bilinear upsample (align_corners=True) ---
    # W-axis: batched MXU matmul over Hf, contracting Wf  ->  (Hf, W, Cp) in f32.
    wup = jnp.einsum('hpv,hvc->hpc', awb_ref[...], dec3,
                     preferred_element_type=jnp.float32)

    # H-axis: each output row is a weighted sum of the Hf slabs.  Scalar weights from SMEM,
    # combination on the VPU; only leading-dim indexing and full-slab lane-dense stores.
    # TODO(synk): for large H/Hf this step should also move to the MXU (extra H-tile grid axis).
    for h in range(h_out):
        acc = ah_ref[h, 0] * wup[0]
        for f in range(1, hf):
            acc = acc + ah_ref[h, f] * wup[f]
        o_ref[h] = acc                                                  # (W, Cp) full-lane store


# ------------------------------ JAX glue --------------------------------------
def _im2col_3x3_s2_p1(x_nhwc):
    """Extract 3x3/stride2/pad1 patches.  K ordering = (kh, kw, cin); rows are H-major."""
    N, H, W, C = x_nhwc.shape
    xp = jnp.pad(x_nhwc, ((0, 0), (1, 1), (1, 1), (0, 0)))
    Hf = (H + 2 - 3) // 2 + 1
    Wf = (W + 2 - 3) // 2 + 1
    cols = []
    for dh in range(3):
        for dw in range(3):
            cols.append(xp[:, dh:dh + 2 * Hf:2, dw:dw + 2 * Wf:2, :])
    patches = jnp.stack(cols, axis=-2)                 # (N, Hf, Wf, 9, C)
    return patches.reshape(N, Hf * Wf, 9 * C), Hf, Wf


def _interp_matrix(out_size, in_size):
    """Row-stochastic matrix implementing 1-D linear interp with align_corners=True."""
    if in_size == 1:
        return jnp.ones((out_size, 1), jnp.float32)
    src = jnp.arange(out_size, dtype=jnp.float32) * (in_size - 1) / (out_size - 1)
    lo = jnp.clip(jnp.floor(src).astype(jnp.int32), 0, in_size - 2)
    frac = src - lo.astype(jnp.float32)
    eye = jnp.eye(in_size, dtype=jnp.float32)
    return (1.0 - frac)[:, None] * eye[lo] + frac[:, None] * eye[lo + 1]


@functools.partial(jax.jit, static_argnames=("task",))
def single_task_model(x_nchw, w1, b1, w2, b2, task="semseg"):
    """Forward pass of SingleTaskModel.  Input x: (N, Cin, H, W) float32 (PyTorch NCHW)."""
    N, Cin, H, W = x_nchw.shape
    K, Cmid = w1.shape
    Cout = w2.shape[1]

    x_nhwc = jnp.transpose(x_nchw, (0, 2, 3, 1))
    patches, Hf, Wf = _im2col_3x3_s2_p1(x_nhwc)        # (N, Mf, K), rows H-major
    Mf = Hf * Wf

    # Pad contraction / channel dims to MXU-friendly multiples of 128 (zero padding is inert).
    Kp = _round_up(K, 128)
    Cmid_p = _round_up(Cmid, 128)
    Cp = _round_up(Cout, 128)

    patches_p = jnp.pad(patches, ((0, 0), (0, 0), (0, Kp - K))).astype(jnp.bfloat16)
    w1_p = jnp.pad(w1, ((0, Kp - K), (0, Cmid_p - Cmid))).astype(jnp.bfloat16)
    b1_p = jnp.pad(b1, (0, Cmid_p - Cmid)).reshape(1, Cmid_p).astype(jnp.float32)
    w2_p = jnp.pad(w2, ((0, Cmid_p - Cmid), (0, Cp - Cout))).astype(jnp.bfloat16)
    b2_p = jnp.pad(b2, (0, Cp - Cout)).reshape(1, Cp).astype(jnp.float32)

    # Separable bilinear interpolation factors (align_corners=True).
    ah = _interp_matrix(H, Hf).astype(jnp.float32)                        # (H, Hf)  -> SMEM
    aw = _interp_matrix(W, Wf).astype(jnp.bfloat16)                       # (W, Wf)
    aw_b = jnp.broadcast_to(aw[None], (Hf, W, Wf))                        # batched-matmul lhs

    out4 = pl.pallas_call(
        _single_task_kernel,
        out_shape=jax.ShapeDtypeStruct((N, H, W, Cp), jnp.float32),
        grid_spec=pltpu.PrefetchScalarGridSpec(
            num_scalar_prefetch=0,
            grid=(N,),
            in_specs=[
                pl.BlockSpec((None, Mf, Kp), lambda n: (n, 0, 0)),
                pl.BlockSpec((Kp, Cmid_p), lambda n: (0, 0)),
                pl.BlockSpec((1, Cmid_p), lambda n: (0, 0)),
                pl.BlockSpec((Cmid_p, Cp), lambda n: (0, 0)),
                pl.BlockSpec((1, Cp), lambda n: (0, 0)),
                pl.BlockSpec((Hf, W, Wf), lambda n: (0, 0, 0)),
                pl.BlockSpec(memory_space=pltpu.MemorySpace.SMEM),
            ],
            out_specs=pl.BlockSpec((None, H, W, Cp), lambda n: (n, 0, 0, 0)),
        ),
        compiler_params=pltpu.CompilerParams(dimension_semantics=("parallel",)),
    )(patches_p, w1_p, b1_p, w2_p, b2_p, aw_b, ah)

    # Slice the channel padding and fold back to PyTorch NCHW.
    out = out4[:, :, :, :Cout].transpose(0, 3, 1, 2)
    return {task: out}                                            # outfn = identity


# ----------------------------- pure-JAX reference ------------------------------
def _reference(x_nchw, w1, b1, w2, b2):
    N, Cin, H, W = x_nchw.shape
    K, Cmid = w1.shape
    Cout = w2.shape[1]
    x = jnp.transpose(x_nchw, (0, 2, 3, 1))
    w1_hwio = w1.reshape(3, 3, Cin, Cmid)
    feats = lax.conv_general_dilated(
        x, w1_hwio, window_strides=(2, 2), padding=((1, 1), (1, 1)),
        dimension_numbers=("NHWC", "HWIO", "NHWC")) + b1
    feats = jnp.maximum(feats, 0.0)
    dec = jnp.einsum("nhwc,cd->nhwd", feats, w2) + b2
    Hf, Wf = feats.shape[1], feats.shape[2]
    Ah, Aw = _interp_matrix(H, Hf), _interp_matrix(W, Wf)
    out = jnp.einsum("oh,nhwc->nowc", Ah, dec)
    out = jnp.einsum("pw,nhwc->nhpc", Aw, out)
    return out.transpose(0, 3, 1, 2)


# ---------------------------------- main ---------------------------------------
if __name__ == "__main__":
    N, Cin, H, W = 2, 4, 16, 16
    Cmid, Cout = 32, 3
    K = 3 * 3 * Cin

    key = jax.random.PRNGKey(0)
    kx, k1, k2, k3, k4 = jax.random.split(key, 5)
    x = jax.random.normal(kx, (N, Cin, H, W), jnp.float32)
    w1 = jax.random.normal(k1, (K, Cmid), jnp.float32) * 0.1     # = torch (Cmid,Cin,3,3) permuted to (kh,kw,cin,cmid)
    b1 = jax.random.normal(k2, (Cmid,), jnp.float32) * 0.1
    w2 = jax.random.normal(k3, (Cmid, Cout), jnp.float32) * 0.1  # 1x1 conv weight
    b2 = jax.random.normal(k4, (Cout,), jnp.float32) * 0.1

    out = single_task_model(x, w1, b1, w2, b2, task="semseg")
    y = jax.block_until_ready(out["semseg"])
    assert y.shape == (N, Cout, H, W), y.shape

    ref = jax.block_until_ready(_reference(x, w1, b1, w2, b2))
    # bf16 matmul operands (f32 accumulate) -> relaxed tolerance vs. the f32 reference.
    assert jnp.allclose(y, ref, rtol=3e-2, atol=3e-2), float(jnp.max(jnp.abs(y - ref)))

    print("KERNEL_OK")
</pallas_src>

<mosaic_0001>
module attributes {stable_mosaic.version = 11 : i64} {
  func.func @_single_task_kernel(%arg0: i32, %arg1: memref<1x64x128xbf16, #tpu.memory_space<vmem>>, %arg2: memref<128x128xbf16, #tpu.memory_space<vmem>>, %arg3: memref<1x128xf32, #tpu.memory_space<vmem>>, %arg4: memref<128x128xbf16, #tpu.memory_space<vmem>>, %arg5: memref<1x128xf32, #tpu.memory_space<vmem>>, %arg6: memref<8x16x8xbf16, #tpu.memory_space<vmem>>, %arg7: memref<16x8xf32, #tpu.memory_space<smem>>, %arg8: memref<1x16x16x128xf32, #tpu.memory_space<vmem>>) attributes {dimension_semantics = [#tpu.dimension_semantics<parallel>], iteration_bounds = array<i64: 2>, scalar_prefetch = 0 : i64, scratch_operands = 0 : i64, tpu.core_type = #tpu.core_type<tc>, window_params = [{transform_indices = @transform_0, window_bounds = array<i64: 1, 64, 128>}, {pipeline_mode = #tpu.pipeline_mode<synchronous>, transform_indices = @transform_1, window_bounds = array<i64: 128, 128>}, {pipeline_mode = #tpu.pipeline_mode<synchronous>, transform_indices = @transform_2, window_bounds = array<i64: 1, 128>}, {pipeline_mode = #tpu.pipeline_mode<synchronous>, transform_indices = @transform_3, window_bounds = array<i64: 128, 128>}, {pipeline_mode = #tpu.pipeline_mode<synchronous>, transform_indices = @transform_4, window_bounds = array<i64: 1, 128>}, {pipeline_mode = #tpu.pipeline_mode<synchronous>, transform_indices = @transform_5, window_bounds = array<i64: 8, 16, 8>}, {transform_indices = @transform_6, window_bounds = array<i64: 16, 8>}, {transform_indices = @transform_7, window_bounds = array<i64: 1, 16, 16, 128>}]} {
    %c0 = arith.constant 0 : index
    %c0_0 = arith.constant 0 : index
    %c0_1 = arith.constant 0 : index
    %0 = vector.load %arg1[%c0, %c0_0, %c0_1] : memref<1x64x128xbf16, #tpu.memory_space<vmem>>, vector<1x64x128xbf16>
    %1 = vector.shape_cast %0 : vector<1x64x128xbf16> to vector<64x128xbf16>
    %c0_2 = arith.constant 0 : index
    %c0_3 = arith.constant 0 : index
    %2 = vector.load %arg2[%c0_2, %c0_3] : memref<128x128xbf16, #tpu.memory_space<vmem>>, vector<128x128xbf16>
    %cst = arith.constant dense<0.000000e+00> : vector<64x128xf32>
    %3 = tpu.matmul %1, %2, %cst {dimension_numbers = #tpu.dot_dimension_numbers<[1], [0], [0], [1], [0, 0, 1, 1], [], []>} : vector<64x128xbf16>, vector<128x128xbf16>, vector<64x128xf32> -> vector<64x128xf32>
    %c0_4 = arith.constant 0 : index
    %c0_5 = arith.constant 0 : index
    %4 = vector.load %arg3[%c0_4, %c0_5] : memref<1x128xf32, #tpu.memory_space<vmem>>, vector<1x128xf32>
    %5 = vector.broadcast %4 : vector<1x128xf32> to vector<64x128xf32>
    %6 = arith.addf %3, %5 : vector<64x128xf32>
    %cst_6 = arith.constant 0.000000e+00 : f32
    %7 = vector.broadcast %cst_6 : f32 to vector<64x128xf32>
    %8 = arith.maximumf %6, %7 : vector<64x128xf32>
    %9 = arith.truncf %8 : vector<64x128xf32> to vector<64x128xbf16>
    %c0_7 = arith.constant 0 : index
    %c0_8 = arith.constant 0 : index
    %10 = vector.load %arg4[%c0_7, %c0_8] : memref<128x128xbf16, #tpu.memory_space<vmem>>, vector<128x128xbf16>
    %cst_9 = arith.constant dense<0.000000e+00> : vector<64x128xf32>
    %11 = tpu.matmul %9, %10, %cst_9 {dimension_numbers = #tpu.dot_dimension_numbers<[1], [0], [0], [1], [0, 0, 1, 1], [], []>} : vector<64x128xbf16>, vector<128x128xbf16>, vector<64x128xf32> -> vector<64x128xf32>
    %c0_10 = arith.constant 0 : index
    %c0_11 = arith.constant 0 : index
    %12 = vector.load %arg5[%c0_10, %c0_11] : memref<1x128xf32, #tpu.memory_space<vmem>>, vector<1x128xf32>
    %13 = vector.broadcast %12 : vector<1x128xf32> to vector<64x128xf32>
    %14 = arith.addf %11, %13 : vector<64x128xf32>
    %15 = vector.shape_cast %14 : vector<64x128xf32> to vector<8x8x128xf32>
    %16 = arith.truncf %15 : vector<8x8x128xf32> to vector<8x8x128xbf16>
    %c0_12 = arith.constant 0 : index
    %c0_13 = arith.constant 0 : index
    %c0_14 = arith.constant 0 : index
    %17 = vector.load %arg6[%c0_12, %c0_13, %c0_14] : memref<8x16x8xbf16, #tpu.memory_space<vmem>>, vector<8x16x8xbf16>
    "tpu.trace_start"() <{level = 10 : i32, message = "hpv,hvc->hpc"}> : () -> ()
    %cst_15 = arith.constant dense<0.000000e+00> : vector<8x16x128xf32>
    %18 = tpu.matmul %17, %16, %cst_15 {dimension_numbers = #tpu.dot_dimension_numbers<[2], [1], [1], [2], [0, 0, 0, 1, 1, 2], [0], [0]>} : vector<8x16x8xbf16>, vector<8x8x128xbf16>, vector<8x16x128xf32> -> vector<8x16x128xf32>
    "tpu.trace_stop"() : () -> ()
    %c0_16 = arith.constant 0 : index
    %c0_17 = arith.constant 0 : index
    %19 = memref.load %arg7[%c0_16, %c0_17] : memref<16x8xf32, #tpu.memory_space<smem>>
    %20 = vector.extract_strided_slice %18 {offsets = [0, 0, 0], sizes = [1, 16, 128], strides = [1, 1, 1]} : vector<8x16x128xf32> to vector<1x16x128xf32>
    %21 = vector.shape_cast %20 : vector<1x16x128xf32> to vector<16x128xf32>
    %22 = vector.broadcast %19 : f32 to vector<16x128xf32>
    %23 = arith.mulf %22, %21 : vector<16x128xf32>
    %c0_18 = arith.constant 0 : index
    %c1 = arith.constant 1 : index
    %24 = memref.load %arg7[%c0_18, %c1] : memref<16x8xf32, #tpu.memory_space<smem>>
    %25 = vector.extract_strided_slice %18 {offsets = [1, 0, 0], sizes = [1, 16, 128], strides = [1, 1, 1]} : vector<8x16x128xf32> to vector<1x16x128xf32>
    %26 = vector.shape_cast %25 : vector<1x16x128xf32> to vector<16x128xf32>
    %27 = vector.broadcast %24 : f32 to vector<16x128xf32>
    %28 = arith.mulf %27, %26 : vector<16x128xf32>
    %29 = arith.addf %23, %28 : vector<16x128xf32>
    %c0_19 = arith.constant 0 : index
    %c2 = arith.constant 2 : index
    %30 = memref.load %arg7[%c0_19, %c2] : memref<16x8xf32, #tpu.memory_space<smem>>
    %31 = vector.extract_strided_slice %18 {offsets = [2, 0, 0], sizes = [1, 16, 128], strides = [1, 1, 1]} : vector<8x16x128xf32> to vector<1x16x128xf32>
    %32 = vector.shape_cast %31 : vector<1x16x128xf32> to vector<16x128xf32>
    %33 = vector.broadcast %30 : f32 to vector<16x128xf32>
    %34 = arith.mulf %33, %32 : vector<16x128xf32>
    %35 = arith.addf %29, %34 : vector<16x128xf32>
    %c0_20 = arith.constant 0 : index
    %c3 = arith.constant 3 : index
    %36 = memref.load %arg7[%c0_20, %c3] : memref<16x8xf32, #tpu.memory_space<smem>>
    %37 = vector.extract_strided_slice %18 {offsets = [3, 0, 0], sizes = [1, 16, 128], strides = [1, 1, 1]} : vector<8x16x128xf32> to vector<1x16x128xf32>
    %38 = vector.shape_cast %37 : vector<1x16x128xf32> to vector<16x128xf32>
    %39 = vector.broadcast %36 : f32 to vector<16x128xf32>
    %40 = arith.mulf %39, %38 : vector<16x128xf32>
    %41 = arith.addf %35, %40 : vector<16x128xf32>
    %c0_21 = arith.constant 0 : index
    %c4 = arith.constant 4 : index
    %42 = memref.load %arg7[%c0_21, %c4] : memref<16x8xf32, #tpu.memory_space<smem>>
    %43 = vector.extract_strided_slice %18 {offsets = [4, 0, 0], sizes = [1, 16, 128], strides = [1, 1, 1]} : vector<8x16x128xf32> to vector<1x16x128xf32>
    %44 = vector.shape_cast %43 : vector<1x16x128xf32> to vector<16x128xf32>
    %45 = vector.broadcast %42 : f32 to vector<16x128xf32>
    %46 = arith.mulf %45, %44 : vector<16x128xf32>
    %47 = arith.addf %41, %46 : vector<16x128xf32>
    %c0_22 = arith.constant 0 : index
    %c5 = arith.constant 5 : index
    %48 = memref.load %arg7[%c0_22, %c5] : memref<16x8xf32, #tpu.memory_space<smem>>
    %49 = vector.extract_strided_slice %18 {offsets = [5, 0, 0], sizes = [1, 16, 128], strides = [1, 1, 1]} : vector<8x16x128xf32> to vector<1x16x128xf32>
    %50 = vector.shape_cast %49 : vector<1x16x128xf32> to vector<16x128xf32>
    %51 = vector.broadcast %48 : f32 to vector<16x128xf32>
    %52 = arith.mulf %51, %50 : vector<16x128xf32>
    %53 = arith.addf %47, %52 : vector<16x128xf32>
    %c0_23 = arith.constant 0 : index
    %c6 = arith.constant 6 : index
    %54 = memref.load %arg7[%c0_23, %c6] : memref<16x8xf32, #tpu.memory_space<smem>>
    %55 = vector.extract_strided_slice %18 {offsets = [6, 0, 0], sizes = [1, 16, 128], strides = [1, 1, 1]} : vector<8x16x128xf32> to vector<1x16x128xf32>
    %56 = vector.shape_cast %55 : vector<1x16x128xf32> to vector<16x128xf32>
    %57 = vector.broadcast %54 : f32 to vector<16x128xf32>
    %58 = arith.mulf %57, %56 : vector<16x128xf32>
    %59 = arith.addf %53, %58 : vector<16x128xf32>
    %c0_24 = arith.constant 0 : index
    %c7 = arith.constant 7 : index
    %60 = memref.load %arg7[%c0_24, %c7] : memref<16x8xf32, #tpu.memory_space<smem>>
    %61 = vector.extract_strided_slice %18 {offsets = [7, 0, 0], sizes = [1, 16, 128], strides = [1, 1, 1]} : vector<8x16x128xf32> to vector<1x16x128xf32>
    %62 = vector.shape_cast %61 : vector<1x16x128xf32> to vector<16x128xf32>
    %63 = vector.broadcast %60 : f32 to vector<16x128xf32>
    %64 = arith.mulf %63, %62 : vector<16x128xf32>
    %65 = arith.addf %59, %64 : vector<16x128xf32>
    %c0_25 = arith.constant 0 : index
    %c0_26 = arith.constant 0 : index
    %c0_27 = arith.constant 0 : index
    %c0_28 = arith.constant 0 : index
    %66 = vector.load %arg8[%c0_25, %c0_26, %c0_27, %c0_28] : memref<1x16x16x128xf32, #tpu.memory_space<vmem>>, vector<1x1x16x128xf32>
    %67 = vector.shape_cast %66 : vector<1x1x16x128xf32> to vector<16x128xf32>
    %68 = vector.shape_cast %65 : vector<16x128xf32> to vector<1x1x16x128xf32>
    tpu.vector_store %arg8[%c0_25, %c0_26, %c0_27, %c0_28], %68 {strides = array<i32>} : memref<1x16x16x128xf32, #tpu.memory_space<vmem>>, vector<1x1x16x128xf32>,
    %c1_29 = arith.constant 1 : index
    %c0_30 = arith.constant 0 : index
    %69 = memref.load %arg7[%c1_29, %c0_30] : memref<16x8xf32, #tpu.memory_space<smem>>
    %70 = vector.extract_strided_slice %18 {offsets = [0, 0, 0], sizes = [1, 16, 128], strides = [1, 1, 1]} : vector<8x16x128xf32> to vector<1x16x128xf32>
    %71 = vector.shape_cast %70 : vector<1x16x128xf32> to vector<16x128xf32>
    %72 = vector.broadcast %69 : f32 to vector<16x128xf32>
    %73 = arith.mulf %72, %71 : vector<16x128xf32>
    %c1_31 = arith.constant 1 : index
    %c1_32 = arith.constant 1 : index
    %74 = memref.load %arg7[%c1_31, %c1_32] : memref<16x8xf32, #tpu.memory_space<smem>>
    %75 = vector.extract_strided_slice %18 {offsets = [1, 0, 0], sizes = [1, 16, 128], strides = [1, 1, 1]} : vector<8x16x128xf32> to vector<1x16x128xf32>
    %76 = vector.shape_cast %75 : vector<1x16x128xf32> to vector<16x128xf32>
    %77 = vector.broadcast %74 : f32 to vector<16x128xf32>
    %78 = arith.mulf %77, %76 : vector<16x128xf32>
    %79 = arith.addf %73, %78 : vector<16x128xf32>
    %c1_33 = arith.constant 1 : index
    %c2_34 = arith.constant 2 : index
    %80 = memref.load %arg7[%c1_33, %c2_34] : memref<16x8xf32, #tpu.memory_space<smem>>
    %81 = vector.extract_strided_slice %18 {offsets = [2, 0, 0], sizes = [1, 16, 128], strides = [1, 1, 1]} : vector<8x16x128xf32> to vector<1x16x128xf32>
    %82 = vector.shape_cast %81 : vector<1x16x128xf32> to vector<16x128xf32>
    %83 = vector.broadcast %80 : f32 to vector<16x128xf32>
    %84 = arith.mulf %83, %82 : vector<16x128xf32>
    %85 = arith.addf %79, %84 : vector<16x128xf32>
    %c1_35 = arith.constant 1 : index
    %c3_36 = arith.constant 3 : index
    %86 = memref.load %arg7[%c1_35, %c3_36] : memref<16x8xf32, #tpu.memory_space<smem>>
    %87 = vector.extract_strided_slice %18 {offsets = [3, 0, 0], sizes = [1, 16, 128], strides = [1, 1, 1]} : vector<8x16x128xf32> to vector<1x16x128xf32>
    %88 = vector.shape_cast %87 : vector<1x16x128xf32> to vector<16x128xf32>
    %89 = vector.broadcast %86 : f32 to vector<16x128xf32>
    %90 = arith.mulf %89, %88 : vector<16x128xf32>
    %91 = arith.addf %85, %90 : vector<16x128xf32>
    %c1_37 = arith.constant 1 : index
    %c4_38 = arith.constant 4 : index
    %92 = memref.load %arg7[%c1_37, %c4_38] : memref<16x8xf32, #tpu.memory_space<smem>>
    %93 = vector.extract_strided_slice %18 {offsets = [4, 0, 0], sizes = [1, 16, 128], strides = [1, 1, 1]} : vector<8x16x128xf32> to vector<1x16x128xf32>
    %94 = vector.shape_cast %93 : vector<1x16x128xf32> to vector<16x128xf32>
    %95 = vector.broadcast %92 : f32 to vector<16x128xf32>
    %96 = arith.mulf %95, %94 : vector<16x128xf32>
    %97 = arith.addf %91, %96 : vector<16x128xf32>
    %c1_39 = arith.constant 1 : index
    %c5_40 = arith.constant 5 : index
    %98 = memref.load %arg7[%c1_39, %c5_40] : memref<16x8xf32, #tpu.memory_space<smem>>
    %99 = vector.extract_strided_slice %18 {offsets = [5, 0, 0], sizes = [1, 16, 128], strides = [1, 1, 1]} : vector<8x16x128xf32> to vector<1x16x128xf32>
    %100 = vector.shape_cast %99 : vector<1x16x128xf32> to vector<16x128xf32>
    %101 = vector.broadcast %98 : f32 to vector<16x128xf32>
    %102 = arith.mulf %101, %100 : vector<16x128xf32>
    %103 = arith.addf %97, %102 : vector<16x128xf32>
    %c1_41 = arith.constant 1 : index
    %c6_42 = arith.constant 6 : index
    %104 = memref.load %arg7[%c1_41, %c6_42] : memref<16x8xf32, #tpu.memory_space<smem>>
    %105 = vector.extract_strided_slice %18 {offsets = [6, 0, 0], sizes = [1, 16, 128], strides = [1, 1, 1]} : vector<8x16x128xf32> to vector<1x16x128xf32>
    %106 = vector.shape_cast %105 : vector<1x16x128xf32> to vector<16x128xf32>
    %107 = vector.broadcast %104 : f32 to vector<16x128xf32>
    %108 = arith.mulf %107, %106 : vector<16x128xf32>
    %109 = arith.addf %103, %108 : vector<16x128xf32>
    %c1_43 = arith.constant 1 : index
    %c7_44 = arith.constant 7 : index
    %110 = memref.load %arg7[%c1_43, %c7_44] : memref<16x8xf32, #tpu.memory_space<smem>>
    %111 = vector.extract_strided_slice %18 {offsets = [7, 0, 0], sizes = [1, 16, 128], strides = [1, 1, 1]} : vector<8x16x128xf32> to vector<1x16x128xf32>
    %112 = vector.shape_cast %111 : vector<1x16x128xf32> to vector<16x128xf32>
    %113 = vector.broadcast %110 : f32 to vector<16x128xf32>
    %114 = arith.mulf %113, %112 : vector<16x128xf32>
    %115 = arith.addf %109, %114 : vector<16x128xf32>
    %c0_45 = arith.constant 0 : index
    %c1_46 = arith.constant 1 : index
    %c0_47 = arith.constant 0 : index
    %c0_48 = arith.constant 0 : index
    %116 = vector.load %arg8[%c0_45, %c1_46, %c0_47, %c0_48] : memref<1x16x16x128xf32, #tpu.memory_space<vmem>>, vector<1x1x16x128xf32>
    %117 = vector.shape_cast %116 : vector<1x1x16x128xf32> to vector<16x128xf32>
    %118 = vector.shape_cast %115 : vector<16x128xf32> to vector<1x1x16x128xf32>
    tpu.vector_store %arg8[%c0_45, %c1_46, %c0_47, %c0_48], %118 {strides = array<i32>} : memref<1x16x16x128xf32, #tpu.memory_space<vmem>>, vector<1x1x16x128xf32>,
    %c2_49 = arith.constant 2 : index
    %c0_50 = arith.constant 0 : index
    %119 = memref.load %arg7[%c2_49, %c0_50] : memref<16x8xf32, #tpu.memory_space<smem>>
    %120 = vector.extract_strided_slice %18 {offsets = [0, 0, 0], sizes = [1, 16, 128], strides = [1, 1, 1]} : vector<8x16x128xf32> to vector<1x16x128xf32>
    %121 = vector.shape_cast %120 : vector<1x16x128xf32> to vector<16x128xf32>
    %122 = vector.broadcast %119 : f32 to vector<16x128xf32>
    %123 = arith.mulf %122, %121 : vector<16x128xf32>
    %c2_51 = arith.constant 2 : index
    %c1_52 = arith.constant 1 : index
    %124 = memref.load %arg7[%c2_51, %c1_52] : memref<16x8xf32, #tpu.memory_space<smem>>
    %125 = vector.extract_strided_slice %18 {offsets = [1, 0, 0], sizes = [1, 16, 128], strides = [1, 1, 1]} : vector<8x16x128xf32> to vector<1x16x128xf32>
    %126 = vector.shape_cast %125 : vector<1x16x128xf32> to vector<16x128xf32>
    %127 = vector.broadcast %124 : f32 to vector<16x128xf32>
    %128 = arith.mulf %127, %126 : vector<16x128xf32>
    %129 = arith.addf %123, %128 : vector<16x128xf32>
    %c2_53 = arith.constant 2 : index
    %c2_54 = arith.constant 2 : index
    %130 = memref.load %arg7[%c2_53, %c2_54] : memref<16x8xf32, #tpu.memory_space<smem>>
    %131 = vector.extract_strided_slice %18 {offsets = [2, 0, 0], sizes = [1, 16, 128], strides = [1, 1, 1]} : vector<8x16x128xf32> to vector<1x16x128xf32>
    %132 = vector.shape_cast %131 : vector<1x16x128xf32> to vector<16x128xf32>
    %133 = vector.broadcast %130 : f32 to vector<16x128xf32>
    %134 = arith.mulf %133, %132 : vector<16x128xf32>
    %135 = arith.addf %129, %134 : vector<16x128xf32>
    %c2_55 = arith.constant 2 : index
    %c3_56 = arith.constant 3 : index
    %136 = memref.load %arg7[%c2_55, %c3_56] : memref<16x8xf32, #tpu.memory_space<smem>>
    %137 = vector.extract_strided_slice %18 {offsets = [3, 0, 0], sizes = [1, 16, 128], strides = [1, 1, 1]} : vector<8x16x128xf32> to vector<1x16x128xf32>
    %138 = vector.shape_cast %137 : vector<1x16x128xf32> to vector<16x128xf32>
    %139 = vector.broadcast %136 : f32 to vector<16x128xf32>
    %140 = arith.mulf %139, %138 : vector<16x128xf32>
    %141 = arith.addf %135, %140 : vector<16x128xf32>
    %c2_57 = arith.constant 2 : index
    %c4_58 = arith.constant 4 : index
    %142 = memref.load %arg7[%c2_57, %c4_58] : memref<16x8xf32, #tpu.memory_space<smem>>
    %143 = vector.extract_strided_slice %18 {offsets = [4, 0, 0], sizes = [1, 16, 128], strides = [1, 1, 1]} : vector<8x16x128xf32> to vector<1x16x128xf32>
    %144 = vector.shape_cast %143 : vector<1x16x128xf32> to vector<16x128xf32>
    %145 = vector.broadcast %142 : f32 to vector<16x128xf32>
    %146 = arith.mulf %145, %144 : vector<16x128xf32>
    %147 = arith.addf %141, %146 : vector<16x128xf32>
    %c2_59 = arith.constant 2 : index
    %c5_60 = arith.constant 5 : index
    %148 = memref.load %arg7[%c2_59, %c5_60] : memref<16x8xf32, #tpu.memory_space<smem>>
    %149 = vector.extract_strided_slice %18 {offsets = [5, 0, 0], sizes = [1, 16, 128], strides = [1, 1, 1]} : vector<8x16x128xf32> to vector<1x16x128xf32>
    %150 = vector.shape_cast %149 : vector<1x16x128xf32> to vector<16x128xf32>
    %151 = vector.broadcast %148 : f32 to vector<16x128xf32>
    %152 = arith.mulf %151, %150 : vector<16x128xf32>
    %153 = arith.addf %147, %152 : vector<16x128xf32>
    %c2_61 = arith.constant 2 : index
    %c6_62 = arith.constant 6 : index
    %154 = memref.load %arg7[%c2_61, %c6_62] : memref<16x8xf32, #tpu.memory_space<smem>>
    %155 = vector.extract_strided_slice %18 {offsets = [6, 0, 0], sizes = [1, 16, 128], strides = [1, 1, 1]} : vector<8x16x128xf32> to vector<1x16x128xf32>
    %156 = vector.shape_cast %155 : vector<1x16x128xf32> to vector<16x128xf32>
    %157 = vector.broadcast %154 : f32 to vector<16x128xf32>
    %158 = arith.mulf %157, %156 : vector<16x128xf32>
    %159 = arith.addf %153, %158 : vector<16x128xf32>
    %c2_63 = arith.constant 2 : index
    %c7_64 = arith.constant 7 : index
    %160 = memref.load %arg7[%c2_63, %c7_64] : memref<16x8xf32, #tpu.memory_space<smem>>
    %161 = vector.extract_strided_slice %18 {offsets = [7, 0, 0], sizes = [1, 16, 128], strides = [1, 1, 1]} : vector<8x16x128xf32> to vector<1x16x128xf32>
    %162 = vector.shape_cast %161 : vector<1x16x128xf32> to vector<16x128xf32>
    %163 = vector.broadcast %160 : f32 to vector<16x128xf32>
    %164 = arith.mulf %163, %162 : vector<16x128xf32>
    %165 = arith.addf %159, %164 : vector<16x128xf32>
    %c0_65 = arith.constant 0 : index
    %c2_66 = arith.constant 2 : index
    %c0_67 = arith.constant 0 : index
    %c0_68 = arith.constant 0 : index
    %166 = vector.load %arg8[%c0_65, %c2_66, %c0_67, %c0_68] : memref<1x16x16x128xf32, #tpu.memory_space<vmem>>, vector<1x1x16x128xf32>
    %167 = vector.shape_cast %166 : vector<1x1x16x128xf32> to vector<16x128xf32>
    %168 = vector.shape_cast %165 : vector<16x128xf32> to vector<1x1x16x128xf32>
    tpu.vector_store %arg8[%c0_65, %c2_66, %c0_67, %c0_68], %168 {strides = array<i32>} : memref<1x16x16x128xf32, #tpu.memory_space<vmem>>, vector<1x1x16x128xf32>,
    %c3_69 = arith.constant 3 : index
    %c0_70 = arith.constant 0 : index
    %169 = memref.load %arg7[%c3_69, %c0_70] : memref<16x8xf32, #tpu.memory_space<smem>>
    %170 = vector.extract_strided_slice %18 {offsets = [0, 0, 0], sizes = [1, 16, 128], strides = [1, 1, 1]} : vector<8x16x128xf32> to vector<1x16x128xf32>
    %171 = vector.shape_cast %170 : vector<1x16x128xf32> to vector<16x128xf32>
    %172 = vector.broadcast %169 : f32 to vector<16x128xf32>
    %173 = arith.mulf %172, %171 : vector<16x128xf32>
    %c3_71 = arith.constant 3 : index
    %c1_72 = arith.constant 1 : index
    %174 = memref.load %arg7[%c3_71, %c1_72] : memref<16x8xf32, #tpu.memory_space<smem>>
    %175 = vector.extract_strided_slice %18 {offsets = [1, 0, 0], sizes = [1, 16, 128], strides = [1, 1, 1]} : vector<8x16x128xf32> to vector<1x16x128xf32>
    %176 = vector.shape_cast %175 : vector<1x16x128xf32> to vector<16x128xf32>
    %177 = vector.broadcast %174 : f32 to vector<16x128xf32>
    %178 = arith.mulf %177, %176 : vector<16x128xf32>
    %179 = arith.addf %173, %178 : vector<16x128xf32>
    %c3_73 = arith.constant 3 : index
    %c2_74 = arith.constant 2 : index
    %180 = memref.load %arg7[%c3_73, %c2_74] : memref<16x8xf32, #tpu.memory_space<smem>>
    %181 = vector.extract_strided_slice %18 {offsets = [2, 0, 0], sizes = [1, 16, 128], strides = [1, 1, 1]} : vector<8x16x128xf32> to vector<1x16x128xf32>
    %182 = vector.shape_cast %181 : vector<1x16x128xf32> to vector<16x128xf32>
    %183 = vector.broadcast %180 : f32 to vector<16x128xf32>
    %184 = arith.mulf %183, %182 : vector<16x128xf32>
    %185 = arith.addf %179, %184 : vector<16x128xf32>
    %c3_75 = arith.constant 3 : index
    %c3_76 = arith.constant 3 : index
    %186 = memref.load %arg7[%c3_75, %c3_76] : memref<16x8xf32, #tpu.memory_space<smem>>
    %187 = vector.extract_strided_slice %18 {offsets = [3, 0, 0], sizes = [1, 16, 128], strides = [1, 1, 1]} : vector<8x16x128xf32> to vector<1x16x128xf32>
    %188 = vector.shape_cast %187 : vector<1x16x128xf32> to vector<16x128xf32>
    %189 = vector.broadcast %186 : f32 to vector<16x128xf32>
    %190 = arith.mulf %189, %188 : vector<16x128xf32>
    %191 = arith.addf %185, %190 : vector<16x128xf32>
    %c3_77 = arith.constant 3 : index
    %c4_78 = arith.constant 4 : index
    %192 = memref.load %arg7[%c3_77, %c4_78] : memref<16x8xf32, #tpu.memory_space<smem>>
    %193 = vector.extract_strided_slice %18 {offsets = [4, 0, 0], sizes = [1, 16, 128], strides = [1, 1, 1]} : vector<8x16x128xf32> to vector<1x16x128xf32>
    %194 = vector.shape_cast %193 : vector<1x16x128xf32> to vector<16x128xf32>
    %195 = vector.broadcast %192 : f32 to vector<16x128xf32>
    %196 = arith.mulf %195, %194 : vector<16x128xf32>
    %197 = arith.addf %191, %196 : vector<16x128xf32>
    %c3_79 = arith.constant 3 : index
    %c5_80 = arith.constant 5 : index
    %198 = memref.load %arg7[%c3_79, %c5_80] : memref<16x8xf32, #tpu.memory_space<smem>>
    %199 = vector.extract_strided_slice %18 {offsets = [5, 0, 0], sizes = [1, 16, 128], strides = [1, 1, 1]} : vector<8x16x128xf32> to vector<1x16x128xf32>
    %200 = vector.shape_cast %199 : vector<1x16x128xf32> to vector<16x128xf32>
    %201 = vector.broadcast %198 : f32 to vector<16x128xf32>
    %202 = arith.mulf %201, %200 : vector<16x128xf32>
    %203 = arith.addf %197, %202 : vector<16x128xf32>
    %c3_81 = arith.constant 3 : index
    %c6_82 = arith.constant 6 : index
    %204 = memref.load %arg7[%c3_81, %c6_82] : memref<16x8xf32, #tpu.memory_space<smem>>
    %205 = vector.extract_strided_slice %18 {offsets = [6, 0, 0], sizes = [1, 16, 128], strides = [1, 1, 1]} : vector<8x16x128xf32> to vector<1x16x128xf32>
    %206 = vector.shape_cast %205 : vector<1x16x128xf32> to vector<16x128xf32>
    %207 = vector.broadcast %204 : f32 to vector<16x128xf32>
    %208 = arith.mulf %207, %206 : vector<16x128xf32>
    %209 = arith.addf %203, %208 : vector<16x128xf32>
    %c3_83 = arith.constant 3 : index
    %c7_84 = arith.constant 7 : index
    %210 = memref.load %arg7[%c3_83, %c7_84] : memref<16x8xf32, #tpu.memory_space<smem>>
    %211 = vector.extract_strided_slice %18 {offsets = [7, 0, 0], sizes = [1, 16, 128], strides = [1, 1, 1]} : vector<8x16x128xf32> to vector<1x16x128xf32>
    %212 = vector.shape_cast %211 : vector<1x16x128xf32> to vector<16x128xf32>
    %213 = vector.broadcast %210 : f32 to vector<16x128xf32>
    %214 = arith.mulf %213, %212 : vector<16x128xf32>
    %215 = arith.addf %209, %214 : vector<16x128xf32>
    %c0_85 = arith.constant 0 : index
    %c3_86 = arith.constant 3 : index
    %c0_87 = arith.constant 0 : index
    %c0_88 = arith.constant 0 : index
    %216 = vector.load %arg8[%c0_85, %c3_86, %c0_87, %c0_88] : memref<1x16x16x128xf32, #tpu.memory_space<vmem>>, vector<1x1x16x128xf32>
    %217 = vector.shape_cast %216 : vector<1x1x16x128xf32> to vector<16x128xf32>
    %218 = vector.shape_cast %215 : vector<16x128xf32> to vector<1x1x16x128xf32>
    tpu.vector_store %arg8[%c0_85, %c3_86, %c0_87, %c0_88], %218 {strides = array<i32>} : memref<1x16x16x128xf32, #tpu.memory_space<vmem>>, vector<1x1x16x128xf32>,
    %c4_89 = arith.constant 4 : index
    %c0_90 = arith.constant 0 : index
    %219 = memref.load %arg7[%c4_89, %c0_90] : memref<16x8xf32, #tpu.memory_space<smem>>
    %220 = vector.extract_strided_slice %18 {offsets = [0, 0, 0], sizes = [1, 16, 128], strides = [1, 1, 1]} : vector<8x16x128xf32> to vector<1x16x128xf32>
    %221 = vector.shape_cast %220 : vector<1x16x128xf32> to vector<16x128xf32>
    %222 = vector.broadcast %219 : f32 to vector<16x128xf32>
    %223 = arith.mulf %222, %221 : vector<16x128xf32>
    %c4_91 = arith.constant 4 : index
    %c1_92 = arith.constant 1 : index
    %224 = memref.load %arg7[%c4_91, %c1_92] : memref<16x8xf32, #tpu.memory_space<smem>>
    %225 = vector.extract_strided_slice %18 {offsets = [1, 0, 0], sizes = [1, 16, 128], strides = [1, 1, 1]} : vector<8x16x128xf32> to vector<1x16x128xf32>
    %226 = vector.shape_cast %225 : vector<1x16x128xf32> to vector<16x128xf32>
    %227 = vector.broadcast %224 : f32 to vector<16x128xf32>
    %228 = arith.mulf %227, %226 : vector<16x128xf32>
    %229 = arith.addf %223, %228 : vector<16x128xf32>
    %c4_93 = arith.constant 4 : index
    %c2_94 = arith.constant 2 : index
    %230 = memref.load %arg7[%c4_93, %c2_94] : memref<16x8xf32, #tpu.memory_space<smem>>
    %231 = vector.extract_strided_slice %18 {offsets = [2, 0, 0], sizes = [1, 16, 128], strides = [1, 1, 1]} : vector<8x16x128xf32> to vector<1x16x128xf32>
    %232 = vector.shape_cast %231 : vector<1x16x128xf32> to vector<16x128xf32>
    %233 = vector.broadcast %230 : f32 to vector<16x128xf32>
    %234 = arith.mulf %233, %232 : vector<16x128xf32>
    %235 = arith.addf %229, %234 : vector<16x128xf32>
    %c4_95 = arith.constant 4 : index
    %c3_96 = arith.constant 3 : index
    %236 = memref.load %arg7[%c4_95, %c3_96] : memref<16x8xf32, #tpu.memory_space<smem>>
    %237 = vector.extract_strided_slice %18 {offsets = [3, 0, 0], sizes = [1, 16, 128], strides = [1, 1, 1]} : vector<8x16x128xf32> to vector<1x16x128xf32>
    %238 = vector.shape_cast %237 : vector<1x16x128xf32> to vector<16x128xf32>
    %239 = vector.broadcast %236 : f32 to vector<16x128xf32>
    %240 = arith.mulf %239, %238 : vector<16x128xf32>
    %241 = arith.addf %235, %240 : vector<16x128xf32>
    %c4_97 = arith.constant 4 : index
    %c4_98 = arith.constant 4 : index
    %242 = memref.load %arg7[%c4_97, %c4_98] : memref<16x8xf32, #tpu.memory_space<smem>>
    %243 = vector.extract_strided_slice %18 {offsets = [4, 0, 0], sizes = [1, 16, 128], strides = [1, 1, 1]} : vector<8x16x128xf32> to vector<1x16x128xf32>
    %244 = vector.shape_cast %243 : vector<1x16x128xf32> to vector<16x128xf32>
    %245 = vector.broadcast %242 : f32 to vector<16x128xf32>
    %246 = arith.mulf %245, %244 : vector<16x128xf32>
    %247 = arith.addf %241, %246 : vector<16x128xf32>
    %c4_99 = arith.constant 4 : index
    %c5_100 = arith.constant 5 : index
    %248 = memref.load %arg7[%c4_99, %c5_100] : memref<16x8xf32, #tpu.memory_space<smem>>
    %249 = vector.extract_strided_slice %18 {offsets = [5, 0, 0], sizes = [1, 16, 128], strides = [1, 1, 1]} : vector<8x16x128xf32> to vector<1x16x128xf32>
    %250 = vector.shape_cast %249 : vector<1x16x128xf32> to vector<16x128xf32>
    %251 = vector.broadcast %248 : f32 to vector<16x128xf32>
    %252 = arith.mulf %251, %250 : vector<16x128xf32>
    %253 = arith.addf %247, %252 : vector<16x128xf32>
    %c4_101 = arith.constant 4 : index
    %c6_102 = arith.constant 6 : index
    %254 = memref.load %arg7[%c4_101, %c6_102] : memref<16x8xf32, #tpu.memory_space<smem>>
    %255 = vector.extract_strided_slice %18 {offsets = [6, 0, 0], sizes = [1, 16, 128], strides = [1, 1, 1]} : vector<8x16x128xf32> to vector<1x16x128xf32>
    %256 = vector.shape_cast %255 : vector<1x16x128xf32> to vector<16x128xf32>
    %257 = vector.broadcast %254 : f32 to vector<16x128xf32>
    %258 = arith.mulf %257, %256 : vector<16x128xf32>
    %259 = arith.addf %253, %258 : vector<16x128xf32>
    %c4_103 = arith.constant 4 : index
    %c7_104 = arith.constant 7 : index
    %260 = memref.load %arg7[%c4_103, %c7_104] : memref<16x8xf32, #tpu.memory_space<smem>>
    %261 = vector.extract_strided_slice %18 {offsets = [7, 0, 0], sizes = [1, 16, 128], strides = [1, 1, 1]} : vector<8x16x128xf32> to vector<1x16x128xf32>
    %262 = vector.shape_cast %261 : vector<1x16x128xf32> to vector<16x128xf32>
    %263 = vector.broadcast %260 : f32 to vector<16x128xf32>
    %264 = arith.mulf %263, %262 : vector<16x128xf32>
    %265 = arith.addf %259, %264 : vector<16x128xf32>
    %c0_105 = arith.constant 0 : index
    %c4_106 = arith.constant 4 : index
    %c0_107 = arith.constant 0 : index
    %c0_108 = arith.constant 0 : index
    %266 = vector.load %arg8[%c0_105, %c4_106, %c0_107, %c0_108] : memref<1x16x16x128xf32, #tpu.memory_space<vmem>>, vector<1x1x16x128xf32>
    %267 = vector.shape_cast %266 : vector<1x1x16x128xf32> to vector<16x128xf32>
    %268 = vector.shape_cast %265 : vector<16x128xf32> to vector<1x1x16x128xf32>
    tpu.vector_store %arg8[%c0_105, %c4_106, %c0_107, %c0_108], %268 {strides = array<i32>} : memref<1x16x16x128xf32, #tpu.memory_space<vmem>>, vector<1x1x16x128xf32>,
    %c5_109 = arith.constant 5 : index
    %c0_110 = arith.constant 0 : index
    %269 = memref.load %arg7[%c5_109, %c0_110] : memref<16x8xf32, #tpu.memory_space<smem>>
    %270 = vector.extract_strided_slice %18 {offsets = [0, 0, 0], sizes = [1, 16, 128], strides = [1, 1, 1]} : vector<8x16x128xf32> to vector<1x16x128xf32>
    %271 = vector.shape_cast %270 : vector<1x16x128xf32> to vector<16x128xf32>
    %272 = vector.broadcast %269 : f32 to vector<16x128xf32>
    %273 = arith.mulf %272, %271 : vector<16x128xf32>
    %c5_111 = arith.constant 5 : index
    %c1_112 = arith.constant 1 : index
    %274 = memref.load %arg7[%c5_111, %c1_112] : memref<16x8xf32, #tpu.memory_space<smem>>
    %275 = vector.extract_strided_slice %18 {offsets = [1, 0, 0], sizes = [1, 16, 128], strides = [1, 1, 1]} : vector<8x16x128xf32> to vector<1x16x128xf32>
    %276 = vector.shape_cast %275 : vector<1x16x128xf32> to vector<16x128xf32>
    %277 = vector.broadcast %274 : f32 to vector<16x128xf32>
    %278 = arith.mulf %277, %276 : vector<16x128xf32>
    %279 = arith.addf %273, %278 : vector<16x128xf32>
    %c5_113 = arith.constant 5 : index
    %c2_114 = arith.constant 2 : index
    %280 = memref.load %arg7[%c5_113, %c2_114] : memref<16x8xf32, #tpu.memory_space<smem>>
    %281 = vector.extract_strided_slice %18 {offsets = [2, 0, 0], sizes = [1, 16, 128], strides = [1, 1, 1]} : vector<8x16x128xf32> to vector<1x16x128xf32>
    %282 = vector.shape_cast %281 : vector<1x16x128xf32> to vector<16x128xf32>
    %283 = vector.broadcast %280 : f32 to vector<16x128xf32>
    %284 = arith.mulf %283, %282 : vector<16x128xf32>
    %285 = arith.addf %279, %284 : vector<16x128xf32>
    %c5_115 = arith.constant 5 : index
    %c3_116 = arith.constant 3 : index
    %286 = memref.load %arg7[%c5_115, %c3_116] : memref<16x8xf32, #tpu.memory_space<smem>>
    %287 = vector.extract_strided_slice %18 {offsets = [3, 0, 0], sizes = [1, 16, 128], strides = [1, 1, 1]} : vector<8x16x128xf32> to vector<1x16x128xf32>
    %288 = vector.shape_cast %287 : vector<1x16x128xf32> to vector<16x128xf32>
    %289 = vector.broadcast %286 : f32 to vector<16x128xf32>
    %290 = arith.mulf %289, %288 : vector<16x128xf32>
    %291 = arith.addf %285, %290 : vector<16x128xf32>
    %c5_117 = arith.constant 5 : index
    %c4_118 = arith.constant 4 : index
    %292 = memref.load %arg7[%c5_117, %c4_118] : memref<16x8xf32, #tpu.memory_space<smem>>
    %293 = vector.extract_strided_slice %18 {offsets = [4, 0, 0], sizes = [1, 16, 128], strides = [1, 1, 1]} : vector<8x16x128xf32> to vector<1x16x128xf32>
    %294 = vector.shape_cast %293 : vector<1x16x128xf32> to vector<16x128xf32>
    %295 = vector.broadcast %292 : f32 to vector<16x128xf32>
    %296 = arith.mulf %295, %294 : vector<16x128xf32>
    %297 = arith.addf %291, %296 : vector<16x128xf32>
    %c5_119 = arith.constant 5 : index
    %c5_120 = arith.constant 5 : index
    %298 = memref.load %arg7[%c5_119, %c5_120] : memref<16x8xf32, #tpu.memory_space<smem>>
    %299 = vector.extract_strided_slice %18 {offsets = [5, 0, 0], sizes = [1, 16, 128], strides = [1, 1, 1]} : vector<8x16x128xf32> to vector<1x16x128xf32>
    %300 = vector.shape_cast %299 : vector<1x16x128xf32> to vector<16x128xf32>
    %301 = vector.broadcast %298 : f32 to vector<16x128xf32>
    %302 = arith.mulf %301, %300 : vector<16x128xf32>
    %303 = arith.addf %297, %302 : vector<16x128xf32>
    %c5_121 = arith.constant 5 : index
    %c6_122 = arith.constant 6 : index
    %304 = memref.load %arg7[%c5_121, %c6_122] : memref<16x8xf32, #tpu.memory_space<smem>>
    %305 = vector.extract_strided_slice %18 {offsets = [6, 0, 0], sizes = [1, 16, 128], strides = [1, 1, 1]} : vector<8x16x128xf32> to vector<1x16x128xf32>
    %306 = vector.shape_cast %305 : vector<1x16x128xf32> to vector<16x128xf32>
    %307 = vector.broadcast %304 : f32 to vector<16x128xf32>
    %308 = arith.mulf %307, %306 : vector<16x128xf32>
    %309 = arith.addf %303, %308 : vector<16x128xf32>
    %c5_123 = arith.constant 5 : index
    %c7_124 = arith.constant 7 : index
    %310 = memref.load %arg7[%c5_123, %c7_124] : memref<16x8xf32, #tpu.memory_space<smem>>
    %311 = vector.extract_strided_slice %18 {offsets = [7, 0, 0], sizes = [1, 16, 128], strides = [1, 1, 1]} : vector<8x16x128xf32> to vector<1x16x128xf32>
    %312 = vector.shape_cast %311 : vector<1x16x128xf32> to vector<16x128xf32>
    %313 = vector.broadcast %310 : f32 to vector<16x128xf32>
    %314 = arith.mulf %313, %312 : vector<16x128xf32>
    %315 = arith.addf %309, %314 : vector<16x128xf32>
    %c0_125 = arith.constant 0 : index
    %c5_126 = arith.constant 5 : index
    %c0_127 = arith.constant 0 : index
    %c0_128 = arith.constant 0 : index
    %316 = vector.load %arg8[%c0_125, %c5_126, %c0_127, %c0_128] : memref<1x16x16x128xf32, #tpu.memory_space<vmem>>, vector<1x1x16x128xf32>
    %317 = vector.shape_cast %316 : vector<1x1x16x128xf32> to vector<16x128xf32>
    %318 = vector.shape_cast %315 : vector<16x128xf32> to vector<1x1x16x128xf32>
    tpu.vector_store %arg8[%c0_125, %c5_126, %c0_127, %c0_128], %318 {strides = array<i32>} : memref<1x16x16x128xf32, #tpu.memory_space<vmem>>, vector<1x1x16x128xf32>,
    %c6_129 = arith.constant 6 : index
    %c0_130 = arith.constant 0 : index
    %319 = memref.load %arg7[%c6_129, %c0_130] : memref<16x8xf32, #tpu.memory_space<smem>>
    %320 = vector.extract_strided_slice %18 {offsets = [0, 0, 0], sizes = [1, 16, 128], strides = [1, 1, 1]} : vector<8x16x128xf32> to vector<1x16x128xf32>
    %321 = vector.shape_cast %320 : vector<1x16x128xf32> to vector<16x128xf32>
    %322 = vector.broadcast %319 : f32 to vector<16x128xf32>
    %323 = arith.mulf %322, %321 : vector<16x128xf32>
    %c6_131 = arith.constant 6 : index
    %c1_132 = arith.constant 1 : index
    %324 = memref.load %arg7[%c6_131, %c1_132] : memref<16x8xf32, #tpu.memory_space<smem>>
    %325 = vector.extract_strided_slice %18 {offsets = [1, 0, 0], sizes = [1, 16, 128], strides = [1, 1, 1]} : vector<8x16x128xf32> to vector<1x16x128xf32>
    %326 = vector.shape_cast %325 : vector<1x16x128xf32> to vector<16x128xf32>
    %327 = vector.broadcast %324 : f32 to vector<16x128xf32>
    %328 = arith.mulf %327, %326 : vector<16x128xf32>
    %329 = arith.addf %323, %328 : vector<16x128xf32>
    %c6_133 = arith.constant 6 : index
    %c2_134 = arith.constant 2 : index
    %330 = memref.load %arg7[%c6_133, %c2_134] : memref<16x8xf32, #tpu.memory_space<smem>>
    %331 = vector.extract_strided_slice %18 {offsets = [2, 0, 0], sizes = [1, 16, 128], strides = [1, 1, 1]} : vector<8x16x128xf32> to vector<1x16x128xf32>
    %332 = vector.shape_cast %331 : vector<1x16x128xf32> to vector<16x128xf32>
    %333 = vector.broadcast %330 : f32 to vector<16x128xf32>
    %334 = arith.mulf %333, %332 : vector<16x128xf32>
    %335 = arith.addf %329, %334 : vector<16x128xf32>
    %c6_135 = arith.constant 6 : index
    %c3_136 = arith.constant 3 : index
    %336 = memref.load %arg7[%c6_135, %c3_136] : memref<16x8xf32, #tpu.memory_space<smem>>
    %337 = vector.extract_strided_slice %18 {offsets = [3, 0, 0], sizes = [1, 16, 128], strides = [1, 1, 1]} : vector<8x16x128xf32> to vector<1x16x128xf32>
    %338 = vector.shape_cast %337 : vector<1x16x128xf32> to vector<16x128xf32>
    %339 = vector.broadcast %336 : f32 to vector<16x128xf32>
    %340 = arith.mulf %339, %338 : vector<16x128xf32>
    %341 = arith.addf %335, %340 : vector<16x128xf32>
    %c6_137 = arith.constant 6 : index
    %c4_138 = arith.constant 4 : index
    %342 = memref.load %arg7[%c6_137, %c4_138] : memref<16x8xf32, #tpu.memory_space<smem>>
    %343 = vector.extract_strided_slice %18 {offsets = [4, 0, 0], sizes = [1, 16, 128], strides = [1, 1, 1]} : vector<8x16x128xf32> to vector<1x16x128xf32>
    %344 = vector.shape_cast %343 : vector<1x16x128xf32> to vector<16x128xf32>
    %345 = vector.broadcast %342 : f32 to vector<16x128xf32>
    %346 = arith.mulf %345, %344 : vector<16x128xf32>
    %347 = arith.addf %341, %346 : vector<16x128xf32>
    %c6_139 = arith.constant 6 : index
    %c5_140 = arith.constant 5 : index
    %348 = memref.load %arg7[%c6_139, %c5_140] : memref<16x8xf32, #tpu.memory_space<smem>>
    %349 = vector.extract_strided_slice %18 {offsets = [5, 0, 0], sizes = [1, 16, 128], strides = [1, 1, 1]} : vector<8x16x128xf32> to vector<1x16x128xf32>
    %350 = vector.shape_cast %349 : vector<1x16x128xf32> to vector<16x128xf32>
    %351 = vector.broadcast %348 : f32 to vector<16x128xf32>
    %352 = arith.mulf %351, %350 : vector<16x128xf32>
    %353 = arith.addf %347, %352 : vector<16x128xf32>
    %c6_141 = arith.constant 6 : index
    %c6_142 = arith.constant 6 : index
    %354 = memref.load %arg7[%c6_141, %c6_142] : memref<16x8xf32, #tpu.memory_space<smem>>
    %355 = vector.extract_strided_slice %18 {offsets = [6, 0, 0], sizes = [1, 16, 128], strides = [1, 1, 1]} : vector<8x16x128xf32> to vector<1x16x128xf32>
    %356 = vector.shape_cast %355 : vector<1x16x128xf32> to vector<16x128xf32>
    %357 = vector.broadcast %354 : f32 to vector<16x128xf32>
    %358 = arith.mulf %357, %356 : vector<16x128xf32>
    %359 = arith.addf %353, %358 : vector<16x128xf32>
    %c6_143 = arith.constant 6 : index
    %c7_144 = arith.constant 7 : index
    %360 = memref.load %arg7[%c6_143, %c7_144] : memref<16x8xf32, #tpu.memory_space<smem>>
    %361 = vector.extract_strided_slice %18 {offsets = [7, 0, 0], sizes = [1, 16, 128], strides = [1, 1, 1]} : vector<8x16x128xf32> to vector<1x16x128xf32>
    %362 = vector.shape_cast %361 : vector<1x16x128xf32> to vector<16x128xf32>
    %363 = vector.broadcast %360 : f32 to vector<16x128xf32>
    %364 = arith.mulf %363, %362 : vector<16x128xf32>
    %365 = arith.addf %359, %364 : vector<16x128xf32>
    %c0_145 = arith.constant 0 : index
    %c6_146 = arith.constant 6 : index
    %c0_147 = arith.constant 0 : index
    %c0_148 = arith.constant 0 : index
    %366 = vector.load %arg8[%c0_145, %c6_146, %c0_147, %c0_148] : memref<1x16x16x128xf32, #tpu.memory_space<vmem>>, vector<1x1x16x128xf32>
    %367 = vector.shape_cast %366 : vector<1x1x16x128xf32> to vector<16x128xf32>
    %368 = vector.shape_cast %365 : vector<16x128xf32> to vector<1x1x16x128xf32>
    tpu.vector_store %arg8[%c0_145, %c6_146, %c0_147, %c0_148], %368 {strides = array<i32>} : memref<1x16x16x128xf32, #tpu.memory_space<vmem>>, vector<1x1x16x128xf32>,
    %c7_149 = arith.constant 7 : index
    %c0_150 = arith.constant 0 : index
    %369 = memref.load %arg7[%c7_149, %c0_150] : memref<16x8xf32, #tpu.memory_space<smem>>
    %370 = vector.extract_strided_slice %18 {offsets = [0, 0, 0], sizes = [1, 16, 128], strides = [1, 1, 1]} : vector<8x16x128xf32> to vector<1x16x128xf32>
    %371 = vector.shape_cast %370 : vector<1x16x128xf32> to vector<16x128xf32>
    %372 = vector.broadcast %369 : f32 to vector<16x128xf32>
    %373 = arith.mulf %372, %371 : vector<16x128xf32>
    %c7_151 = arith.constant 7 : index
    %c1_152 = arith.constant 1 : index
    %374 = memref.load %arg7[%c7_151, %c1_152] : memref<16x8xf32, #tpu.memory_space<smem>>
    %375 = vector.extract_strided_slice %18 {offsets = [1, 0, 0], sizes = [1, 16, 128], strides = [1, 1, 1]} : vector<8x16x128xf32> to vector<1x16x128xf32>
    %376 = vector.shape_cast %375 : vector<1x16x128xf32> to vector<16x128xf32>
    %377 = vector.broadcast %374 : f32 to vector<16x128xf32>
    %378 = arith.mulf %377, %376 : vector<16x128xf32>
    %379 = arith.addf %373, %378 : vector<16x128xf32>
    %c7_153 = arith.constant 7 : index
    %c2_154 = arith.constant 2 : index
    %380 = memref.load %arg7[%c7_153, %c2_154] : memref<16x8xf32, #tpu.memory_space<smem>>
    %381 = vector.extract_strided_slice %18 {offsets = [2, 0, 0], sizes = [1, 16, 128], strides = [1, 1, 1]} : vector<8x16x128xf32> to vector<1x16x128xf32>
    %382 = vector.shape_cast %381 : vector<1x16x128xf32> to vector<16x128xf32>
    %383 = vector.broadcast %380 : f32 to vector<16x128xf32>
    %384 = arith.mulf %383, %382 : vector<16x128xf32>
    %385 = arith.addf %379, %384 : vector<16x128xf32>
    %c7_155 = arith.constant 7 : index
    %c3_156 = arith.constant 3 : index
    %386 = memref.load %arg7[%c7_155, %c3_156] : memref<16x8xf32, #tpu.memory_space<smem>>
    %387 = vector.extract_strided_slice %18 {offsets = [3, 0, 0], sizes = [1, 16, 128], strides = [1, 1, 1]} : vector<8x16x128xf32> to vector<1x16x128xf32>
    %388 = vector.shape_cast %387 : vector<1x16x128xf32> to vector<16x128xf32>
    %389 = vector.broadcast %386 : f32 to vector<16x128xf32>
    %390 = arith.mulf %389, %388 : vector<16x128xf32>
    %391 = arith.addf %385, %390 : vector<16x128xf32>
    %c7_157 = arith.constant 7 : index
    %c4_158 = arith.constant 4 : index
    %392 = memref.load %arg7[%c7_157, %c4_158] : memref<16x8xf32, #tpu.memory_space<smem>>
    %393 = vector.extract_strided_slice %18 {offsets = [4, 0, 0], sizes = [1, 16, 128], strides = [1, 1, 1]} : vector<8x16x128xf32> to vector<1x16x128xf32>
    %394 = vector.shape_cast %393 : vector<1x16x128xf32> to vector<16x128xf32>
    %395 = vector.broadcast %392 : f32 to vector<16x128xf32>
    %396 = arith.mulf %395, %394 : vector<16x128xf32>
    %397 = arith.addf %391, %396 : vector<16x128xf32>
    %c7_159 = arith.constant 7 : index
    %c5_160 = arith.constant 5 : index
    %398 = memref.load %arg7[%c7_159, %c5_160] : memref<16x8xf32, #tpu.memory_space<smem>>
    %399 = vector.extract_strided_slice %18 {offsets = [5, 0, 0], sizes = [1, 16, 128], strides = [1, 1, 1]} : vector<8x16x128xf32> to vector<1x16x128xf32>
    %400 = vector.shape_cast %399 : vector<1x16x128xf32> to vector<16x128xf32>
    %401 = vector.broadcast %398 : f32 to vector<16x128xf32>
    %402 = arith.mulf %401, %400 : vector<16x128xf32>
    %403 = arith.addf %397, %402 : vector<16x128xf32>
    %c7_161 = arith.constant 7 : index
    %c6_162 = arith.constant 6 : index
    %404 = memref.load %arg7[%c7_161, %c6_162] : memref<16x8xf32, #tpu.memory_space<smem>>
    %405 = vector.extract_strided_slice %18 {offsets = [6, 0, 0], sizes = [1, 16, 128], strides = [1, 1, 1]} : vector<8x16x128xf32> to vector<1x16x128xf32>
    %406 = vector.shape_cast %405 : vector<1x16x128xf32> to vector<16x128xf32>
    %407 = vector.broadcast %404 : f32 to vector<16x128xf32>
    %408 = arith.mulf %407, %406 : vector<16x128xf32>
    %409 = arith.addf %403, %408 : vector<16x128xf32>
    %c7_163 = arith.constant 7 : index
    %c7_164 = arith.constant 7 : index
    %410 = memref.load %arg7[%c7_163, %c7_164] : memref<16x8xf32, #tpu.memory_space<smem>>
    %411 = vector.extract_strided_slice %18 {offsets = [7, 0, 0], sizes = [1, 16, 128], strides = [1, 1, 1]} : vector<8x16x128xf32> to vector<1x16x128xf32>
    %412 = vector.shape_cast %411 : vector<1x16x128xf32> to vector<16x128xf32>
    %413 = vector.broadcast %410 : f32 to vector<16x128xf32>
    %414 = arith.mulf %413, %412 : vector<16x128xf32>
    %415 = arith.addf %409, %414 : vector<16x128xf32>
    %c0_165 = arith.constant 0 : index
    %c7_166 = arith.constant 7 : index
    %c0_167 = arith.constant 0 : index
    %c0_168 = arith.constant 0 : index
    %416 = vector.load %arg8[%c0_165, %c7_166, %c0_167, %c0_168] : memref<1x16x16x128xf32, #tpu.memory_space<vmem>>, vector<1x1x16x128xf32>
    %417 = vector.shape_cast %416 : vector<1x1x16x128xf32> to vector<16x128xf32>
    %418 = vector.shape_cast %415 : vector<16x128xf32> to vector<1x1x16x128xf32>
    tpu.vector_store %arg8[%c0_165, %c7_166, %c0_167, %c0_168], %418 {strides = array<i32>} : memref<1x16x16x128xf32, #tpu.memory_space<vmem>>, vector<1x1x16x128xf32>,
    %c8 = arith.constant 8 : index
    %c0_169 = arith.constant 0 : index
    %419 = memref.load %arg7[%c8, %c0_169] : memref<16x8xf32, #tpu.memory_space<smem>>
    %420 = vector.extract_strided_slice %18 {offsets = [0, 0, 0], sizes = [1, 16, 128], strides = [1, 1, 1]} : vector<8x16x128xf32> to vector<1x16x128xf32>
    %421 = vector.shape_cast %420 : vector<1x16x128xf32> to vector<16x128xf32>
    %422 = vector.broadcast %419 : f32 to vector<16x128xf32>
    %423 = arith.mulf %422, %421 : vector<16x128xf32>
    %c8_170 = arith.constant 8 : index
    %c1_171 = arith.constant 1 : index
    %424 = memref.load %arg7[%c8_170, %c1_171] : memref<16x8xf32, #tpu.memory_space<smem>>
    %425 = vector.extract_strided_slice %18 {offsets = [1, 0, 0], sizes = [1, 16, 128], strides = [1, 1, 1]} : vector<8x16x128xf32> to vector<1x16x128xf32>
    %426 = vector.shape_cast %425 : vector<1x16x128xf32> to vector<16x128xf32>
    %427 = vector.broadcast %424 : f32 to vector<16x128xf32>
    %428 = arith.mulf %427, %426 : vector<16x128xf32>
    %429 = arith.addf %423, %428 : vector<16x128xf32>
    %c8_172 = arith.constant 8 : index
    %c2_173 = arith.constant 2 : index
    %430 = memref.load %arg7[%c8_172, %c2_173] : memref<16x8xf32, #tpu.memory_space<smem>>
    %431 = vector.extract_strided_slice %18 {offsets = [2, 0, 0], sizes = [1, 16, 128], strides = [1, 1, 1]} : vector<8x16x128xf32> to vector<1x16x128xf32>
    %432 = vector.shape_cast %431 : vector<1x16x128xf32> to vector<16x128xf32>
    %433 = vector.broadcast %430 : f32 to vector<16x128xf32>
    %434 = arith.mulf %433, %432 : vector<16x128xf32>
    %435 = arith.addf %429, %434 : vector<16x128xf32>
    %c8_174 = arith.constant 8 : index
    %c3_175 = arith.constant 3 : index
    %436 = memref.load %arg7[%c8_174, %c3_175] : memref<16x8xf32, #tpu.memory_space<smem>>
    %437 = vector.extract_strided_slice %18 {offsets = [3, 0, 0], sizes = [1, 16, 128], strides = [1, 1, 1]} : vector<8x16x128xf32> to vector<1x16x128xf32>
    %438 = vector.shape_cast %437 : vector<1x16x128xf32> to vector<16x128xf32>
    %439 = vector.broadcast %436 : f32 to vector<16x128xf32>
    %440 = arith.mulf %439, %438 : vector<16x128xf32>
    %441 = arith.addf %435, %440 : vector<16x128xf32>
    %c8_176 = arith.constant 8 : index
    %c4_177 = arith.constant 4 : index
    %442 = memref.load %arg7[%c8_176, %c4_177] : memref<16x8xf32, #tpu.memory_space<smem>>
    %443 = vector.extract_strided_slice %18 {offsets = [4, 0, 0], sizes = [1, 16, 128], strides = [1, 1, 1]} : vector<8x16x128xf32> to vector<1x16x128xf32>
    %444 = vector.shape_cast %443 : vector<1x16x128xf32> to vector<16x128xf32>
    %445 = vector.broadcast %442 : f32 to vector<16x128xf32>
    %446 = arith.mulf %445, %444 : vector<16x128xf32>
    %447 = arith.addf %441, %446 : vector<16x128xf32>
    %c8_178 = arith.constant 8 : index
    %c5_179 = arith.constant 5 : index
    %448 = memref.load %arg7[%c8_178, %c5_179] : memref<16x8xf32, #tpu.memory_space<smem>>
    %449 = vector.extract_strided_slice %18 {offsets = [5, 0, 0], sizes = [1, 16, 128], strides = [1, 1, 1]} : vector<8x16x128xf32> to vector<1x16x128xf32>
    %450 = vector.shape_cast %449 : vector<1x16x128xf32> to vector<16x128xf32>
    %451 = vector.broadcast %448 : f32 to vector<16x128xf32>
    %452 = arith.mulf %451, %450 : vector<16x128xf32>
    %453 = arith.addf %447, %452 : vector<16x128xf32>
    %c8_180 = arith.constant 8 : index
    %c6_181 = arith.constant 6 : index
    %454 = memref.load %arg7[%c8_180, %c6_181] : memref<16x8xf32, #tpu.memory_space<smem>>
    %455 = vector.extract_strided_slice %18 {offsets = [6, 0, 0], sizes = [1, 16, 128], strides = [1, 1, 1]} : vector<8x16x128xf32> to vector<1x16x128xf32>
    %456 = vector.shape_cast %455 : vector<1x16x128xf32> to vector<16x128xf32>
    %457 = vector.broadcast %454 : f32 to vector<16x128xf32>
    %458 = arith.mulf %457, %456 : vector<16x128xf32>
    %459 = arith.addf %453, %458 : vector<16x128xf32>
    %c8_182 = arith.constant 8 : index
    %c7_183 = arith.constant 7 : index
    %460 = memref.load %arg7[%c8_182, %c7_183] : memref<16x8xf32, #tpu.memory_space<smem>>
    %461 = vector.extract_strided_slice %18 {offsets = [7, 0, 0], sizes = [1, 16, 128], strides = [1, 1, 1]} : vector<8x16x128xf32> to vector<1x16x128xf32>
    %462 = vector.shape_cast %461 : vector<1x16x128xf32> to vector<16x128xf32>
    %463 = vector.broadcast %460 : f32 to vector<16x128xf32>
    %464 = arith.mulf %463, %462 : vector<16x128xf32>
    %465 = arith.addf %459, %464 : vector<16x128xf32>
    %c0_184 = arith.constant 0 : index
    %c8_185 = arith.constant 8 : index
    %c0_186 = arith.constant 0 : index
    %c0_187 = arith.constant 0 : index
    %466 = vector.load %arg8[%c0_184, %c8_185, %c0_186, %c0_187] : memref<1x16x16x128xf32, #tpu.memory_space<vmem>>, vector<1x1x16x128xf32>
    %467 = vector.shape_cast %466 : vector<1x1x16x128xf32> to vector<16x128xf32>
    %468 = vector.shape_cast %465 : vector<16x128xf32> to vector<1x1x16x128xf32>
    tpu.vector_store %arg8[%c0_184, %c8_185, %c0_186, %c0_187], %468 {strides = array<i32>} : memref<1x16x16x128xf32, #tpu.memory_space<vmem>>, vector<1x1x16x128xf32>,
    %c9 = arith.constant 9 : index
    %c0_188 = arith.constant 0 : index
    %469 = memref.load %arg7[%c9, %c0_188] : memref<16x8xf32, #tpu.memory_space<smem>>
    %470 = vector.extract_strided_slice %18 {offsets = [0, 0, 0], sizes = [1, 16, 128], strides = [1, 1, 1]} : vector<8x16x128xf32> to vector<1x16x128xf32>
    %471 = vector.shape_cast %470 : vector<1x16x128xf32> to vector<16x128xf32>
    %472 = vector.broadcast %469 : f32 to vector<16x128xf32>
    %473 = arith.mulf %472, %471 : vector<16x128xf32>
    %c9_189 = arith.constant 9 : index
    %c1_190 = arith.constant 1 : index
    %474 = memref.load %arg7[%c9_189, %c1_190] : memref<16x8xf32, #tpu.memory_space<smem>>
    %475 = vector.extract_strided_slice %18 {offsets = [1, 0, 0], sizes = [1, 16, 128], strides = [1, 1, 1]} : vector<8x16x128xf32> to vector<1x16x128xf32>
    %476 = vector.shape_cast %475 : vector<1x16x128xf32> to vector<16x128xf32>
    %477 = vector.broadcast %474 : f32 to vector<16x128xf32>
    %478 = arith.mulf %477, %476 : vector<16x128xf32>
    %479 = arith.addf %473, %478 : vector<16x128xf32>
    %c9_191 = arith.constant 9 : index
    %c2_192 = arith.constant 2 : index
    %480 = memref.load %arg7[%c9_191, %c2_192] : memref<16x8xf32, #tpu.memory_space<smem>>
    %481 = vector.extract_strided_slice %18 {offsets = [2, 0, 0], sizes = [1, 16, 128], strides = [1, 1, 1]} : vector<8x16x128xf32> to vector<1x16x128xf32>
    %482 = vector.shape_cast %481 : vector<1x16x128xf32> to vector<16x128xf32>
    %483 = vector.broadcast %480 : f32 to vector<16x128xf32>
    %484 = arith.mulf %483, %482 : vector<16x128xf32>
    %485 = arith.addf %479, %484 : vector<16x128xf32>
    %c9_193 = arith.constant 9 : index
    %c3_194 = arith.constant 3 : index
    %486 = memref.load %arg7[%c9_193, %c3_194] : memref<16x8xf32, #tpu.memory_space<smem>>
    %487 = vector.extract_strided_slice %18 {offsets = [3, 0, 0], sizes = [1, 16, 128], strides = [1, 1, 1]} : vector<8x16x128xf32> to vector<1x16x128xf32>
    %488 = vector.shape_cast %487 : vector<1x16x128xf32> to vector<16x128xf32>
    %489 = vector.broadcast %486 : f32 to vector<16x128xf32>
    %490 = arith.mulf %489, %488 : vector<16x128xf32>
    %491 = arith.addf %485, %490 : vector<16x128xf32>
    %c9_195 = arith.constant 9 : index
    %c4_196 = arith.constant 4 : index
    %492 = memref.load %arg7[%c9_195, %c4_196] : memref<16x8xf32, #tpu.memory_space<smem>>
    %493 = vector.extract_strided_slice %18 {offsets = [4, 0, 0], sizes = [1, 16, 128], strides = [1, 1, 1]} : vector<8x16x128xf32> to vector<1x16x128xf32>
    %494 = vector.shape_cast %493 : vector<1x16x128xf32> to vector<16x128xf32>
    %495 = vector.broadcast %492 : f32 to vector<16x128xf32>
    %496 = arith.mulf %495, %494 : vector<16x128xf32>
    %497 = arith.addf %491, %496 : vector<16x128xf32>
    %c9_197 = arith.constant 9 : index
    %c5_198 = arith.constant 5 : index
    %498 = memref.load %arg7[%c9_197, %c5_198] : memref<16x8xf32, #tpu.memory_space<smem>>
    %499 = vector.extract_strided_slice %18 {offsets = [5, 0, 0], sizes = [1, 16, 128], strides = [1, 1, 1]} : vector<8x16x128xf32> to vector<1x16x128xf32>
    %500 = vector.shape_cast %499 : vector<1x16x128xf32> to vector<16x128xf32>
    %501 = vector.broadcast %498 : f32 to vector<16x128xf32>
    %502 = arith.mulf %501, %500 : vector<16x128xf32>
    %503 = arith.addf %497, %502 : vector<16x128xf32>
    %c9_199 = arith.constant 9 : index
    %c6_200 = arith.constant 6 : index
    %504 = memref.load %arg7[%c9_199, %c6_200] : memref<16x8xf32, #tpu.memory_space<smem>>
    %505 = vector.extract_strided_slice %18 {offsets = [6, 0, 0], sizes = [1, 16, 128], strides = [1, 1, 1]} : vector<8x16x128xf32> to vector<1x16x128xf32>
    %506 = vector.shape_cast %505 : vector<1x16x128xf32> to vector<16x128xf32>
    %507 = vector.broadcast %504 : f32 to vector<16x128xf32>
    %508 = arith.mulf %507, %506 : vector<16x128xf32>
    %509 = arith.addf %503, %508 : vector<16x128xf32>
    %c9_201 = arith.constant 9 : index
    %c7_202 = arith.constant 7 : index
    %510 = memref.load %arg7[%c9_201, %c7_202] : memref<16x8xf32, #tpu.memory_space<smem>>
    %511 = vector.extract_strided_slice %18 {offsets = [7, 0, 0], sizes = [1, 16, 128], strides = [1, 1, 1]} : vector<8x16x128xf32> to vector<1x16x128xf32>
    %512 = vector.shape_cast %511 : vector<1x16x128xf32> to vector<16x128xf32>
    %513 = vector.broadcast %510 : f32 to vector<16x128xf32>
    %514 = arith.mulf %513, %512 : vector<16x128xf32>
    %515 = arith.addf %509, %514 : vector<16x128xf32>
    %c0_203 = arith.constant 0 : index
    %c9_204 = arith.constant 9 : index
    %c0_205 = arith.constant 0 : index
    %c0_206 = arith.constant 0 : index
    %516 = vector.load %arg8[%c0_203, %c9_204, %c0_205, %c0_206] : memref<1x16x16x128xf32, #tpu.memory_space<vmem>>, vector<1x1x16x128xf32>
    %517 = vector.shape_cast %516 : vector<1x1x16x128xf32> to vector<16x128xf32>
    %518 = vector.shape_cast %515 : vector<16x128xf32> to vector<1x1x16x128xf32>
    tpu.vector_store %arg8[%c0_203, %c9_204, %c0_205, %c0_206], %518 {strides = array<i32>} : memref<1x16x16x128xf32, #tpu.memory_space<vmem>>, vector<1x1x16x128xf32>,
    %c10 = arith.constant 10 : index
    %c0_207 = arith.constant 0 : index
    %519 = memref.load %arg7[%c10, %c0_207] : memref<16x8xf32, #tpu.memory_space<smem>>
    %520 = vector.extract_strided_slice %18 {offsets = [0, 0, 0], sizes = [1, 16, 128], strides = [1, 1, 1]} : vector<8x16x128xf32> to vector<1x16x128xf32>
    %521 = vector.shape_cast %520 : vector<1x16x128xf32> to vector<16x128xf32>
    %522 = vector.broadcast %519 : f32 to vector<16x128xf32>
    %523 = arith.mulf %522, %521 : vector<16x128xf32>
    %c10_208 = arith.constant 10 : index
    %c1_209 = arith.constant 1 : index
    %524 = memref.load %arg7[%c10_208, %c1_209] : memref<16x8xf32, #tpu.memory_space<smem>>
    %525 = vector.extract_strided_slice %18 {offsets = [1, 0, 0], sizes = [1, 16, 128], strides = [1, 1, 1]} : vector<8x16x128xf32> to vector<1x16x128xf32>
    %526 = vector.shape_cast %525 : vector<1x16x128xf32> to vector<16x128xf32>
    %527 = vector.broadcast %524 : f32 to vector<16x128xf32>
    %528 = arith.mulf %527, %526 : vector<16x128xf32>
    %529 = arith.addf %523, %528 : vector<16x128xf32>
    %c10_210 = arith.constant 10 : index
    %c2_211 = arith.constant 2 : index
    %530 = memref.load %arg7[%c10_210, %c2_211] : memref<16x8xf32, #tpu.memory_space<smem>>
    %531 = vector.extract_strided_slice %18 {offsets = [2, 0, 0], sizes = [1, 16, 128], strides = [1, 1, 1]} : vector<8x16x128xf32> to vector<1x16x128xf32>
    %532 = vector.shape_cast %531 : vector<1x16x128xf32> to vector<16x128xf32>
    %533 = vector.broadcast %530 : f32 to vector<16x128xf32>
    %534 = arith.mulf %533, %532 : vector<16x128xf32>
    %535 = arith.addf %529, %534 : vector<16x128xf32>
    %c10_212 = arith.constant 10 : index
    %c3_213 = arith.constant 3 : index
    %536 = memref.load %arg7[%c10_212, %c3_213] : memref<16x8xf32, #tpu.memory_space<smem>>
    %537 = vector.extract_strided_slice %18 {offsets = [3, 0, 0], sizes = [1, 16, 128], strides = [1, 1, 1]} : vector<8x16x128xf32> to vector<1x16x128xf32>
    %538 = vector.shape_cast %537 : vector<1x16x128xf32> to vector<16x128xf32>
    %539 = vector.broadcast %536 : f32 to vector<16x128xf32>
    %540 = arith.mulf %539, %538 : vector<16x128xf32>
    %541 = arith.addf %535, %540 : vector<16x128xf32>
    %c10_214 = arith.constant 10 : index
    %c4_215 = arith.constant 4 : index
    %542 = memref.load %arg7[%c10_214, %c4_215] : memref<16x8xf32, #tpu.memory_space<smem>>
    %543 = vector.extract_strided_slice %18 {offsets = [4, 0, 0], sizes = [1, 16, 128], strides = [1, 1, 1]} : vector<8x16x128xf32> to vector<1x16x128xf32>
    %544 = vector.shape_cast %543 : vector<1x16x128xf32> to vector<16x128xf32>
    %545 = vector.broadcast %542 : f32 to vector<16x128xf32>
    %546 = arith.mulf %545, %544 : vector<16x128xf32>
    %547 = arith.addf %541, %546 : vector<16x128xf32>
    %c10_216 = arith.constant 10 : index
    %c5_217 = arith.constant 5 : index
    %548 = memref.load %arg7[%c10_216, %c5_217] : memref<16x8xf32, #tpu.memory_space<smem>>
    %549 = vector.extract_strided_slice %18 {offsets = [5, 0, 0], sizes = [1, 16, 128], strides = [1, 1, 1]} : vector<8x16x128xf32> to vector<1x16x128xf32>
    %550 = vector.shape_cast %549 : vector<1x16x128xf32> to vector<16x128xf32>
    %551 = vector.broadcast %548 : f32 to vector<16x128xf32>
    %552 = arith.mulf %551, %550 : vector<16x128xf32>
    %553 = arith.addf %547, %552 : vector<16x128xf32>
    %c10_218 = arith.constant 10 : index
    %c6_219 = arith.constant 6 : index
    %554 = memref.load %arg7[%c10_218, %c6_219] : memref<16x8xf32, #tpu.memory_space<smem>>
    %555 = vector.extract_strided_slice %18 {offsets = [6, 0, 0], sizes = [1, 16, 128], strides = [1, 1, 1]} : vector<8x16x128xf32> to vector<1x16x128xf32>
    %556 = vector.shape_cast %555 : vector<1x16x128xf32> to vector<16x128xf32>
    %557 = vector.broadcast %554 : f32 to vector<16x128xf32>
    %558 = arith.mulf %557, %556 : vector<16x128xf32>
    %559 = arith.addf %553, %558 : vector<16x128xf32>
    %c10_220 = arith.constant 10 : index
    %c7_221 = arith.constant 7 : index
    %560 = memref.load %arg7[%c10_220, %c7_221] : memref<16x8xf32, #tpu.memory_space<smem>>
    %561 = vector.extract_strided_slice %18 {offsets = [7, 0, 0], sizes = [1, 16, 128], strides = [1, 1, 1]} : vector<8x16x128xf32> to vector<1x16x128xf32>
    %562 = vector.shape_cast %561 : vector<1x16x128xf32> to vector<16x128xf32>
    %563 = vector.broadcast %560 : f32 to vector<16x128xf32>
    %564 = arith.mulf %563, %562 : vector<16x128xf32>
    %565 = arith.addf %559, %564 : vector<16x128xf32>
    %c0_222 = arith.constant 0 : index
    %c10_223 = arith.constant 10 : index
    %c0_224 = arith.constant 0 : index
    %c0_225 = arith.constant 0 : index
    %566 = vector.load %arg8[%c0_222, %c10_223, %c0_224, %c0_225] : memref<1x16x16x128xf32, #tpu.memory_space<vmem>>, vector<1x1x16x128xf32>
    %567 = vector.shape_cast %566 : vector<1x1x16x128xf32> to vector<16x128xf32>
    %568 = vector.shape_cast %565 : vector<16x128xf32> to vector<1x1x16x128xf32>
    tpu.vector_store %arg8[%c0_222, %c10_223, %c0_224, %c0_225], %568 {strides = array<i32>} : memref<1x16x16x128xf32, #tpu.memory_space<vmem>>, vector<1x1x16x128xf32>,
    %c11 = arith.constant 11 : index
    %c0_226 = arith.constant 0 : index
    %569 = memref.load %arg7[%c11, %c0_226] : memref<16x8xf32, #tpu.memory_space<smem>>
    %570 = vector.extract_strided_slice %18 {offsets = [0, 0, 0], sizes = [1, 16, 128], strides = [1, 1, 1]} : vector<8x16x128xf32> to vector<1x16x128xf32>
    %571 = vector.shape_cast %570 : vector<1x16x128xf32> to vector<16x128xf32>
    %572 = vector.broadcast %569 : f32 to vector<16x128xf32>
    %573 = arith.mulf %572, %571 : vector<16x128xf32>
    %c11_227 = arith.constant 11 : index
    %c1_228 = arith.constant 1 : index
    %574 = memref.load %arg7[%c11_227, %c1_228] : memref<16x8xf32, #tpu.memory_space<smem>>
    %575 = vector.extract_strided_slice %18 {offsets = [1, 0, 0], sizes = [1, 16, 128], strides = [1, 1, 1]} : vector<8x16x128xf32> to vector<1x16x128xf32>
    %576 = vector.shape_cast %575 : vector<1x16x128xf32> to vector<16x128xf32>
    %577 = vector.broadcast %574 : f32 to vector<16x128xf32>
    %578 = arith.mulf %577, %576 : vector<16x128xf32>
    %579 = arith.addf %573, %578 : vector<16x128xf32>
    %c11_229 = arith.constant 11 : index
    %c2_230 = arith.constant 2 : index
    %580 = memref.load %arg7[%c11_229, %c2_230] : memref<16x8xf32, #tpu.memory_space<smem>>
    %581 = vector.extract_strided_slice %18 {offsets = [2, 0, 0], sizes = [1, 16, 128], strides = [1, 1, 1]} : vector<8x16x128xf32> to vector<1x16x128xf32>
    %582 = vector.shape_cast %581 : vector<1x16x128xf32> to vector<16x128xf32>
    %583 = vector.broadcast %580 : f32 to vector<16x128xf32>
    %584 = arith.mulf %583, %582 : vector<16x128xf32>
    %585 = arith.addf %579, %584 : vector<16x128xf32>
    %c11_231 = arith.constant 11 : index
    %c3_232 = arith.constant 3 : index
    %586 = memref.load %arg7[%c11_231, %c3_232] : memref<16x8xf32, #tpu.memory_space<smem>>
    %587 = vector.extract_strided_slice %18 {offsets = [3, 0, 0], sizes = [1, 16, 128], strides = [1, 1, 1]} : vector<8x16x128xf32> to vector<1x16x128xf32>
    %588 = vector.shape_cast %587 : vector<1x16x128xf32> to vector<16x128xf32>
    %589 = vector.broadcast %586 : f32 to vector<16x128xf32>
    %590 = arith.mulf %589, %588 : vector<16x128xf32>
    %591 = arith.addf %585, %590 : vector<16x128xf32>
    %c11_233 = arith.constant 11 : index
    %c4_234 = arith.constant 4 : index
    %592 = memref.load %arg7[%c11_233, %c4_234] : memref<16x8xf32, #tpu.memory_space<smem>>
    %593 = vector.extract_strided_slice %18 {offsets = [4, 0, 0], sizes = [1, 16, 128], strides = [1, 1, 1]} : vector<8x16x128xf32> to vector<1x16x128xf32>
    %594 = vector.shape_cast %593 : vector<1x16x128xf32> to vector<16x128xf32>
    %595 = vector.broadcast %592 : f32 to vector<16x128xf32>
    %596 = arith.mulf %595, %594 : vector<16x128xf32>
    %597 = arith.addf %591, %596 : vector<16x128xf32>
    %c11_235 = arith.constant 11 : index
    %c5_236 = arith.constant 5 : index
    %598 = memref.load %arg7[%c11_235, %c5_236] : memref<16x8xf32, #tpu.memory_space<smem>>
    %599 = vector.extract_strided_slice %18 {offsets = [5, 0, 0], sizes = [1, 16, 128], strides = [1, 1, 1]} : vector<8x16x128xf32> to vector<1x16x128xf32>
    %600 = vector.shape_cast %599 : vector<1x16x128xf32> to vector<16x128xf32>
    %601 = vector.broadcast %598 : f32 to vector<16x128xf32>
    %602 = arith.mulf %601, %600 : vector<16x128xf32>
    %603 = arith.addf %597, %602 : vector<16x128xf32>
    %c11_237 = arith.constant 11 : index
    %c6_238 = arith.constant 6 : index
    %604 = memref.load %arg7[%c11_237, %c6_238] : memref<16x8xf32, #tpu.memory_space<smem>>
    %605 = vector.extract_strided_slice %18 {offsets = [6, 0, 0], sizes = [1, 16, 128], strides = [1, 1, 1]} : vector<8x16x128xf32> to vector<1x16x128xf32>
    %606 = vector.shape_cast %605 : vector<1x16x128xf32> to vector<16x128xf32>
    %607 = vector.broadcast %604 : f32 to vector<16x128xf32>
    %608 = arith.mulf %607, %606 : vector<16x128xf32>
    %609 = arith.addf %603, %608 : vector<16x128xf32>
    %c11_239 = arith.constant 11 : index
    %c7_240 = arith.constant 7 : index
    %610 = memref.load %arg7[%c11_239, %c7_240] : memref<16x8xf32, #tpu.memory_space<smem>>
    %611 = vector.extract_strided_slice %18 {offsets = [7, 0, 0], sizes = [1, 16, 128], strides = [1, 1, 1]} : vector<8x16x128xf32> to vector<1x16x128xf32>
    %612 = vector.shape_cast %611 : vector<1x16x128xf32> to vector<16x128xf32>
    %613 = vector.broadcast %610 : f32 to vector<16x128xf32>
    %614 = arith.mulf %613, %612 : vector<16x128xf32>
    %615 = arith.addf %609, %614 : vector<16x128xf32>
    %c0_241 = arith.constant 0 : index
    %c11_242 = arith.constant 11 : index
    %c0_243 = arith.constant 0 : index
    %c0_244 = arith.constant 0 : index
    %616 = vector.load %arg8[%c0_241, %c11_242, %c0_243, %c0_244] : memref<1x16x16x128xf32, #tpu.memory_space<vmem>>, vector<1x1x16x128xf32>
    %617 = vector.shape_cast %616 : vector<1x1x16x128xf32> to vector<16x128xf32>
    %618 = vector.shape_cast %615 : vector<16x128xf32> to vector<1x1x16x128xf32>
    tpu.vector_store %arg8[%c0_241, %c11_242, %c0_243, %c0_244], %618 {strides = array<i32>} : memref<1x16x16x128xf32, #tpu.memory_space<vmem>>, vector<1x1x16x128xf32>,
    %c12 = arith.constant 12 : index
    %c0_245 = arith.constant 0 : index
    %619 = memref.load %arg7[%c12, %c0_245] : memref<16x8xf32, #tpu.memory_space<smem>>
    %620 = vector.extract_strided_slice %18 {offsets = [0, 0, 0], sizes = [1, 16, 128], strides = [1, 1, 1]} : vector<8x16x128xf32> to vector<1x16x128xf32>
    %621 = vector.shape_cast %620 : vector<1x16x128xf32> to vector<16x128xf32>
    %622 = vector.broadcast %619 : f32 to vector<16x128xf32>
    %623 = arith.mulf %622, %621 : vector<16x128xf32>
    %c12_246 = arith.constant 12 : index
    %c1_247 = arith.constant 1 : index
    %624 = memref.load %arg7[%c12_246, %c1_247] : memref<16x8xf32, #tpu.memory_space<smem>>
    %625 = vector.extract_strided_slice %18 {offsets = [1, 0, 0], sizes = [1, 16, 128], strides = [1, 1, 1]} : vector<8x16x128xf32> to vector<1x16x128xf32>
    %626 = vector.shape_cast %625 : vector<1x16x128xf32> to vector<16x128xf32>
    %627 = vector.broadcast %624 : f32 to vector<16x128xf32>
    %628 = arith.mulf %627, %626 : vector<16x128xf32>
    %629 = arith.addf %623, %628 : vector<16x128xf32>
    %c12_248 = arith.constant 12 : index
    %c2_249 = arith.constant 2 : index
    %630 = memref.load %arg7[%c12_248, %c2_249] : memref<16x8xf32, #tpu.memory_space<smem>>
    %631 = vector.extract_strided_slice %18 {offsets = [2, 0, 0], sizes = [1, 16, 128], strides = [1, 1, 1]} : vector<8x16x128xf32> to vector<1x16x128xf32>
    %632 = vector.shape_cast %631 : vector<1x16x128xf32> to vector<16x128xf32>
    %633 = vector.broadcast %630 : f32 to vector<16x128xf32>
    %634 = arith.mulf %633, %632 : vector<16x128xf32>
    %635 = arith.addf %629, %634 : vector<16x128xf32>
    %c12_250 = arith.constant 12 : index
    %c3_251 = arith.constant 3 : index
    %636 = memref.load %arg7[%c12_250, %c3_251] : memref<16x8xf32, #tpu.memory_space<smem>>
    %637 = vector.extract_strided_slice %18 {offsets = [3, 0, 0], sizes = [1, 16, 128], strides = [1, 1, 1]} : vector<8x16x128xf32> to vector<1x16x128xf32>
    %638 = vector.shape_cast %637 : vector<1x16x128xf32> to vector<16x128xf32>
    %639 = vector.broadcast %636 : f32 to vector<16x128xf32>
    %640 = arith.mulf %639, %638 : vector<16x128xf32>
    %641 = arith.addf %635, %640 : vector<16x128xf32>
    %c12_252 = arith.constant 12 : index
    %c4_253 = arith.constant 4 : index
    %642 = memref.load %arg7[%c12_252, %c4_253] : memref<16x8xf32, #tpu.memory_space<smem>>
    %643 = vector.extract_strided_slice %18 {offsets = [4, 0, 0], sizes = [1, 16, 128], strides = [1, 1, 1]} : vector<8x16x128xf32> to vector<1x16x128xf32>
    %644 = vector.shape_cast %643 : vector<1x16x128xf32> to vector<16x128xf32>
    %645 = vector.broadcast %642 : f32 to vector<16x128xf32>
    %646 = arith.mulf %645, %644 : vector<16x128xf32>
    %647 = arith.addf %641, %646 : vector<16x128xf32>
    %c12_254 = arith.constant 12 : index
    %c5_255 = arith.constant 5 : index
    %648 = memref.load %arg7[%c12_254, %c5_255] : memref<16x8xf32, #tpu.memory_space<smem>>
    %649 = vector.extract_strided_slice %18 {offsets = [5, 0, 0], sizes = [1, 16, 128], strides = [1, 1, 1]} : vector<8x16x128xf32> to vector<1x16x128xf32>
    %650 = vector.shape_cast %649 : vector<1x16x128xf32> to vector<16x128xf32>
    %651 = vector.broadcast %648 : f32 to vector<16x128xf32>
    %652 = arith.mulf %651, %650 : vector<16x128xf32>
    %653 = arith.addf %647, %652 : vector<16x128xf32>
    %c12_256 = arith.constant 12 : index
    %c6_257 = arith.constant 6 : index
    %654 = memref.load %arg7[%c12_256, %c6_257] : memref<16x8xf32, #tpu.memory_space<smem>>
    %655 = vector.extract_strided_slice %18 {offsets = [6, 0, 0], sizes = [1, 16, 128], strides = [1, 1, 1]} : vector<8x16x128xf32> to vector<1x16x128xf32>
    %656 = vector.shape_cast %655 : vector<1x16x128xf32> to vector<16x128xf32>
    %657 = vector.broadcast %654 : f32 to vector<16x128xf32>
    %658 = arith.mulf %657, %656 : vector<16x128xf32>
    %659 = arith.addf %653, %658 : vector<16x128xf32>
    %c12_258 = arith.constant 12 : index
    %c7_259 = arith.constant 7 : index
    %660 = memref.load %arg7[%c12_258, %c7_259] : memref<16x8xf32, #tpu.memory_space<smem>>
    %661 = vector.extract_strided_slice %18 {offsets = [7, 0, 0], sizes = [1, 16, 128], strides = [1, 1, 1]} : vector<8x16x128xf32> to vector<1x16x128xf32>
    %662 = vector.shape_cast %661 : vector<1x16x128xf32> to vector<16x128xf32>
    %663 = vector.broadcast %660 : f32 to vector<16x128xf32>
    %664 = arith.mulf %663, %662 : vector<16x128xf32>
    %665 = arith.addf %659, %664 : vector<16x128xf32>
    %c0_260 = arith.constant 0 : index
    %c12_261 = arith.constant 12 : index
    %c0_262 = arith.constant 0 : index
    %c0_263 = arith.constant 0 : index
    %666 = vector.load %arg8[%c0_260, %c12_261, %c0_262, %c0_263] : memref<1x16x16x128xf32, #tpu.memory_space<vmem>>, vector<1x1x16x128xf32>
    %667 = vector.shape_cast %666 : vector<1x1x16x128xf32> to vector<16x128xf32>
    %668 = vector.shape_cast %665 : vector<16x128xf32> to vector<1x1x16x128xf32>
    tpu.vector_store %arg8[%c0_260, %c12_261, %c0_262, %c0_263], %668 {strides = array<i32>} : memref<1x16x16x128xf32, #tpu.memory_space<vmem>>, vector<1x1x16x128xf32>,
    %c13 = arith.constant 13 : index
    %c0_264 = arith.constant 0 : index
    %669 = memref.load %arg7[%c13, %c0_264] : memref<16x8xf32, #tpu.memory_space<smem>>
    %670 = vector.extract_strided_slice %18 {offsets = [0, 0, 0], sizes = [1, 16, 128], strides = [1, 1, 1]} : vector<8x16x128xf32> to vector<1x16x128xf32>
    %671 = vector.shape_cast %670 : vector<1x16x128xf32> to vector<16x128xf32>
    %672 = vector.broadcast %669 : f32 to vector<16x128xf32>
    %673 = arith.mulf %672, %671 : vector<16x128xf32>
    %c13_265 = arith.constant 13 : index
    %c1_266 = arith.constant 1 : index
    %674 = memref.load %arg7[%c13_265, %c1_266] : memref<16x8xf32, #tpu.memory_space<smem>>
    %675 = vector.extract_strided_slice %18 {offsets = [1, 0, 0], sizes = [1, 16, 128], strides = [1, 1, 1]} : vector<8x16x128xf32> to vector<1x16x128xf32>
    %676 = vector.shape_cast %675 : vector<1x16x128xf32> to vector<16x128xf32>
    %677 = vector.broadcast %674 : f32 to vector<16x128xf32>
    %678 = arith.mulf %677, %676 : vector<16x128xf32>
    %679 = arith.addf %673, %678 : vector<16x128xf32>
    %c13_267 = arith.constant 13 : index
    %c2_268 = arith.constant 2 : index
    %680 = memref.load %arg7[%c13_267, %c2_268] : memref<16x8xf32, #tpu.memory_space<smem>>
    %681 = vector.extract_strided_slice %18 {offsets = [2, 0, 0], sizes = [1, 16, 128], strides = [1, 1, 1]} : vector<8x16x128xf32> to vector<1x16x128xf32>
    %682 = vector.shape_cast %681 : vector<1x16x128xf32> to vector<16x128xf32>
    %683 = vector.broadcast %680 : f32 to vector<16x128xf32>
    %684 = arith.mulf %683, %682 : vector<16x128xf32>
    %685 = arith.addf %679, %684 : vector<16x128xf32>
    %c13_269 = arith.constant 13 : index
    %c3_270 = arith.constant 3 : index
    %686 = memref.load %arg7[%c13_269, %c3_270] : memref<16x8xf32, #tpu.memory_space<smem>>
    %687 = vector.extract_strided_slice %18 {offsets = [3, 0, 0], sizes = [1, 16, 128], strides = [1, 1, 1]} : vector<8x16x128xf32> to vector<1x16x128xf32>
    %688 = vector.shape_cast %687 : vector<1x16x128xf32> to vector<16x128xf32>
    %689 = vector.broadcast %686 : f32 to vector<16x128xf32>
    %690 = arith.mulf %689, %688 : vector<16x128xf32>
    %691 = arith.addf %685, %690 : vector<16x128xf32>
    %c13_271 = arith.constant 13 : index
    %c4_272 = arith.constant 4 : index
    %692 = memref.load %arg7[%c13_271, %c4_272] : memref<16x8xf32, #tpu.memory_space<smem>>
    %693 = vector.extract_strided_slice %18 {offsets = [4, 0, 0], sizes = [1, 16, 128], strides = [1, 1, 1]} : vector<8x16x128xf32> to vector<1x16x128xf32>
    %694 = vector.shape_cast %693 : vector<1x16x128xf32> to vector<16x128xf32>
    %695 = vector.broadcast %692 : f32 to vector<16x128xf32>
    %696 = arith.mulf %695, %694 : vector<16x128xf32>
    %697 = arith.addf %691, %696 : vector<16x128xf32>
    %c13_273 = arith.constant 13 : index
    %c5_274 = arith.constant 5 : index
    %698 = memref.load %arg7[%c13_273, %c5_274] : memref<16x8xf32, #tpu.memory_space<smem>>
    %699 = vector.extract_strided_slice %18 {offsets = [5, 0, 0], sizes = [1, 16, 128], strides = [1, 1, 1]} : vector<8x16x128xf32> to vector<1x16x128xf32>
    %700 = vector.shape_cast %699 : vector<1x16x128xf32> to vector<16x128xf32>
    %701 = vector.broadcast %698 : f32 to vector<16x128xf32>
    %702 = arith.mulf %701, %700 : vector<16x128xf32>
    %703 = arith.addf %697, %702 : vector<16x128xf32>
    %c13_275 = arith.constant 13 : index
    %c6_276 = arith.constant 6 : index
    %704 = memref.load %arg7[%c13_275, %c6_276] : memref<16x8xf32, #tpu.memory_space<smem>>
    %705 = vector.extract_strided_slice %18 {offsets = [6, 0, 0], sizes = [1, 16, 128], strides = [1, 1, 1]} : vector<8x16x128xf32> to vector<1x16x128xf32>
    %706 = vector.shape_cast %705 : vector<1x16x128xf32> to vector<16x128xf32>
    %707 = vector.broadcast %704 : f32 to vector<16x128xf32>
    %708 = arith.mulf %707, %706 : vector<16x128xf32>
    %709 = arith.addf %703, %708 : vector<16x128xf32>
    %c13_277 = arith.constant 13 : index
    %c7_278 = arith.constant 7 : index
    %710 = memref.load %arg7[%c13_277, %c7_278] : memref<16x8xf32, #tpu.memory_space<smem>>
    %711 = vector.extract_strided_slice %18 {offsets = [7, 0, 0], sizes = [1, 16, 128], strides = [1, 1, 1]} : vector<8x16x128xf32> to vector<1x16x128xf32>
    %712 = vector.shape_cast %711 : vector<1x16x128xf32> to vector<16x128xf32>
    %713 = vector.broadcast %710 : f32 to vector<16x128xf32>
    %714 = arith.mulf %713, %712 : vector<16x128xf32>
    %715 = arith.addf %709, %714 : vector<16x128xf32>
    %c0_279 = arith.constant 0 : index
    %c13_280 = arith.constant 13 : index
    %c0_281 = arith.constant 0 : index
    %c0_282 = arith.constant 0 : index
    %716 = vector.load %arg8[%c0_279, %c13_280, %c0_281, %c0_282] : memref<1x16x16x128xf32, #tpu.memory_space<vmem>>, vector<1x1x16x128xf32>
    %717 = vector.shape_cast %716 : vector<1x1x16x128xf32> to vector<16x128xf32>
    %718 = vector.shape_cast %715 : vector<16x128xf32> to vector<1x1x16x128xf32>
    tpu.vector_store %arg8[%c0_279, %c13_280, %c0_281, %c0_282], %718 {strides = array<i32>} : memref<1x16x16x128xf32, #tpu.memory_space<vmem>>, vector<1x1x16x128xf32>,
    %c14 = arith.constant 14 : index
    %c0_283 = arith.constant 0 : index
    %719 = memref.load %arg7[%c14, %c0_283] : memref<16x8xf32, #tpu.memory_space<smem>>
    %720 = vector.extract_strided_slice %18 {offsets = [0, 0, 0], sizes = [1, 16, 128], strides = [1, 1, 1]} : vector<8x16x128xf32> to vector<1x16x128xf32>
    %721 = vector.shape_cast %720 : vector<1x16x128xf32> to vector<16x128xf32>
    %722 = vector.broadcast %719 : f32 to vector<16x128xf32>
    %723 = arith.mulf %722, %721 : vector<16x128xf32>
    %c14_284 = arith.constant 14 : index
    %c1_285 = arith.constant 1 : index
    %724 = memref.load %arg7[%c14_284, %c1_285] : memref<16x8xf32, #tpu.memory_space<smem>>
    %725 = vector.extract_strided_slice %18 {offsets = [1, 0, 0], sizes = [1, 16, 128], strides = [1, 1, 1]} : vector<8x16x128xf32> to vector<1x16x128xf32>
    %726 = vector.shape_cast %725 : vector<1x16x128xf32> to vector<16x128xf32>
    %727 = vector.broadcast %724 : f32 to vector<16x128xf32>
    %728 = arith.mulf %727, %726 : vector<16x128xf32>
    %729 = arith.addf %723, %728 : vector<16x128xf32>
    %c14_286 = arith.constant 14 : index
    %c2_287 = arith.constant 2 : index
    %730 = memref.load %arg7[%c14_286, %c2_287] : memref<16x8xf32, #tpu.memory_space<smem>>
    %731 = vector.extract_strided_slice %18 {offsets = [2, 0, 0], sizes = [1, 16, 128], strides = [1, 1, 1]} : vector<8x16x128xf32> to vector<1x16x128xf32>
    %732 = vector.shape_cast %731 : vector<1x16x128xf32> to vector<16x128xf32>
    %733 = vector.broadcast %730 : f32 to vector<16x128xf32>
    %734 = arith.mulf %733, %732 : vector<16x128xf32>
    %735 = arith.addf %729, %734 : vector<16x128xf32>
    %c14_288 = arith.constant 14 : index
    %c3_289 = arith.constant 3 : index
    %736 = memref.load %arg7[%c14_288, %c3_289] : memref<16x8xf32, #tpu.memory_space<smem>>
    %737 = vector.extract_strided_slice %18 {offsets = [3, 0, 0], sizes = [1, 16, 128], strides = [1, 1, 1]} : vector<8x16x128xf32> to vector<1x16x128xf32>
    %738 = vector.shape_cast %737 : vector<1x16x128xf32> to vector<16x128xf32>
    %739 = vector.broadcast %736 : f32 to vector<16x128xf32>
    %740 = arith.mulf %739, %738 : vector<16x128xf32>
    %741 = arith.addf %735, %740 : vector<16x128xf32>
    %c14_290 = arith.constant 14 : index
    %c4_291 = arith.constant 4 : index
    %742 = memref.load %arg7[%c14_290, %c4_291] : memref<16x8xf32, #tpu.memory_space<smem>>
    %743 = vector.extract_strided_slice %18 {offsets = [4, 0, 0], sizes = [1, 16, 128], strides = [1, 1, 1]} : vector<8x16x128xf32> to vector<1x16x128xf32>
    %744 = vector.shape_cast %743 : vector<1x16x128xf32> to vector<16x128xf32>
    %745 = vector.broadcast %742 : f32 to vector<16x128xf32>
    %746 = arith.mulf %745, %744 : vector<16x128xf32>
    %747 = arith.addf %741, %746 : vector<16x128xf32>
    %c14_292 = arith.constant 14 : index
    %c5_293 = arith.constant 5 : index
    %748 = memref.load %arg7[%c14_292, %c5_293] : memref<16x8xf32, #tpu.memory_space<smem>>
    %749 = vector.extract_strided_slice %18 {offsets = [5, 0, 0], sizes = [1, 16, 128], strides = [1, 1, 1]} : vector<8x16x128xf32> to vector<1x16x128xf32>
    %750 = vector.shape_cast %749 : vector<1x16x128xf32> to vector<16x128xf32>
    %751 = vector.broadcast %748 : f32 to vector<16x128xf32>
    %752 = arith.mulf %751, %750 : vector<16x128xf32>
    %753 = arith.addf %747, %752 : vector<16x128xf32>
    %c14_294 = arith.constant 14 : index
    %c6_295 = arith.constant 6 : index
    %754 = memref.load %arg7[%c14_294, %c6_295] : memref<16x8xf32, #tpu.memory_space<smem>>
    %755 = vector.extract_strided_slice %18 {offsets = [6, 0, 0], sizes = [1, 16, 128], strides = [1, 1, 1]} : vector<8x16x128xf32> to vector<1x16x128xf32>
    %756 = vector.shape_cast %755 : vector<1x16x128xf32> to vector<16x128xf32>
    %757 = vector.broadcast %754 : f32 to vector<16x128xf32>
    %758 = arith.mulf %757, %756 : vector<16x128xf32>
    %759 = arith.addf %753, %758 : vector<16x128xf32>
    %c14_296 = arith.constant 14 : index
    %c7_297 = arith.constant 7 : index
    %760 = memref.load %arg7[%c14_296, %c7_297] : memref<16x8xf32, #tpu.memory_space<smem>>
    %761 = vector.extract_strided_slice %18 {offsets = [7, 0, 0], sizes = [1, 16, 128], strides = [1, 1, 1]} : vector<8x16x128xf32> to vector<1x16x128xf32>
    %762 = vector.shape_cast %761 : vector<1x16x128xf32> to vector<16x128xf32>
    %763 = vector.broadcast %760 : f32 to vector<16x128xf32>
    %764 = arith.mulf %763, %762 : vector<16x128xf32>
    %765 = arith.addf %759, %764 : vector<16x128xf32>
    %c0_298 = arith.constant 0 : index
    %c14_299 = arith.constant 14 : index
    %c0_300 = arith.constant 0 : index
    %c0_301 = arith.constant 0 : index
    %766 = vector.load %arg8[%c0_298, %c14_299, %c0_300, %c0_301] : memref<1x16x16x128xf32, #tpu.memory_space<vmem>>, vector<1x1x16x128xf32>
    %767 = vector.shape_cast %766 : vector<1x1x16x128xf32> to vector<16x128xf32>
    %768 = vector.shape_cast %765 : vector<16x128xf32> to vector<1x1x16x128xf32>
    tpu.vector_store %arg8[%c0_298, %c14_299, %c0_300, %c0_301], %768 {strides = array<i32>} : memref<1x16x16x128xf32, #tpu.memory_space<vmem>>, vector<1x1x16x128xf32>,
    %c15 = arith.constant 15 : index
    %c0_302 = arith.constant 0 : index
    %769 = memref.load %arg7[%c15, %c0_302] : memref<16x8xf32, #tpu.memory_space<smem>>
    %770 = vector.extract_strided_slice %18 {offsets = [0, 0, 0], sizes = [1, 16, 128], strides = [1, 1, 1]} : vector<8x16x128xf32> to vector<1x16x128xf32>
    %771 = vector.shape_cast %770 : vector<1x16x128xf32> to vector<16x128xf32>
    %772 = vector.broadcast %769 : f32 to vector<16x128xf32>
    %773 = arith.mulf %772, %771 : vector<16x128xf32>
    %c15_303 = arith.constant 15 : index
    %c1_304 = arith.constant 1 : index
    %774 = memref.load %arg7[%c15_303, %c1_304] : memref<16x8xf32, #tpu.memory_space<smem>>
    %775 = vector.extract_strided_slice %18 {offsets = [1, 0, 0], sizes = [1, 16, 128], strides = [1, 1, 1]} : vector<8x16x128xf32> to vector<1x16x128xf32>
    %776 = vector.shape_cast %775 : vector<1x16x128xf32> to vector<16x128xf32>
    %777 = vector.broadcast %774 : f32 to vector<16x128xf32>
    %778 = arith.mulf %777, %776 : vector<16x128xf32>
    %779 = arith.addf %773, %778 : vector<16x128xf32>
    %c15_305 = arith.constant 15 : index
    %c2_306 = arith.constant 2 : index
    %780 = memref.load %arg7[%c15_305, %c2_306] : memref<16x8xf32, #tpu.memory_space<smem>>
    %781 = vector.extract_strided_slice %18 {offsets = [2, 0, 0], sizes = [1, 16, 128], strides = [1, 1, 1]} : vector<8x16x128xf32> to vector<1x16x128xf32>
    %782 = vector.shape_cast %781 : vector<1x16x128xf32> to vector<16x128xf32>
    %783 = vector.broadcast %780 : f32 to vector<16x128xf32>
    %784 = arith.mulf %783, %782 : vector<16x128xf32>
    %785 = arith.addf %779, %784 : vector<16x128xf32>
    %c15_307 = arith.constant 15 : index
    %c3_308 = arith.constant 3 : index
    %786 = memref.load %arg7[%c15_307, %c3_308] : memref<16x8xf32, #tpu.memory_space<smem>>
    %787 = vector.extract_strided_slice %18 {offsets = [3, 0, 0], sizes = [1, 16, 128], strides = [1, 1, 1]} : vector<8x16x128xf32> to vector<1x16x128xf32>
    %788 = vector.shape_cast %787 : vector<1x16x128xf32> to vector<16x128xf32>
    %789 = vector.broadcast %786 : f32 to vector<16x128xf32>
    %790 = arith.mulf %789, %788 : vector<16x128xf32>
    %791 = arith.addf %785, %790 : vector<16x128xf32>
    %c15_309 = arith.constant 15 : index
    %c4_310 = arith.constant 4 : index
    %792 = memref.load %arg7[%c15_309, %c4_310] : memref<16x8xf32, #tpu.memory_space<smem>>
    %793 = vector.extract_strided_slice %18 {offsets = [4, 0, 0], sizes = [1, 16, 128], strides = [1, 1, 1]} : vector<8x16x128xf32> to vector<1x16x128xf32>
    %794 = vector.shape_cast %793 : vector<1x16x128xf32> to vector<16x128xf32>
    %795 = vector.broadcast %792 : f32 to vector<16x128xf32>
    %796 = arith.mulf %795, %794 : vector<16x128xf32>
    %797 = arith.addf %791, %796 : vector<16x128xf32>
    %c15_311 = arith.constant 15 : index
    %c5_312 = arith.constant 5 : index
    %798 = memref.load %arg7[%c15_311, %c5_312] : memref<16x8xf32, #tpu.memory_space<smem>>
    %799 = vector.extract_strided_slice %18 {offsets = [5, 0, 0], sizes = [1, 16, 128], strides = [1, 1, 1]} : vector<8x16x128xf32> to vector<1x16x128xf32>
    %800 = vector.shape_cast %799 : vector<1x16x128xf32> to vector<16x128xf32>
    %801 = vector.broadcast %798 : f32 to vector<16x128xf32>
    %802 = arith.mulf %801, %800 : vector<16x128xf32>
    %803 = arith.addf %797, %802 : vector<16x128xf32>
    %c15_313 = arith.constant 15 : index
    %c6_314 = arith.constant 6 : index
    %804 = memref.load %arg7[%c15_313, %c6_314] : memref<16x8xf32, #tpu.memory_space<smem>>
    %805 = vector.extract_strided_slice %18 {offsets = [6, 0, 0], sizes = [1, 16, 128], strides = [1, 1, 1]} : vector<8x16x128xf32> to vector<1x16x128xf32>
    %806 = vector.shape_cast %805 : vector<1x16x128xf32> to vector<16x128xf32>
    %807 = vector.broadcast %804 : f32 to vector<16x128xf32>
    %808 = arith.mulf %807, %806 : vector<16x128xf32>
    %809 = arith.addf %803, %808 : vector<16x128xf32>
    %c15_315 = arith.constant 15 : index
    %c7_316 = arith.constant 7 : index
    %810 = memref.load %arg7[%c15_315, %c7_316] : memref<16x8xf32, #tpu.memory_space<smem>>
    %811 = vector.extract_strided_slice %18 {offsets = [7, 0, 0], sizes = [1, 16, 128], strides = [1, 1, 1]} : vector<8x16x128xf32> to vector<1x16x128xf32>
    %812 = vector.shape_cast %811 : vector<1x16x128xf32> to vector<16x128xf32>
    %813 = vector.broadcast %810 : f32 to vector<16x128xf32>
    %814 = arith.mulf %813, %812 : vector<16x128xf32>
    %815 = arith.addf %809, %814 : vector<16x128xf32>
    %c0_317 = arith.constant 0 : index
    %c15_318 = arith.constant 15 : index
    %c0_319 = arith.constant 0 : index
    %c0_320 = arith.constant 0 : index
    %816 = vector.load %arg8[%c0_317, %c15_318, %c0_319, %c0_320] : memref<1x16x16x128xf32, #tpu.memory_space<vmem>>, vector<1x1x16x128xf32>
    %817 = vector.shape_cast %816 : vector<1x1x16x128xf32> to vector<16x128xf32>
    %818 = vector.shape_cast %815 : vector<16x128xf32> to vector<1x1x16x128xf32>
    tpu.vector_store %arg8[%c0_317, %c15_318, %c0_319, %c0_320], %818 {strides = array<i32>} : memref<1x16x16x128xf32, #tpu.memory_space<vmem>>, vector<1x1x16x128xf32>,
    return
  }
  func.func @transform_0(%arg0: i32) -> (i32, i32, i32) {
    %c0_i32 = arith.constant 0 : i32
    %c0_i32_0 = arith.constant 0 : i32
    %c0_i32_1 = arith.constant 0 : i32
    return %arg0, %c0_i32, %c0_i32_0 : i32, i32, i32
  }
  func.func @transform_1(%arg0: i32) -> (i32, i32) {
    %c0_i32 = arith.constant 0 : i32
    %c0_i32_0 = arith.constant 0 : i32
    %c0_i32_1 = arith.constant 0 : i32
    return %c0_i32, %c0_i32_0 : i32, i32
  }
  func.func @transform_2(%arg0: i32) -> (i32, i32) {
    %c0_i32 = arith.constant 0 : i32
    %c0_i32_0 = arith.constant 0 : i32
    %c0_i32_1 = arith.constant 0 : i32
    return %c0_i32, %c0_i32_0 : i32, i32
  }
  func.func @transform_3(%arg0: i32) -> (i32, i32) {
    %c0_i32 = arith.constant 0 : i32
    %c0_i32_0 = arith.constant 0 : i32
    %c0_i32_1 = arith.constant 0 : i32
    return %c0_i32, %c0_i32_0 : i32, i32
  }
  func.func @transform_4(%arg0: i32) -> (i32, i32) {
    %c0_i32 = arith.constant 0 : i32
    %c0_i32_0 = arith.constant 0 : i32
    %c0_i32_1 = arith.constant 0 : i32
    return %c0_i32, %c0_i32_0 : i32, i32
  }
  func.func @transform_5(%arg0: i32) -> (i32, i32, i32) {
    %c0_i32 = arith.constant 0 : i32
    %c0_i32_0 = arith.constant 0 : i32
    %c0_i32_1 = arith.constant 0 : i32
    %c0_i32_2 = arith.constant 0 : i32
    return %c0_i32, %c0_i32_0, %c0_i32_1 : i32, i32, i32
  }
  func.func @transform_6(%arg0: i32) -> (i32, i32) {
    %c0_i32 = arith.constant 0 : i32
    %c0_i32_0 = arith.constant 0 : i32
    %c0_i32_1 = arith.constant 0 : i32
    return %c0_i32, %c0_i32_0 : i32, i32
  }
  func.func @transform_7(%arg0: i32) -> (i32, i32, i32, i32) {
    %c0_i32 = arith.constant 0 : i32
    %c0_i32_0 = arith.constant 0 : i32
    %c0_i32_1 = arith.constant 0 : i32
    %c0_i32_2 = arith.constant 0 : i32
    return %arg0, %c0_i32, %c0_i32_0, %c0_i32_1 : i32, i32, i32, i32
  }
}

</mosaic_0001>

<bundles_post_ra>
// kernel: single_task_model.1
= control target key start
LH: loop header
LB: loop body
LE: loop exit
PB: predicated region body
PF: predicated region fallthrough
CT: control target
= control target key end

     0   :  { %s4336_s0 = inlined_call_operand.vmem [shape: bf16[2,64,128], index: 0, kind: input, shape index: {}]   ;;  %s4337_s1 = inlined_call_operand.vmem [shape: bf16[128,128], index: 1, kind: input, shape index: {}]   ;;  %s4338_s2 = inlined_call_operand.vmem [shape: f32[1,128], index: 2, kind: input, shape index: {}]   ;;  %s4339_s3 = inlined_call_operand.vmem [shape: bf16[128,128], index: 3, kind: input, shape index: {}]   ;;  %s4340_s4 = inlined_call_operand.vmem [shape: f32[1,128], index: 4, kind: input, shape index: {}]   ;;  %s4341_s5 = inlined_call_operand.vmem [shape: bf16[8,16,8], index: 5, kind: input, shape index: {}]   ;;  %s4342_s6 = inlined_call_operand.vmem [shape: f32[16,8], index: 6, kind: input, shape index: {}]   ;;  %s4343_s7 = inlined_call_operand.vmem [shape: f32[2,16,16,128], index: 7, kind: output, shape index: {}]  }
   0x1   :  { %4516 = sst [smem:[#allocation126_spill]] %s4336_s0 }
   0x2   :  { %4517 = sst [smem:[#allocation127_spill]] %s4337_s1 }
   0x3   :  { %4518 = sst [smem:[#allocation128_spill]] %s4338_s2 }
   0x4   :  { %4519 = sst [smem:[#allocation129_spill]] %s4339_s3 }
   0x5   :  { %4520 = sst [smem:[#allocation130_spill]] %s4340_s4 }
   0x6   :  { %4521 = sst [smem:[#allocation131_spill]] %s4341_s5 }
   0x7   :  { %4522 = sst [smem:[#allocation132_spill]] %s4342_s6 }
   0x8   :  { %4523 = sst [smem:[#allocation133_spill]] %s4343_s7 }
   0x9   :  { %12 = vsyncpa [#allocation3], 0  ;;  %s2373_s24 = smov 0  }
   0xa LB: > { %4524 = sst [smem:[#allocation5_spill]] %s2326_s24  ;;  %s2379_s25 = sadd.s32 4294967295, %s2326_s24   ;;  %s2326_s24 = sphi %s2373_s24, %s18_s24  }
   0xb   : > { %p1906_p0 = scmp.ge.s32.totalorder %s2326_s24, 1  ;;  %p201_p1 = scmp.lt.s32.totalorder %s2326_s24, 3 }
   0xc   : > { %s4525_s6 = sld [smem:[#allocation132_spill]]  ;;  %p2258_p3 = scmp.eq.s32.totalorder %s2379_s25, 0 }
   0xd   : > { %p2386_p2 = pnand %p1906_p0, %p201_p1 }
   0xf   : > { %p2254_p4 = pneg %p2386_p2 }
  0x11   : > { %p2395_p5 = pnand %p2258_p3, %p2254_p4 }
  0x12   : > { %s228_s28 = sshll.u32 %s4525_s6, 4  ;;  %s229_s28 = int_to_ptr.vmem [resolvable:$true] %s228_s28 }
  0x13   : > { %s2301_s8 = scalar_lea.vmem %s229_s28, 256  ;;  %p2303_p7 = pneg %p2395_p5 }
  0x14   : > { %p2302_p6 = scmp.ne.s32.totalorder %s229_s28, %s2301_s8  ;;  %p2309_p10 = scmp.lt.s32.totalorder %s229_s28, %s229_s28 }
  0x15   : > { %p2310_p11 = scmp.lt.s32.totalorder %s2301_s8, %s2301_s8 }
  0x16   : > { %p2304_p8 = pnand %p2303_p7, %p2302_p6 }
  0x17   : > { %p2311_p12 = por %p2310_p11, %p2309_p10 }
  0x18   : > { %p2305_p9 = pneg %p2304_p8 }
  0x1a   : > { %p2312_p13 = pnand %p2311_p12, %p2305_p9 }
  0x1c   : > { %2315 = shalt.err (!%p2312_p13)
}
  0x1d   : > { %s2328_s9 = smov [#allocation2]   ;;  %s2329_s10 = smov 128  }
  0x1e   : > { %s2330_s11 = smov 8   ;;  %252 = sbr.rel (%p2386_p2) target bundleno = 907 (0x38b), region = 48 }
  0x1f   : > { %2257 = dma.vmem_to_smem (!%p2395_p5), %s229_s28, 256, %s2328_s9, [#allocation3], %s2329_s10, %s2329_s10, %s2330_s11  }
  0x25   : > { %2321 = dma.done.wait (%p2258_p3), [#allocation3], 256  }
  0x26   : > { %2323 = vsyncadd (%p2258_p3), [#allocation3], 4294967040 }
  0x27   : > { %258 = sfence }
  0x28   : > { %s4528_s1 = sld [smem:[#allocation127_spill]]  ;;  %p285_p0 = scmp.lt.s32.totalorder %s2379_s25, 1  ;;  %v2331_v49 = vmov 0.0   ;;  %vm2332_vm0 = vmmov 0   ;;  %vm645_vm1 = vcmask 1043456   ;;  %vm641_vm2 = vcmask 64512  }
  0x29   : > { %s4530_s0 = sld [smem:[#allocation126_spill]]  ;;  %s4531_s3 = sld [smem:[#allocation129_spill]] }
  0x2a   : > { %s5058_s25 = smov (!%p285_p0, %s2379_s25), 1  ;;  %s4532_s2 = sld [smem:[#allocation128_spill]] }
  0x2b   : > { %4529 = sst [smem:[#allocation6_spill]] %s5058_s25  ;;  %s2112_s18 = sshll.u32 %s5058_s25, 5 }
  0x2c   : > { %s4533_s4 = sld [smem:[#allocation130_spill]]  ;;  %s4534_s5 = sld [smem:[#allocation131_spill]] }
  0x2d   : > { %s2541_s29 = sld [smem:[#allocation2]]  ;;  %s2573_s22 = sld [smem:[#allocation2 + $0x1]] }
  0x2e   : > { %v2273_v0 = vld [vmem:[%s4528_s1] sm:$0xff]   ;;  %v2274_v1 = vld [vmem:[%s4528_s1 + $0x8] sm:$0xff]   ;;  %v2275_v2 = vld [vmem:[%s4528_s1 + $0x10] sm:$0xff]   ;;  %s2543_s30 = sld [smem:[#allocation2 + $0x80]]  ;;  %s2575_s23 = sld [smem:[#allocation2 + $0x81]] }
  0x2f   : > { %2154 = vmatprep.subr.bf16.mxu0 %v2273_v0  ;;  %s2426_s21 = scalar_lea.vmem %s4530_s0, %s2112_s18  ;;  %v2276_v3 = vld [vmem:[%s4528_s1 + $0x18] sm:$0xff]   ;;  %v2277_v5 = vld [vmem:[%s4528_s1 + $0x20] sm:$0xff]   ;;  %v2286_v7 = vld [vmem:[%s4531_s3 + $0x8] sm:$0xff]   ;;  %s2545_s8 = sld [smem:[#allocation2 + $0x100]] }
  0x30   : > { %2155 = vmatpush3.bf16.msra.mxu0 %v2273_v0  ;;  %v2281_v4 = vld [vmem:[%s2426_s21] sm:$0xff]   ;;  %v2278_v8 = vld [vmem:[%s4528_s1 + $0x28] sm:$0xff]   ;;  %v2287_v9 = vld [vmem:[%s4531_s3 + $0x10] sm:$0xff]   ;;  %s2549_s9 = sld [smem:[#allocation2 + $0x200]]  ;;  %s2577_s26 = sld [smem:[#allocation2 + $0x101]] }
  0x31   : > { %2156 = vmatprep.subr.bf16.mxu0 %v2274_v1  ;;  %2170 = vmatprep.mubr.bf16.mxu0 %v2281_v4  ;;  %v2285_v6 = vld [vmem:[%s4531_s3] sm:$0xff]   ;;  %v2279_v10 = vld [vmem:[%s4528_s1 + $0x30] sm:$0xff]   ;;  %v2288_v11 = vld [vmem:[%s4531_s3 + $0x18] sm:$0xff]   ;;  %s2551_s10 = sld [smem:[#allocation2 + $0x280]]  ;;  %s2579_s27 = sld [smem:[#allocation2 + $0x181]] }
  0x32   : > { %2178 = vmatprep.subr.bf16.mxu1 %v2285_v6  ;;  %v2280_v12 = vld [vmem:[%s4528_s1 + $0x38] sm:$0xff]   ;;  %v2289_v13 = vld [vmem:[%s4531_s3 + $0x20] sm:$0xff]   ;;  %v2290_v14 = vld [vmem:[%s4531_s3 + $0x28] sm:$0xff]   ;;  %s2553_s11 = sld [smem:[#allocation2 + $0x300]]  ;;  %s2581_s28 = sld [smem:[#allocation2 + $0x201]] }
  0x33   : > { %2179 = vmatpush3.bf16.msra.mxu1 %v2285_v6  ;;  %v2282_v15 = vld [vmem:[%s2426_s21 + $0x8] sm:$0xff]   ;;  %v2283_v16 = vld [vmem:[%s2426_s21 + $0x10] sm:$0xff]   ;;  %v2284_v17 = vld [vmem:[%s2426_s21 + $0x18] sm:$0xff]   ;;  %4535 = sst [smem:[#allocation7_spill]] %s2541_s29  ;;  %s2547_s21 = sld [smem:[#allocation2 + $0x180]] }
  0x34   : > { %2157 = vmatpush3.bf16.msra.mxu0 %v2274_v1  ;;  %2180 = vmatprep.subr.bf16.mxu1 %v2286_v7  ;;  %v2291_v18 = vld [vmem:[%s4531_s3 + $0x30] sm:$0xff]   ;;  %v2292_v19 = vld [vmem:[%s4531_s3 + $0x38] sm:$0xff]   ;;  %v1915_v20 = vld [vmem:[%s4532_s2] ss:$0 sm:$0xff]  ;;  %4536 = sst [smem:[#allocation8_spill]] %s2543_s30  ;;  %s2555_s12 = sld [smem:[#allocation2 + $0x380]] }
  0x35   : > { %2158 = vmatprep.subr.bf16.mxu0 %v2275_v2  ;;  %v1928_v50 = vld [vmem:[%s4533_s4] ss:$0 sm:$0xff]  ;;  %4537 = sst [smem:[#allocation9_spill]] %s2545_s8  ;;  %s2557_s13 = sld [smem:[#allocation2 + $0x400]] }
  0x36   : > { %v2293_v63 = vld [vmem:[%s4534_s5] sm:$0xff]   ;;  %4539 = sst [smem:[#allocation11_spill]] %s2549_s9  ;;  %s2559_s14 = sld [smem:[#allocation2 + $0x480]] }
  0x37   : > { %2181 = vmatpush3.bf16.msra.mxu1 %v2286_v7  ;;  %4540 = sst [smem:[#allocation12_spill]] %s2551_s10  ;;  %s2561_s15 = sld [smem:[#allocation2 + $0x500]] }
  0x38   : > { %2159 = vmatpush3.bf16.msra.mxu0 %v2275_v2  ;;  %2182 = vmatprep.subr.bf16.mxu1 %v2287_v9  ;;  %v2294_v2 = vld [vmem:[%s4534_s5 + $0x8] sm:$0xff]   ;;  %4541 = sst [smem:[#allocation13_spill]] %s2553_s11  ;;  %s2583_s0 = sld [smem:[#allocation2 + $0x281]] }
  0x39   : > { %2160 = vmatprep.subr.bf16.mxu0 %v2276_v3  ;;  %4538 = sst [smem:[#allocation10_spill]] %s2547_s21  ;;  %s2563_s16 = sld [smem:[#allocation2 + $0x580]] }
  0x3a   : > { %4542 = sst [smem:[#allocation14_spill]] %s2555_s12  ;;  %s2565_s17 = sld [smem:[#allocation2 + $0x600]] }
  0x3b   : > { %2183 = vmatpush3.bf16.msra.mxu1 %v2287_v9  ;;  %4543 = sst [smem:[#allocation15_spill]] %s2557_s13  ;;  %s2567_s18 = sld [smem:[#allocation2 + $0x680]] }
  0x3c   : > { %2161 = vmatpush3.bf16.msra.mxu0 %v2276_v3  ;;  %2184 = vmatprep.subr.bf16.mxu1 %v2288_v11  ;;  %4544 = sst [smem:[#allocation16_spill]] %s2559_s14  ;;  %s2569_s19 = sld [smem:[#allocation2 + $0x700]] }
  0x3d   : > { %2162 = vmatprep.subr.bf16.mxu0 %v2277_v5  ;;  %4545 = sst [smem:[#allocation17_spill]] %s2561_s15  ;;  %s2571_s20 = sld [smem:[#allocation2 + $0x780]] }
  0x3e   : > { %4551 = sst [smem:[#allocation23_spill]] %s2573_s22  ;;  %s2585_s1 = sld [smem:[#allocation2 + $0x301]] }
  0x3f   : > { %2185 = vmatpush3.bf16.msra.mxu1 %v2288_v11  ;;  %4546 = sst [smem:[#allocation18_spill]] %s2563_s16  ;;  %s2587_s2 = sld [smem:[#allocation2 + $0x381]] }
  0x40   : > { %2163 = vmatpush3.bf16.msra.mxu0 %v2277_v5  ;;  %2186 = vmatprep.subr.bf16.mxu1 %v2289_v13  ;;  %4547 = sst [smem:[#allocation19_spill]] %s2565_s17  ;;  %s2589_s3 = sld [smem:[#allocation2 + $0x401]] }
  0x41   : > { %2164 = vmatprep.subr.bf16.mxu0 %v2278_v8  ;;  %4548 = sst [smem:[#allocation20_spill]] %s2567_s18  ;;  %s2591_s4 = sld [smem:[#allocation2 + $0x481]] }
  0x42   : > { %4549 = sst [smem:[#allocation21_spill]] %s2569_s19  ;;  %s2595_s6 = sld [smem:[#allocation2 + $0x581]] }
  0x43   : > { %2187 = vmatpush3.bf16.msra.mxu1 %v2289_v13  ;;  %4550 = sst [smem:[#allocation22_spill]] %s2571_s20 }
  0x44   : > { %2165 = vmatpush3.bf16.msra.mxu0 %v2278_v8  ;;  %2188 = vmatprep.subr.bf16.mxu1 %v2290_v14  ;;  %4552 = sst [smem:[#allocation24_spill]] %s2575_s23  ;;  %s2597_s24 = sld [smem:[#allocation2 + $0x601]] }
  0x45   : > { %2166 = vmatprep.subr.bf16.mxu0 %v2279_v10  ;;  %4553 = sst [smem:[#allocation25_spill]] %s2577_s26  ;;  %s2599_s7 = sld [smem:[#allocation2 + $0x681]] }
  0x46   : > { %4554 = sst [smem:[#allocation26_spill]] %s2579_s27  ;;  %s2601_s25 = sld [smem:[#allocation2 + $0x701]] }
  0x47   : > { %2189 = vmatpush3.bf16.msra.mxu1 %v2290_v14  ;;  %4555 = sst [smem:[#allocation27_spill]] %s2581_s28  ;;  %s2603_s28 = sld [smem:[#allocation2 + $0x781]] }
  0x48   : > { %2167 = vmatpush3.bf16.msra.mxu0 %v2279_v10  ;;  %2190 = vmatprep.subr.bf16.mxu1 %v2291_v18  ;;  %4556 = sst [smem:[#allocation28_spill]] %s2583_s0  ;;  %s2605_s0 = sld [smem:[#allocation2 + $0x2]] }
  0x49   : > { %2168 = vmatprep.subr.bf16.mxu0 %v2280_v12  ;;  %4557 = sst [smem:[#allocation29_spill]] %s2585_s1  ;;  %s2607_s1 = sld [smem:[#allocation2 + $0x82]] }
  0x4a   : > { %4558 = sst [smem:[#allocation30_spill]] %s2587_s2  ;;  %s2609_s2 = sld [smem:[#allocation2 + $0x102]] }
  0x4b   : > { %2191 = vmatpush3.bf16.msra.mxu1 %v2291_v18  ;;  %4559 = sst [smem:[#allocation31_spill]] %s2589_s3 }
  0x4c   : > { %2169 = vmatpush3.bf16.msra.mxu0 %v2280_v12  ;;  %2192 = vmatprep.subr.bf16.mxu1 %v2292_v19  ;;  %v2295_v12 = vld [vmem:[%s4534_s5 + $0x10] sm:$0xff]   ;;  %4560 = sst [smem:[#allocation32_spill]] %s2591_s4  ;;  %s2611_s3 = sld [smem:[#allocation2 + $0x182]] }
  0x4d   : > { %2202 = vmatprep.subr.bf16.mxu0 %v2331_v49  ;;  %4562 = sst [smem:[#allocation34_spill]] %s2595_s6  ;;  %s2613_s4 = sld [smem:[#allocation2 + $0x202]] }
  0x4e   : > { %4563 = sst [smem:[#allocation35_spill]] %s2597_s24  ;;  %s2617_s6 = sld [smem:[#allocation2 + $0x302]] }
  0x4f   : > { %2171 = vmatmul.mubr.bf16.vlgmr.msra.gmra.mrb[0].mxu0 %v2282_v15  ;;  %2193 = vmatpush3.bf16.msra.mxu1 %v2292_v19  ;;  %v2296_v15 = vld [vmem:[%s4534_s5 + $0x18] sm:$0xff]   ;;  %4564 = sst [smem:[#allocation36_spill]] %s2599_s7  ;;  %s2619_s24 = sld [smem:[#allocation2 + $0x382]] }
  0x50   : > { %2174 = vmatprep.mubr.bf16.mxu0 %v2283_v16  ;;  %2208 = vmatprep.subr.bf16.mxu1 %v2331_v49  ;;  %4565 = sst [smem:[#allocation37_spill]] %s2601_s25  ;;  %s2621_s7 = sld [smem:[#allocation2 + $0x402]] }
  0x51   : > { %4566 = sst [smem:[#allocation38_spill]] %s2603_s28  ;;  %s2623_s25 = sld [smem:[#allocation2 + $0x482]] }
  0x52   : > { %4567 = sst [smem:[#allocation39_spill]] %s2605_s0 }
  0x53   : > { %4568 = sst [smem:[#allocation40_spill]] %s2607_s1  ;;  %s2625_s28 = sld [smem:[#allocation2 + $0x502]] }
  0x54   : > { %4569 = sst [smem:[#allocation41_spill]] %s2609_s2  ;;  %s2627_s0 = sld [smem:[#allocation2 + $0x582]] }
  0x55   : > { %4570 = sst [smem:[#allocation42_spill]] %s2611_s3  ;;  %s2629_s1 = sld [smem:[#allocation2 + $0x602]] }
  0x56   : > { %4571 = sst [smem:[#allocation43_spill]] %s2613_s4  ;;  %s2631_s2 = sld [smem:[#allocation2 + $0x682]] }
  0x57   : > { %2175 = vmatmul.mubr.bf16.gmra.mrb[4].mxu0 %v2284_v17  ;;  %4573 = sst [smem:[#allocation45_spill]] %s2617_s6  ;;  %s2633_s3 = sld [smem:[#allocation2 + $0x702]] }
  0x58   : > { %2204 = vmatprep.mubr.msk.bf16.mxu0 %vm2332_vm0, %v2331_v49  ;;  %4574 = sst [smem:[#allocation46_spill]] %s2619_s24  ;;  %s2635_s4 = sld [smem:[#allocation2 + $0x782]] }
  0x59   : > { %4575 = sst [smem:[#allocation47_spill]] %s2621_s7  ;;  %s2639_s6 = sld [smem:[#allocation2 + $0x83]] }
  0x5a   : > { %4576 = sst [smem:[#allocation48_spill]] %s2623_s25 }
  0x5b   : > { %4577 = sst [smem:[#allocation49_spill]] %s2625_s28  ;;  %s2641_s24 = sld [smem:[#allocation2 + $0x103]] }
  0x5c   : > { %4578 = sst [smem:[#allocation50_spill]] %s2627_s0  ;;  %s2643_s7 = sld [smem:[#allocation2 + $0x183]] }
  0x5d   : > { %4579 = sst [smem:[#allocation51_spill]] %s2629_s1  ;;  %s2645_s25 = sld [smem:[#allocation2 + $0x203]] }
  0x5e   : > { %4580 = sst [smem:[#allocation52_spill]] %s2631_s2  ;;  %s2647_s28 = sld [smem:[#allocation2 + $0x283]] }
  0x5f   : > { %4581 = sst [smem:[#allocation53_spill]] %s2633_s3  ;;  %s2649_s0 = sld [smem:[#allocation2 + $0x303]] }
  0x60   : > { %4582 = sst [smem:[#allocation54_spill]] %s2635_s4  ;;  %s2651_s1 = sld [smem:[#allocation2 + $0x383]] }
  0x61   : > { %4584 = sst [smem:[#allocation56_spill]] %s2639_s6 }
  0x62   : > { %4585 = sst [smem:[#allocation57_spill]] %s2641_s24  ;;  %s2653_s2 = sld [smem:[#allocation2 + $0x403]] }
  0x63   : > { %4586 = sst [smem:[#allocation58_spill]] %s2643_s7  ;;  %s2655_s3 = sld [smem:[#allocation2 + $0x483]] }
  0x64   : > { %4587 = sst [smem:[#allocation59_spill]] %s2645_s25  ;;  %s2657_s4 = sld [smem:[#allocation2 + $0x503]] }
  0x65   : > { %4588 = sst [smem:[#allocation60_spill]] %s2647_s28  ;;  %s2661_s6 = sld [smem:[#allocation2 + $0x603]] }
  0x66   : > { %4589 = sst [smem:[#allocation61_spill]] %s2649_s0  ;;  %s2663_s24 = sld [smem:[#allocation2 + $0x683]] }
  0x67   : > { %4590 = sst [smem:[#allocation62_spill]] %s2651_s1  ;;  %s2665_s7 = sld [smem:[#allocation2 + $0x703]] }
  0x68   : > { %4591 = sst [smem:[#allocation63_spill]] %s2653_s2  ;;  %s2667_s25 = sld [smem:[#allocation2 + $0x783]] }
  0x69   : > { %4592 = sst [smem:[#allocation64_spill]] %s2655_s3  ;;  %s2669_s28 = sld [smem:[#allocation2 + $0x4]] }
  0x6a   : > { %4593 = sst [smem:[#allocation65_spill]] %s2657_s4  ;;  %s2827_s3 = sld [smem:[#allocation2 + $0x786]] }
  0x6b   : > { %4595 = sst [smem:[#allocation67_spill]] %s2661_s6  ;;  %s2671_s1 = sld [smem:[#allocation2 + $0x84]] }
  0x6c   : > { %4596 = sst [smem:[#allocation68_spill]] %s2663_s24  ;;  %s2673_s2 = sld [smem:[#allocation2 + $0x104]] }
  0x6d   : > { %4597 = sst [smem:[#allocation69_spill]] %s2665_s7  ;;  %s2675_s4 = sld [smem:[#allocation2 + $0x184]] }
  0x6e   : > { %4598 = sst [smem:[#allocation70_spill]] %s2667_s25  ;;  %s2679_s6 = sld [smem:[#allocation2 + $0x284]] }
  0x6f   : > { %4599 = sst [smem:[#allocation71_spill]] %s2669_s28  ;;  %s2681_s24 = sld [smem:[#allocation2 + $0x304]] }
  0x70   : > { %s2683_s25 = sld [smem:[#allocation2 + $0x384]]  ;;  %4693 = sst [smem:[#allocation115_spill]] %s2827_s3 }
  0x71   : > { %4600 = sst [smem:[#allocation72_spill]] %s2671_s1  ;;  %s2685_s28 = sld [smem:[#allocation2 + $0x404]] }
  0x72   : > { %4601 = sst [smem:[#allocation73_spill]] %s2673_s2  ;;  %s4797_s0 = sld [smem:[#allocation50_spill]] }
  0x73   : > { %4602 = sst [smem:[#allocation74_spill]] %s2675_s4  ;;  %s2687_s1 = sld [smem:[#allocation2 + $0x484]] }
  0x74   : > { %4604 = sst [smem:[#allocation76_spill]] %s2679_s6  ;;  %s2689_s2 = sld [smem:[#allocation2 + $0x504]] }
  0x75   : > { %4605 = sst [smem:[#allocation77_spill]] %s2681_s24  ;;  %s2691_s4 = sld [smem:[#allocation2 + $0x584]] }
  0x76   : > { %4606 = sst [smem:[#allocation78_spill]] %s2683_s25  ;;  %s2693_s7 = sld [smem:[#allocation2 + $0x604]] }
  0x77   : > { %4607 = sst [smem:[#allocation79_spill]] %s2685_s28  ;;  %s2695_s6 = sld [smem:[#allocation2 + $0x684]] }
  0x78   : > { %s2697_s24 = sld [smem:[#allocation2 + $0x704]]  ;;  %s2891_s28 = sld [smem:[#allocation2 + $0x787]] }
  0x79   : > { %4608 = sst [smem:[#allocation80_spill]] %s2687_s1  ;;  %s2699_s25 = sld [smem:[#allocation2 + $0x784]] }
  0x7a   : > { %4609 = sst [smem:[#allocation81_spill]] %s2689_s2  ;;  %s2705_s2 = sld [smem:[#allocation2 + $0x5]] }
  0x7b   : > { %4610 = sst [smem:[#allocation82_spill]] %s2691_s4  ;;  %s2859_s1 = sld [smem:[#allocation2 + $0x387]] }
  0x7c   : > { %4611 = sst [smem:[#allocation83_spill]] %s2693_s7  ;;  %s2707_s7 = sld [smem:[#allocation2 + $0x85]] }
  0x7d   : > { %4612 = sst [smem:[#allocation84_spill]] %s2695_s6  ;;  %s4798_s3 = sld [smem:[#allocation51_spill]] }
  0x7e   : > { %4613 = sst [smem:[#allocation85_spill]] %s2697_s24  ;;  %s2867_s6 = sld [smem:[#allocation2 + $0x487]] }
  0x7f   : > { %4614 = sst [smem:[#allocation86_spill]] %s2699_s25  ;;  %s2713_s25 = sld [smem:[#allocation2 + $0x105]] }
  0x80   : > { %4615 = sst [smem:[#allocation87_spill]] %s2705_s2  ;;  %s4799_s4 = sld [smem:[#allocation52_spill]] }
  0x81   : > { %4711 = sst [smem:[#allocation122_spill]] %s2859_s1  ;;  %s2873_s1 = sld [smem:[#allocation2 + $0x507]] }
  0x82   : > { %4616 = sst [smem:[#allocation88_spill]] %s2707_s7  ;;  %s2875_s7 = sld [smem:[#allocation2 + $0x587]] }
  0x83   : > { %4730 = sst [smem:[#allocation125_spill]] %s2891_s28  ;;  %s4778_s2 = sld [smem:[#allocation39_spill]] }
  0x84   : > { %4717 = sst [smem:[#allocation124_spill]] %s2867_s6  ;;  %s4759_s6 = sld [smem:[#allocation26_spill]] }
  0x85   : > { %4617 = sst [smem:[#allocation89_spill]] %s2713_s25  ;;  %s4626_s25 = sld [smem:[#allocation32_spill]] }
 0x122   : > { %v2172_v21 = vpop.f32.mrb[0].mxu0 }
 0x123   : > { %v442_v22 = vadd.f32 %v2172_v21, %v1915_v20  ;;  %v433_v23 = vpop.f32.mrb[1].mxu0 }
 0x124   : > { %v434_v24 = vadd.f32 %v1915_v20, %v433_v23  ;;  %v2173_v25 = vpop.f32.mrb[2].mxu0 }
 0x125   : > { %v445_v26 = vadd.f32 %v2173_v25, %v1915_v20  ;;  %v436_v27 = vpop.f32.mrb[3].mxu0  ;;  %v466_v29 = vmax.f32 %v442_v22, 0.0  ;;  %v2298_v22 = vld [vmem:[%s4534_s5 + $0x28] sm:$0xff]   ;;  %v2299_v25 = vld [vmem:[%s4534_s5 + $0x30] sm:$0xff]  }
 0x126   : > { %v437_v28 = vadd.f32 %v1915_v20, %v436_v27  ;;  %v464_v31 = vmax.f32 %v434_v24, 0.0  ;;  %v1055_v27 = vstv %s2541_s29  ;;  %s2721_s29 = sld [smem:[#allocation2 + $0x205]] }
 0x127   : > { %v467_v30 = vmax.f32 %v445_v26, 0.0  ;;  %v2300_v26 = vld [vmem:[%s4534_s5 + $0x38] sm:$0xff]  }
 0x128   : > { %v465_v32 = vmax.f32 %v437_v28, 0.0  ;;  %v1103_v28 = vstv %s2543_s30  ;;  %s2715_s30 = sld [smem:[#allocation2 + $0x185]] }
 0x129   : > { %v473_v33 = vpack.c.bf16 %v467_v30, %v466_v29  ;;  %v1152_v29 = vstv %s2545_s8  ;;  %v1201_v30 = vstv %s2547_s21  ;;  %s4619_s21 = sld [smem:[#allocation27_spill]]  ;;  %s4620_s8 = sld [smem:[#allocation28_spill]] }
 0x12a   : > { %v472_v34 = vpack.c.bf16 %v465_v32, %v464_v31  ;;  %v2176_v35 = vpop.f32.mrb[4].mxu0  ;;  %v1250_v31 = vstv %s2549_s9  ;;  %v1299_v32 = vstv %s2551_s10  ;;  %s4622_s9 = sld [smem:[#allocation29_spill]]  ;;  %s2723_s10 = sld [smem:[#allocation2 + $0x285]] }
 0x12b   : > { %v458_v36 = vadd.f32 %v2176_v35, %v1915_v20  ;;  %v449_v37 = vpop.f32.mrb[5].mxu0  ;;  %v1446_v35 = vstv %s2557_s13 }
 0x12c   : > { %2194 = vmatprep.mubr.bf16.mxu1 %v472_v34  ;;  %v450_v38 = vadd.f32 %v1915_v20, %v449_v37  ;;  %v2177_v39 = vpop.f32.mrb[6].mxu0  ;;  %v1397_v34 = vstv %s2555_s12  ;;  %v1544_v37 = vstv %s2561_s15  ;;  %4621 = sst [smem:[#allocation91_spill]] %s2721_s29  ;;  %s4625_s12 = sld [smem:[#allocation31_spill]] }
 0x12d   : > { %2195 = vmatmul.mubr.bf16.vlgmr.msra.gmra.mrb[0].mxu1 %v473_v33  ;;  %v470_v40 = vmax.f32 %v458_v36, 0.0  ;;  %v461_v41 = vadd.f32 %v2177_v39, %v1915_v20  ;;  %v452_v42 = vpop.f32.mrb[7].mxu0  ;;  %v1348_v33 = vstv %s2553_s11  ;;  %v1495_v36 = vstv %s2559_s14  ;;  %s4624_s11 = sld [smem:[#allocation30_spill]]  ;;  %s2731_s14 = sld [smem:[#allocation2 + $0x385]] }
 0x12e   : > { %v468_v43 = vmax.f32 %v450_v38, 0.0  ;;  %v453_v44 = vadd.f32 %v1915_v20, %v452_v42  ;;  %v2297_v20 = vld [vmem:[%s4534_s5 + $0x20] sm:$0xff]   ;;  %s2593_s5 = sld [smem:[#allocation2 + $0x501]]  ;;  %4618 = sst [smem:[#allocation90_spill]] %s2715_s30  ;;  %v1593_v38 = vstv %s2563_s16  ;;  %v1642_v39 = vstv %s2565_s17 }
 0x12f   : > { %v471_v45 = vmax.f32 %v461_v41, 0.0  ;;  %v1740_v41 = vstv %s2569_s19  ;;  %v1789_v42 = vstv %s2571_s20  ;;  %s2729_s30 = sld [smem:[#allocation2 + $0x305]]  ;;  %s4631_s16 = sld [smem:[#allocation35_spill]] }
 0x130   : > { %v469_v46 = vmax.f32 %v453_v44, 0.0  ;;  %4623 = sst [smem:[#allocation92_spill]] %s2723_s10  ;;  %s4630_s15 = sld [smem:[#allocation34_spill]]  ;;  %v1107_v44 = vstv %s2575_s23 }
 0x131   : > { %v475_v47 = vpack.c.bf16 %v471_v45, %v470_v40  ;;  %v1691_v40 = vstv %s2567_s18  ;;  %v4515_v45 = vstv %s2577_s26  ;;  %s4632_s29 = sld [smem:[#allocation36_spill]]  ;;  %s2737_s10 = sld [smem:[#allocation2 + $0x405]] }
 0x132   : > { %v474_v48 = vpack.c.bf16 %v469_v46, %v468_v43  ;;  %v1059_v43 = vstv %s2573_s22  ;;  %v4514_v46 = vstv %s2579_s27  ;;  %s4634_s17 = sld [smem:[#allocation37_spill]]  ;;  %s2739_s18 = sld [smem:[#allocation2 + $0x485]] }
 0x133   : > { %4629 = sst [smem:[#allocation94_spill]] %s2731_s14  ;;  %s2745_s14 = sld [smem:[#allocation2 + $0x505]] }
 0x134   : > { %2198 = vmatprep.mubr.bf16.mxu1 %v474_v48  ;;  %4561 = sst [smem:[#allocation33_spill]] %s2593_s5  ;;  %s2615_s5 = sld [smem:[#allocation2 + $0x282]]  ;;  %v4510_v48 = vstv %s4620_s8 }
 0x135   : > { %2199 = vmatmul.mubr.bf16.gmra.mrb[4].mxu1 %v475_v47  ;;  %4627 = sst [smem:[#allocation93_spill]] %s2729_s30  ;;  %s4628_s13 = sld [smem:[#allocation33_spill]]  ;;  %v4513_v47 = vstv %s4619_s21 }
 0x136   : > { %2210 = vmatprep.mubr.msk.bf16.mxu1 %vm2332_vm0, %v2331_v49  ;;  %s4636_s19 = sld [smem:[#allocation38_spill]]  ;;  %s2747_s23 = sld [smem:[#allocation2 + $0x585]] }
 0x137   : > { %4633 = sst [smem:[#allocation95_spill]] %s2737_s10  ;;  %s2755_s8 = sld [smem:[#allocation2 + $0x685]] }
 0x138   : > { %4635 = sst [smem:[#allocation96_spill]] %s2739_s18  ;;  %s2753_s18 = sld [smem:[#allocation2 + $0x605]] }
 0x139   : > { %4639 = sst [smem:[#allocation97_spill]] %s2745_s14  ;;  %s2779_s30 = sld [smem:[#allocation2 + $0x186]] }
 0x13a   : > { %4572 = sst [smem:[#allocation44_spill]] %s2615_s5  ;;  %s2637_s5 = sld [smem:[#allocation2 + $0x3]] }
 0x13b   : > { %s2787_s10 = sld [smem:[#allocation2 + $0x286]]  ;;  %s2851_s22 = sld [smem:[#allocation2 + $0x287]] }
 0x13c   : > { %4641 = sst [smem:[#allocation98_spill]] %s2747_s23  ;;  %s2793_s27 = sld [smem:[#allocation2 + $0x306]] }
 0x13d   : > { %4647 = sst [smem:[#allocation100_spill]] %s2755_s8  ;;  %s2761_s23 = sld [smem:[#allocation2 + $0x705]] }
 0x13e   : > { %4645 = sst [smem:[#allocation99_spill]] %s2753_s18  ;;  %s2881_s20 = sld [smem:[#allocation2 + $0x607]] }
 0x13f   : > { %s2769_s8 = sld [smem:[#allocation2 + $0x6]]  ;;  %s4783_s28 = sld [smem:[#allocation44_spill]] }
 0x140   : > { %4583 = sst [smem:[#allocation55_spill]] %s2637_s5  ;;  %s2659_s5 = sld [smem:[#allocation2 + $0x583]] }
 0x141   : > { %4668 = sst [smem:[#allocation106_spill]] %s2787_s10  ;;  %s2795_s14 = sld [smem:[#allocation2 + $0x386]] }
 0x142   : > { %4671 = sst [smem:[#allocation107_spill]] %s2793_s27  ;;  %s2843_s27 = sld [smem:[#allocation2 + $0x187]] }
 0x143   : > { %4651 = sst [smem:[#allocation101_spill]] %s2761_s23  ;;  %s2801_s10 = sld [smem:[#allocation2 + $0x406]] }
 0x144   : > { %s2803_s18 = sld [smem:[#allocation2 + $0x486]]  ;;  %4705 = sst [smem:[#allocation120_spill]] %s2851_s22 }
 0x145   : > { %4657 = sst [smem:[#allocation103_spill]] %s2769_s8  ;;  %s2811_s23 = sld [smem:[#allocation2 + $0x586]] }
 0x146   : > { %4594 = sst [smem:[#allocation66_spill]] %s2659_s5  ;;  %s2677_s5 = sld [smem:[#allocation2 + $0x204]] }
 0x147   : > { %4673 = sst [smem:[#allocation108_spill]] %s2795_s14  ;;  %s2809_s14 = sld [smem:[#allocation2 + $0x506]] }
 0x148   : > { %s2819_s8 = sld [smem:[#allocation2 + $0x686]]  ;;  %4699 = sst [smem:[#allocation118_spill]] %s2843_s27 }
 0x149   : > { %4677 = sst [smem:[#allocation109_spill]] %s2801_s10  ;;  %s2825_s21 = sld [smem:[#allocation2 + $0x706]] }
 0x14a   : > { %4679 = sst [smem:[#allocation110_spill]] %s2803_s18  ;;  %s2817_s18 = sld [smem:[#allocation2 + $0x606]] }
 0x14b   : > { %4685 = sst [smem:[#allocation112_spill]] %s2811_s23  ;;  %s2857_s27 = sld [smem:[#allocation2 + $0x307]] }
 0x14c   : > { %4603 = sst [smem:[#allocation75_spill]] %s2677_s5  ;;  %s2865_s22 = sld [smem:[#allocation2 + $0x407]] }
 0x14d   : > { %4683 = sst [smem:[#allocation111_spill]] %s2809_s14  ;;  %s2883_s5 = sld [smem:[#allocation2 + $0x687]] }
 0x14e   : > { %4689 = sst [smem:[#allocation113_spill]] %s2819_s8  ;;  %s4760_s10 = sld [smem:[#allocation27_spill]] }
 0x14f   : > { %4691 = sst [smem:[#allocation114_spill]] %s2825_s21  ;;  %s4761_s14 = sld [smem:[#allocation28_spill]] }
 0x150   : > { %s4762_s23 = sld [smem:[#allocation29_spill]]  ;;  %s4763_s8 = sld [smem:[#allocation30_spill]] }
 0x151   : > { %4709 = sst [smem:[#allocation121_spill]] %s2857_s27  ;;  %s4782_s26 = sld [smem:[#allocation43_spill]] }
 0x152   : > { %4715 = sst [smem:[#allocation123_spill]] %s2865_s22  ;;  %s4736_s24 = sld [smem:[#allocation121_spill]] }
 0x153   : > { %s4781_s22 = sld [smem:[#allocation42_spill]]  ;;  %s4820_s21 = sld [smem:[#allocation55_spill]] }
 0x200   : > { %v2196_v51 = vpop.f32.mrb[0].mxu1 }
 0x201   : > { %v581_v52 = vpop.f32.mrb[1].mxu1  ;;  %v590_v53 = vadd.f32 %v2196_v51, %v1928_v50  ;;  %v1450_v51 = vstv %s4625_s12  ;;  %s4735_s12 = sld [smem:[#allocation120_spill]] }
 0x202   : > { %v582_v54 = vadd.f32 %v1928_v50, %v581_v52  ;;  %v2197_v55 = vpop.f32.mrb[2].mxu1  ;;  %v1499_v52 = vstv %s4626_s25  ;;  %s2763_s25 = sld [smem:[#allocation2 + $0x785]] }
 0x203   : > { %v584_v56 = vpop.f32.mrb[3].mxu1  ;;  %v593_v58 = vadd.f32 %v2197_v55, %v1928_v50  ;;  %v614_v60 = vpack.c.bf16 %v590_v53, %v590_v53  ;;  %v1548_v53 = vstv %s4628_s13  ;;  %v1646_v55 = vstv %s4631_s16  ;;  %s2841_s16 = sld [smem:[#allocation2 + $0x107]]  ;;  %s4737_s13 = sld [smem:[#allocation122_spill]] }
 0x204   : > { %v612_v57 = vpack.c.bf16 %v582_v54, %v582_v54  ;;  %v585_v59 = vadd.f32 %v1928_v50, %v584_v56  ;;  %v1597_v54 = vstv %s4630_s15  ;;  %v1695_v56 = vstv %s4632_s29  ;;  %s2771_s29 = sld [smem:[#allocation2 + $0x86]]  ;;  %s4719_s15 = sld [smem:[#allocation103_spill]] }
 0x205   : > { %v615_v0 = vpack.c.bf16 %v593_v58, %v593_v58  ;;  %v751_v5 = vsel %vm645_vm1, %v614_v60, 0  ;;  %v1793_v58 = vstv %s4636_s19  ;;  %4721 = sst [smem:[#allocation103_spill]] %s2875_s7  ;;  %s4800_s7 = sld [smem:[#allocation53_spill]] }
 0x206   : > { %v647_v61 = vsel %vm645_vm1, %v612_v57, 0  ;;  %v613_v62 = vpack.c.bf16 %v585_v59, %v585_v59  ;;  %v1744_v57 = vstv %s4634_s17  ;;  %s4723_s17 = sld [smem:[#allocation106_spill]] }
 0x207   : > { %2203 = vmatpush3.bf16.msra.mxu0 %v647_v61  ;;  %v803_v9 = vsel %vm645_vm1, %v615_v0, 0 }
 0x208   : > { %v699_v1 = vsel %vm645_vm1, %v613_v62, 0  ;;  %2214 = vmatprep.subr.bf16.mxu0 %v2331_v49  ;;  %v2200_v3 = vpop.f32.mrb[4].mxu1  ;;  %4653 = sst [smem:[#allocation102_spill]] %s2763_s25  ;;  %s2777_s25 = sld [smem:[#allocation2 + $0x106]] }
 0x209   : > { %2209 = vmatpush3.bf16.msra.mxu1 %v699_v1  ;;  %v597_v4 = vpop.f32.mrb[5].mxu1  ;;  %v606_v16 = vadd.f32 %v2200_v3, %v1928_v50  ;;  %4697 = sst [smem:[#allocation117_spill]] %s2841_s16  ;;  %s2889_s16 = sld [smem:[#allocation2 + $0x707]] }
 0x20a   : > { %2205 = vmatmul.mubr.msk.bf16.vlgmr.msra.gmra.mrb[8].mxu0 %vm641_vm2, %v2293_v63  ;;  %2220 = vmatprep.subr.bf16.mxu1 %v2331_v49  ;;  %v598_v6 = vadd.f32 %v1928_v50, %v597_v4  ;;  %v2201_v7 = vpop.f32.mrb[6].mxu1  ;;  %4659 = sst [smem:[#allocation104_spill]] %s2771_s29  ;;  %s2785_s29 = sld [smem:[#allocation2 + $0x206]] }
 0x20b   : > { %2215 = vmatpush3.bf16.msra.mxu0 %v751_v5  ;;  %2216 = vmatprep.mubr.msk.bf16.mxu0 %vm2332_vm0, %v2331_v49  ;;  %v600_v8 = vpop.f32.mrb[7].mxu1  ;;  %v609_v17 = vadd.f32 %v2201_v7, %v1928_v50  ;;  %v618_v19 = vpack.c.bf16 %v606_v16, %v606_v16  ;;  %s4720_s27 = sld [smem:[#allocation104_spill]] }
 0x20c   : > { %2211 = vmatmul.mubr.msk.bf16.vlgmr.msra.gmra.mrb[8].mxu1 %vm641_vm2, %v2294_v2  ;;  %v616_v10 = vpack.c.bf16 %v598_v6, %v598_v6  ;;  %v601_v11 = vadd.f32 %v1928_v50, %v600_v8  ;;  %2226 = vmatprep.subr.bf16.mxu0 %v2331_v49  ;;  %v4512_v50 = vstv %s4624_s11  ;;  %s2833_s11 = sld [smem:[#allocation2 + $0x7]]  ;;  %4726 = sst [smem:[#allocation104_spill]] %s2881_s20 }
 0x20d   : > { %2221 = vmatpush3.bf16.msra.mxu1 %v803_v9  ;;  %2222 = vmatprep.mubr.msk.bf16.mxu1 %vm2332_vm0, %v2331_v49  ;;  %v619_v21 = vpack.c.bf16 %v609_v17, %v609_v17  ;;  %v959_v23 = vsel %vm645_vm1, %v618_v19, 0  ;;  %s4824_s20 = sld [smem:[#allocation57_spill]] }
 0x20e   : > { %2232 = vmatprep.subr.bf16.mxu1 %v2331_v49  ;;  %v855_v13 = vsel %vm645_vm1, %v616_v10, 0  ;;  %v617_v14 = vpack.c.bf16 %v601_v11, %v601_v11 }
 0x20f   : > { %v1011_v24 = vsel %vm645_vm1, %v619_v21, 0  ;;  %4729 = sst [smem:[#allocation106_spill]] %s2889_s16  ;;  %s4780_s16 = sld [smem:[#allocation41_spill]] }
 0x210   : > { %v907_v18 = vsel %vm645_vm1, %v617_v14, 0  ;;  %4667 = sst [smem:[#allocation105_spill]] %s2785_s29  ;;  %s2835_s29 = sld [smem:[#allocation2 + $0x87]] }
 0x211   : > { %s4722_s19 = sld [smem:[#allocation105_spill]] }
 0x212   : > { %2217 = vmatmul.mubr.msk.bf16.vlgmr.msra.gmra.mrb[12].mxu0 %vm641_vm2, %v2295_v12  ;;  %4727 = sst [smem:[#allocation105_spill]] %s2883_s5 }
 0x213   : > { %2227 = vmatpush3.bf16.msra.mxu0 %v855_v13  ;;  %2228 = vmatprep.mubr.msk.bf16.mxu0 %vm2332_vm0, %v2331_v49  ;;  %s4758_s5 = sld [smem:[#allocation25_spill]] }
 0x214   : > { %2223 = vmatmul.mubr.msk.bf16.vlgmr.msra.gmra.mrb[12].mxu1 %vm641_vm2, %v2296_v15  ;;  %2238 = vmatprep.subr.bf16.mxu0 %v2331_v49 }
 0x215   : > { %2233 = vmatpush3.bf16.msra.mxu1 %v907_v18  ;;  %2234 = vmatprep.mubr.msk.bf16.mxu1 %vm2332_vm0, %v2331_v49 }
 0x216   : > { %2244 = vmatprep.subr.bf16.mxu1 %v2331_v49  ;;  %4695 = sst [smem:[#allocation116_spill]] %s2835_s29 }
 0x217   : > { %s2849_s29 = sld [smem:[#allocation2 + $0x207]] }
 0x21a   : > { %2229 = vmatmul.mubr.msk.bf16.vlgmr.msra.gmra.mrb[16].mxu0 %vm641_vm2, %v2297_v20 }
 0x21b   : > { %2239 = vmatpush3.bf16.msra.mxu0 %v959_v23  ;;  %2240 = vmatprep.mubr.msk.bf16.mxu0 %vm2332_vm0, %v2331_v49 }
 0x21c   : > { %2235 = vmatmul.mubr.msk.bf16.vlgmr.msra.gmra.mrb[16].mxu1 %vm641_vm2, %v2298_v22 }
 0x21d   : > { %2245 = vmatpush3.bf16.msra.mxu1 %v1011_v24  ;;  %2246 = vmatprep.mubr.msk.bf16.mxu1 %vm2332_vm0, %v2331_v49  ;;  %v4511_v49 = vstv %s4622_s9  ;;  %4703 = sst [smem:[#allocation119_spill]] %s2849_s29  ;;  %s4801_s29 = sld [smem:[#allocation54_spill]] }
 0x21e   : > { %s4822_s9 = sld [smem:[#allocation56_spill]] }
 0x222   : > { %2241 = vmatmul.mubr.msk.bf16.vlgmr.msra.gmra.mrb[20].mxu0 %vm641_vm2, %v2299_v25 }
 0x224   : > { %2247 = vmatmul.mubr.msk.bf16.vlgmr.msra.gmra.mrb[20].mxu1 %vm641_vm2, %v2300_v26 }
 0x2dd   : > { %v683_v15 = vpop.f32.mrb[8].mxu0 }
 0x2de   : > { %v1056_v21 = vmul.f32 %v1055_v27, %v683_v15  ;;  %v1104_v20 = vmul.f32 %v1103_v28, %v683_v15  ;;  %v1153_v16 = vmul.f32 %v1152_v29, %v683_v15  ;;  %v1202_v24 = vmul.f32 %v1201_v30, %v683_v15  ;;  %v2206_v25 = vpop.f32.mrb[9].mxu0 }
 0x2df   : > { %v1251_v19 = vmul.f32 %v1250_v31, %v683_v15  ;;  %v1300_v26 = vmul.f32 %v1299_v32, %v683_v15  ;;  %v1349_v17 = vmul.f32 %v1348_v33, %v683_v15  ;;  %v1398_v18 = vmul.f32 %v1397_v34, %v683_v15  ;;  %v686_v23 = vpop.f32.mrb[10].mxu0  ;;  %v735_v22 = vpop.f32.mrb[8].mxu1 }
 0x2e0   : > { %v1447_v14 = vmul.f32 %v1446_v35, %v683_v15  ;;  %v1496_v25 = vmul.f32 %v1495_v36, %v683_v15  ;;  %v1545_v13 = vmul.f32 %v1544_v37, %v683_v15  ;;  %v1594_v12 = vmul.f32 %v1593_v38, %v683_v15  ;;  %v2207_v11 = vpop.f32.mrb[11].mxu0  ;;  %v2212_v10 = vpop.f32.mrb[9].mxu1 }
 0x2e1   : > { %v1643_v9 = vmul.f32 %v1642_v39, %v683_v15  ;;  %v1692_v8 = vmul.f32 %v1691_v40, %v683_v15  ;;  %v1741_v7 = vmul.f32 %v1740_v41, %v683_v15  ;;  %v1790_v6 = vmul.f32 %v1789_v42, %v683_v15  ;;  %v2957_v5 = vpop.f32.mrb[10].mxu1 }
 0x2e2   : > { %v2961_v11 = vmul.f32 %v1055_v27, %v686_v23  ;;  %v2965_v10 = vmul.f32 %v1103_v28, %v686_v23  ;;  %v2969_v4 = vmul.f32 %v1152_v29, %v686_v23  ;;  %v2973_v3 = vmul.f32 %v1201_v30, %v686_v23  ;;  %v2213_v15 = vpop.f32.mrb[11].mxu1 }
 0x2e3   : > { %v2977_v2 = vmul.f32 %v1250_v31, %v686_v23  ;;  %v2981_v27 = vmul.f32 %v1299_v32, %v686_v23  ;;  %v2985_v28 = vmul.f32 %v1348_v33, %v686_v23  ;;  %v2989_v29 = vmul.f32 %v1397_v34, %v686_v23 }
 0x2e4   : > { %v2993_v30 = vmul.f32 %v1446_v35, %v686_v23  ;;  %v2997_v15 = vmul.f32 %v1495_v36, %v686_v23  ;;  %v3001_v31 = vmul.f32 %v1544_v37, %v686_v23  ;;  %v3005_v32 = vmul.f32 %v1593_v38, %v686_v23 }
 0x2e5   : > { %v3009_v33 = vmul.f32 %v1642_v39, %v686_v23  ;;  %v3013_v34 = vmul.f32 %v1691_v40, %v686_v23  ;;  %v3017_v35 = vmul.f32 %v1740_v41, %v686_v23  ;;  %v3021_v1 = vmul.f32 %v1789_v42, %v686_v23  ;;  %v3023_v36 = vpop.f32.mrb[12].mxu0 }
 0x2e6   : > { %v1060_v37 = vmul.f32 %v1059_v43, %v735_v22  ;;  %v1108_v0 = vmul.f32 %v1107_v44, %v735_v22  ;;  %v1157_v38 = vmul.f32 %v4515_v45, %v735_v22  ;;  %v1206_v39 = vmul.f32 %v4514_v46, %v735_v22  ;;  %v2218_v63 = vpop.f32.mrb[13].mxu0 }
 0x2e7   : > { %v1255_v40 = vmul.f32 %v4513_v47, %v735_v22  ;;  %v1304_v62 = vmul.f32 %v4510_v48, %v735_v22  ;;  %v1353_v41 = vmul.f32 %v4511_v49, %v735_v22  ;;  %v1402_v42 = vmul.f32 %v4512_v50, %v735_v22  ;;  %v3041_v23 = vpop.f32.mrb[14].mxu0  ;;  %v3043_v61 = vpop.f32.mrb[12].mxu1 }
 0x2e8   : > { %v3045_v60 = vadd.f32 %v1060_v37, %v1056_v21  ;;  %v3047_v63 = vadd.f32 %v1108_v0, %v1104_v20  ;;  %v3049_v59 = vadd.f32 %v1157_v38, %v1153_v16  ;;  %v3051_v48 = vadd.f32 %v1206_v39, %v1202_v24  ;;  %v2219_v49 = vpop.f32.mrb[15].mxu0  ;;  %v2224_v50 = vpop.f32.mrb[13].mxu1 }
 0x2e9   : > { %v3053_v47 = vadd.f32 %v1255_v40, %v1251_v19  ;;  %v3055_v46 = vadd.f32 %v1304_v62, %v1300_v26  ;;  %v3057_v45 = vadd.f32 %v1353_v41, %v1349_v17  ;;  %v3059_v21 = vadd.f32 %v1402_v42, %v1398_v18  ;;  %v3061_v37 = vpop.f32.mrb[14].mxu1 }
 0x2ea   : > { %v1451_v0 = vmul.f32 %v1450_v51, %v735_v22  ;;  %v1500_v16 = vmul.f32 %v1499_v52, %v735_v22  ;;  %v1549_v20 = vmul.f32 %v1548_v53, %v735_v22  ;;  %v1598_v49 = vmul.f32 %v1597_v54, %v735_v22  ;;  %v2225_v50 = vpop.f32.mrb[15].mxu1 }
 0x2eb   : > { %v1647_v62 = vmul.f32 %v1646_v55, %v735_v22  ;;  %v1696_v17 = vmul.f32 %v1695_v56, %v735_v22  ;;  %v1745_v18 = vmul.f32 %v1744_v57, %v735_v22  ;;  %v1794_v19 = vmul.f32 %v1793_v58, %v735_v22 }
 0x2ec   : > { %v3079_v24 = vadd.f32 %v1451_v0, %v1447_v14  ;;  %v3081_v26 = vadd.f32 %v1500_v16, %v1496_v25  ;;  %v3083_v38 = vadd.f32 %v1549_v20, %v1545_v13  ;;  %v3085_v39 = vadd.f32 %v1598_v49, %v1594_v12 }
 0x2ed   : > { %v3087_v40 = vadd.f32 %v1647_v62, %v1643_v9  ;;  %v3089_v41 = vadd.f32 %v1696_v17, %v1692_v8  ;;  %v3091_v42 = vadd.f32 %v1745_v18, %v1741_v7  ;;  %v3093_v50 = vadd.f32 %v1794_v19, %v1790_v6  ;;  %v3095_v22 = vpop.f32.mrb[16].mxu0 }
 0x2ee   : > { %v1061_v14 = vmul.f32 %v1059_v43, %v2957_v5  ;;  %v1109_v25 = vmul.f32 %v1107_v44, %v2957_v5  ;;  %v4772_v13 = vstv %s4758_s5  ;;  %v4773_v9 = vstv %s4759_s6  ;;  %v2230_v8 = vpop.f32.mrb[17].mxu0  ;;  %s4779_s5 = sld [smem:[#allocation40_spill]]  ;;  %s4784_s6 = sld [smem:[#allocation45_spill]] }
 0x2ef   : > { %v1158_v12 = vmul.f32 %v4772_v13, %v2957_v5  ;;  %v1207_v0 = vmul.f32 %v4773_v9, %v2957_v5  ;;  %v4774_v7 = vstv %s4760_s10  ;;  %v4775_v6 = vstv %s4761_s14  ;;  %v3121_v17 = vpop.f32.mrb[18].mxu0  ;;  %v3123_v18 = vpop.f32.mrb[16].mxu1  ;;  %s4785_s10 = sld [smem:[#allocation46_spill]]  ;;  %s4793_s14 = sld [smem:[#allocation47_spill]] }
 0x2f0   : > { %v1256_v16 = vmul.f32 %v4774_v7, %v2957_v5  ;;  %v1305_v20 = vmul.f32 %v4775_v6, %v2957_v5  ;;  %v4776_v49 = vstv %s4762_s23  ;;  %v4777_v62 = vstv %s4763_s8  ;;  %v2236_v7 = vpop.f32.mrb[17].mxu1  ;;  %v2231_v6 = vpop.f32.mrb[19].mxu0  ;;  %s4795_s23 = sld [smem:[#allocation48_spill]]  ;;  %s4796_s8 = sld [smem:[#allocation49_spill]] }
 0x2f1   : > { %v1354_v43 = vmul.f32 %v4776_v49, %v2957_v5  ;;  %v1403_v44 = vmul.f32 %v4777_v62, %v2957_v5  ;;  %v3126_v19 = vadd.f32 %v1061_v14, %v2961_v11  ;;  %v3129_v13 = vadd.f32 %v1109_v25, %v2965_v10 }
 0x2f2   : > { %v3132_v9 = vadd.f32 %v1158_v12, %v2969_v4  ;;  %v3135_v8 = vadd.f32 %v1207_v0, %v2973_v3  ;;  %v3138_v49 = vadd.f32 %v1256_v16, %v2977_v2  ;;  %v3141_v11 = vadd.f32 %v1305_v20, %v2981_v27  ;;  %v3149_v4 = vpop.f32.mrb[18].mxu1 }
 0x2f3   : > { %v3144_v10 = vadd.f32 %v1354_v43, %v2985_v28  ;;  %v3147_v14 = vadd.f32 %v1403_v44, %v2989_v29  ;;  %v1452_v3 = vmul.f32 %v1450_v51, %v2957_v5  ;;  %v1501_v25 = vmul.f32 %v1499_v52, %v2957_v5  ;;  %v2237_v28 = vpop.f32.mrb[19].mxu1 }
 0x2f4   : > { %v1550_v2 = vmul.f32 %v1548_v53, %v2957_v5  ;;  %v1599_v27 = vmul.f32 %v1597_v54, %v2957_v5  ;;  %v1648_v29 = vmul.f32 %v1646_v55, %v2957_v5  ;;  %v1697_v51 = vmul.f32 %v1695_v56, %v2957_v5 }
 0x2f5   : > { %v1746_v52 = vmul.f32 %v1744_v57, %v2957_v5  ;;  %v1795_v53 = vmul.f32 %v1793_v58, %v2957_v5  ;;  %v3176_v54 = vadd.f32 %v1452_v3, %v2993_v30  ;;  %v3179_v12 = vadd.f32 %v1501_v25, %v2997_v15  ;;  %v3199_v15 = vpop.f32.mrb[20].mxu0 }
 0x2f6   : > { %v3182_v55 = vadd.f32 %v1550_v2, %v3001_v31  ;;  %v3185_v56 = vadd.f32 %v1599_v27, %v3005_v32  ;;  %v3188_v57 = vadd.f32 %v1648_v29, %v3009_v33  ;;  %v3191_v58 = vadd.f32 %v1697_v51, %v3013_v34  ;;  %v2242_v62 = vpop.f32.mrb[21].mxu0 }
 0x2f7   : > { %v3194_v5 = vadd.f32 %v1746_v52, %v3017_v35  ;;  %v3197_v30 = vadd.f32 %v1795_v53, %v3021_v1  ;;  %v4786_v31 = vstv %s4778_s2  ;;  %v4787_v32 = vstv %s4779_s5  ;;  %v3225_v27 = vpop.f32.mrb[22].mxu0  ;;  %v3227_v28 = vpop.f32.mrb[20].mxu1 }
 0x2f8   : > { %v1066_v0 = vmul.f32 %v4786_v31, %v3023_v36  ;;  %v1114_v16 = vmul.f32 %v4787_v32, %v3023_v36  ;;  %v4788_v33 = vstv %s4780_s16  ;;  %v4789_v34 = vstv %s4781_s22  ;;  %v2248_v31 = vpop.f32.mrb[21].mxu1  ;;  %v2243_v32 = vpop.f32.mrb[23].mxu0 }
 0x2f9   : > { %v1163_v20 = vmul.f32 %v4788_v33, %v3023_v36  ;;  %v1212_v43 = vmul.f32 %v4789_v34, %v3023_v36  ;;  %v4790_v35 = vstv %s4782_s26  ;;  %v4791_v1 = vstv %s4783_s28 }
 0x2fa   : > { %v1261_v44 = vmul.f32 %v4790_v35, %v3023_v36  ;;  %v1310_v7 = vmul.f32 %v4791_v1, %v3023_v36  ;;  %v4792_v6 = vstv %s4784_s6  ;;  %v4794_v25 = vstv %s4785_s10 }
 0x2fb   : > { %v1359_v3 = vmul.f32 %v4792_v6, %v3023_v36  ;;  %v1408_v2 = vmul.f32 %v4794_v25, %v3023_v36  ;;  %v3230_v29 = vadd.f32 %v1066_v0, %v3045_v60  ;;  %v3233_v51 = vadd.f32 %v1114_v16, %v3047_v63 }
 0x2fc   : > { %v3236_v52 = vadd.f32 %v1163_v20, %v3049_v59  ;;  %v3239_v53 = vadd.f32 %v1212_v43, %v3051_v48  ;;  %v3242_v33 = vadd.f32 %v1261_v44, %v3053_v47  ;;  %v3245_v60 = vadd.f32 %v1310_v7, %v3055_v46  ;;  %v3253_v59 = vpop.f32.mrb[22].mxu1 }
 0x2fd   : > { %v3248_v63 = vadd.f32 %v1359_v3, %v3057_v45  ;;  %v3251_v0 = vadd.f32 %v1408_v2, %v3059_v21  ;;  %v4802_v48 = vstv %s4793_s14  ;;  %v4803_v20 = vstv %s4795_s23  ;;  %v2249_v62 = vpop.f32.mrb[23].mxu1 }
 0x2fe   : > { %v1457_v16 = vmul.f32 %v4802_v48, %v3023_v36  ;;  %v1506_v34 = vmul.f32 %v4803_v20, %v3023_v36  ;;  %v4804_v47 = vstv %s4796_s8  ;;  %v4805_v46 = vstv %s4797_s0 }
 0x2ff   : > { %v1555_v43 = vmul.f32 %v4804_v47, %v3023_v36  ;;  %v1604_v45 = vmul.f32 %v4805_v46, %v3023_v36  ;;  %v4806_v21 = vstv %s4798_s3  ;;  %v4807_v44 = vstv %s4799_s4 }
 0x300   : > { %v1653_v35 = vmul.f32 %v4806_v21, %v3023_v36  ;;  %v1702_v1 = vmul.f32 %v4807_v44, %v3023_v36  ;;  %v4808_v7 = vstv %s4800_s7  ;;  %v4809_v3 = vstv %s4801_s29 }
 0x301   : > { %v1751_v6 = vmul.f32 %v4808_v7, %v3023_v36  ;;  %v1800_v25 = vmul.f32 %v4809_v3, %v3023_v36  ;;  %v3280_v2 = vadd.f32 %v1457_v16, %v3079_v24  ;;  %v3283_v31 = vadd.f32 %v1506_v34, %v3081_v26 }
 0x302   : > { %v3286_v32 = vadd.f32 %v1555_v43, %v3083_v38  ;;  %v3289_v48 = vadd.f32 %v1604_v45, %v3085_v39  ;;  %v3292_v20 = vadd.f32 %v1653_v35, %v3087_v40  ;;  %v3295_v47 = vadd.f32 %v1702_v1, %v3089_v41 }
 0x303   : > { %v3298_v36 = vadd.f32 %v1751_v6, %v3091_v42  ;;  %v3301_v24 = vadd.f32 %v1800_v25, %v3093_v50  ;;  %v4810_v26 = vstv %s4778_s2  ;;  %v4811_v38 = vstv %s4779_s5  ;;  %s4826_s2 = sld [smem:[#allocation58_spill]]  ;;  %s4828_s5 = sld [smem:[#allocation59_spill]] }
 0x304   : > { %v1067_v16 = vmul.f32 %v4810_v26, %v3041_v23  ;;  %v1115_v39 = vmul.f32 %v4811_v38, %v3041_v23  ;;  %v4812_v34 = vstv %s4780_s16  ;;  %v4813_v41 = vstv %s4781_s22  ;;  %s4830_s16 = sld [smem:[#allocation60_spill]]  ;;  %s4832_s22 = sld [smem:[#allocation61_spill]] }
 0x305   : > { %v1164_v40 = vmul.f32 %v4812_v34, %v3041_v23  ;;  %v1213_v43 = vmul.f32 %v4813_v41, %v3041_v23  ;;  %v4814_v42 = vstv %s4782_s26  ;;  %v4815_v46 = vstv %s4783_s28  ;;  %s4833_s26 = sld [smem:[#allocation62_spill]]  ;;  %s4836_s28 = sld [smem:[#allocation63_spill]] }
 0x306   : > { %v1262_v50 = vmul.f32 %v4814_v42, %v3041_v23  ;;  %v1311_v45 = vmul.f32 %v4815_v46, %v3041_v23  ;;  %v4816_v62 = vstv %s4784_s6  ;;  %v4817_v35 = vstv %s4785_s10  ;;  %s4838_s6 = sld [smem:[#allocation64_spill]]  ;;  %s4840_s10 = sld [smem:[#allocation65_spill]] }
 0x307   : > { %v1360_v21 = vmul.f32 %v4816_v62, %v3041_v23  ;;  %v1409_v44 = vmul.f32 %v4817_v35, %v3041_v23  ;;  %v3328_v1 = vadd.f32 %v1067_v16, %v3126_v19  ;;  %v3331_v7 = vadd.f32 %v1115_v39, %v3129_v13 }
 0x308   : > { %v3334_v6 = vadd.f32 %v1164_v40, %v3132_v9  ;;  %v3337_v3 = vadd.f32 %v1213_v43, %v3135_v8  ;;  %v3340_v25 = vadd.f32 %v1262_v50, %v3138_v49  ;;  %v3343_v26 = vadd.f32 %v1311_v45, %v3141_v11 }
 0x309   : > { %v3346_v38 = vadd.f32 %v1360_v21, %v3144_v10  ;;  %v3349_v19 = vadd.f32 %v1409_v44, %v3147_v14  ;;  %v4818_v13 = vstv %s4793_s14  ;;  %v4819_v9 = vstv %s4795_s23  ;;  %s4842_s14 = sld [smem:[#allocation66_spill]]  ;;  %s4844_s23 = sld [smem:[#allocation67_spill]] }
 0x30a   : > { %v1458_v16 = vmul.f32 %v4818_v13, %v3041_v23  ;;  %v1507_v8 = vmul.f32 %v4819_v9, %v3041_v23  ;;  %v4821_v39 = vstv %s4796_s8  ;;  %v4823_v11 = vstv %s4797_s0  ;;  %s4846_s8 = sld [smem:[#allocation68_spill]]  ;;  %s4848_s0 = sld [smem:[#allocation69_spill]] }
 0x30b   : > { %v1556_v49 = vmul.f32 %v4821_v39, %v3041_v23  ;;  %v1605_v34 = vmul.f32 %v4823_v11, %v3041_v23  ;;  %v4825_v10 = vstv %s4798_s3  ;;  %v4827_v40 = vstv %s4799_s4  ;;  %s4849_s3 = sld [smem:[#allocation70_spill]]  ;;  %s4868_s4 = sld [smem:[#allocation71_spill]] }
 0x30c   : > { %v1654_v14 = vmul.f32 %v4825_v10, %v3041_v23  ;;  %v1703_v41 = vmul.f32 %v4827_v40, %v3041_v23  ;;  %v4829_v43 = vstv %s4800_s7  ;;  %v4831_v50 = vstv %s4801_s29  ;;  %s4870_s7 = sld [smem:[#allocation72_spill]]  ;;  %s4872_s29 = sld [smem:[#allocation73_spill]] }
 0x30d   : > { %v1752_v42 = vmul.f32 %v4829_v43, %v3041_v23  ;;  %v1801_v46 = vmul.f32 %v4831_v50, %v3041_v23  ;;  %v3376_v45 = vadd.f32 %v1458_v16, %v3176_v54  ;;  %v3379_v62 = vadd.f32 %v1507_v8, %v3179_v12 }
 0x30e   : > { %v3382_v21 = vadd.f32 %v1556_v49, %v3182_v55  ;;  %v3385_v35 = vadd.f32 %v1605_v34, %v3185_v56  ;;  %v3388_v44 = vadd.f32 %v1654_v14, %v3188_v57  ;;  %v3391_v13 = vadd.f32 %v1703_v41, %v3191_v58 }
 0x30f   : > { %v3394_v23 = vadd.f32 %v1752_v42, %v3194_v5  ;;  %v3397_v54 = vadd.f32 %v1801_v46, %v3197_v30  ;;  %v4834_v12 = vstv %s4820_s21  ;;  %v4835_v55 = vstv %s4822_s9 }
 0x310   : > { %v1072_v16 = vmul.f32 %v4834_v12, %v3043_v61  ;;  %v1120_v56 = vmul.f32 %v4835_v55, %v3043_v61  ;;  %v4837_v9 = vstv %s4824_s20  ;;  %v4839_v58 = vstv %s4826_s2 }
 0x311   : > { %v1169_v57 = vmul.f32 %v4837_v9, %v3043_v61  ;;  %v1218_v8 = vmul.f32 %v4839_v58, %v3043_v61  ;;  %v4841_v5 = vstv %s4828_s5  ;;  %v4843_v39 = vstv %s4830_s16 }
 0x312   : > { %v1267_v30 = vmul.f32 %v4841_v5, %v3043_v61  ;;  %v1316_v49 = vmul.f32 %v4843_v39, %v3043_v61  ;;  %v4845_v11 = vstv %s4832_s22  ;;  %v4847_v10 = vstv %s4833_s26 }
 0x313   : > { %v1365_v34 = vmul.f32 %v4845_v11, %v3043_v61  ;;  %v1414_v14 = vmul.f32 %v4847_v10, %v3043_v61  ;;  %v3424_v40 = vadd.f32 %v1072_v16, %v3230_v29  ;;  %v3427_v41 = vadd.f32 %v1120_v56, %v3233_v51 }
 0x314   : > { %v3430_v43 = vadd.f32 %v1169_v57, %v3236_v52  ;;  %v3433_v42 = vadd.f32 %v1218_v8, %v3239_v53  ;;  %v3436_v50 = vadd.f32 %v1267_v30, %v3242_v33  ;;  %v3439_v46 = vadd.f32 %v1316_v49, %v3245_v60 }
 0x315   : > { %v3442_v12 = vadd.f32 %v1365_v34, %v3248_v63  ;;  %v3445_v29 = vadd.f32 %v1414_v14, %v3251_v0  ;;  %v4850_v51 = vstv %s4836_s28  ;;  %v4851_v52 = vstv %s4838_s6 }
 0x316   : > { %v1463_v16 = vmul.f32 %v4850_v51, %v3043_v61  ;;  %v1512_v53 = vmul.f32 %v4851_v52, %v3043_v61  ;;  %v4852_v55 = vstv %s4840_s10  ;;  %v4853_v60 = vstv %s4842_s14 }
 0x317   : > { %v1561_v33 = vmul.f32 %v4852_v55, %v3043_v61  ;;  %v1610_v56 = vmul.f32 %v4853_v60, %v3043_v61  ;;  %v4854_v63 = vstv %s4844_s23  ;;  %v4855_v9 = vstv %s4846_s8 }
 0x318   : > { %v1659_v0 = vmul.f32 %v4854_v63, %v3043_v61  ;;  %v1708_v57 = vmul.f32 %v4855_v9, %v3043_v61  ;;  %v4856_v58 = vstv %s4848_s0  ;;  %v4857_v5 = vstv %s4849_s3 }
 0x319   : > { %v1757_v8 = vmul.f32 %v4856_v58, %v3043_v61  ;;  %v1806_v30 = vmul.f32 %v4857_v5, %v3043_v61  ;;  %v3472_v39 = vadd.f32 %v1463_v16, %v3280_v2  ;;  %v3475_v49 = vadd.f32 %v1512_v53, %v3283_v31 }
 0x31a   : > { %v3478_v11 = vadd.f32 %v1561_v33, %v3286_v32  ;;  %v3481_v34 = vadd.f32 %v1610_v56, %v3289_v48  ;;  %v3484_v10 = vadd.f32 %v1659_v0, %v3292_v20  ;;  %v3487_v14 = vadd.f32 %v1708_v57, %v3295_v47 }
 0x31b   : > { %v3490_v61 = vadd.f32 %v1757_v8, %v3298_v36  ;;  %v3493_v2 = vadd.f32 %v1806_v30, %v3301_v24  ;;  %v4858_v31 = vstv %s4820_s21  ;;  %v4859_v32 = vstv %s4822_s9  ;;  %s4874_s21 = sld [smem:[#allocation74_spill]]  ;;  %s4876_s9 = sld [smem:[#allocation75_spill]] }
 0x31c   : > { %v1073_v51 = vmul.f32 %v4858_v31, %v3061_v37  ;;  %v1121_v48 = vmul.f32 %v4859_v32, %v3061_v37  ;;  %v4860_v16 = vstv %s4824_s20  ;;  %v4861_v47 = vstv %s4826_s2  ;;  %s4878_s20 = sld [smem:[#allocation76_spill]]  ;;  %s4880_s2 = sld [smem:[#allocation77_spill]] }
 0x31d   : > { %v1170_v20 = vmul.f32 %v4860_v16, %v3061_v37  ;;  %v1219_v52 = vmul.f32 %v4861_v47, %v3061_v37  ;;  %v4862_v36 = vstv %s4828_s5  ;;  %v4863_v53 = vstv %s4830_s16  ;;  %s4881_s5 = sld [smem:[#allocation78_spill]]  ;;  %s4884_s16 = sld [smem:[#allocation79_spill]] }
 0x31e   : > { %v1268_v24 = vmul.f32 %v4862_v36, %v3061_v37  ;;  %v1317_v55 = vmul.f32 %v4863_v53, %v3061_v37  ;;  %v4864_v33 = vstv %s4832_s22  ;;  %v4865_v56 = vstv %s4833_s26  ;;  %s4886_s22 = sld [smem:[#allocation80_spill]]  ;;  %s4888_s26 = sld [smem:[#allocation81_spill]] }
 0x31f   : > { %v1366_v60 = vmul.f32 %v4864_v33, %v3061_v37  ;;  %v1415_v63 = vmul.f32 %v4865_v56, %v3061_v37  ;;  %v3520_v0 = vadd.f32 %v1073_v51, %v3328_v1  ;;  %v3523_v9 = vadd.f32 %v1121_v48, %v3331_v7 }
 0x320   : > { %v3526_v57 = vadd.f32 %v1170_v20, %v3334_v6  ;;  %v3529_v58 = vadd.f32 %v1219_v52, %v3337_v3  ;;  %v3532_v8 = vadd.f32 %v1268_v24, %v3340_v25  ;;  %v3535_v5 = vadd.f32 %v1317_v55, %v3343_v26 }
 0x321   : > { %v3538_v30 = vadd.f32 %v1366_v60, %v3346_v38  ;;  %v3541_v1 = vadd.f32 %v1415_v63, %v3349_v19  ;;  %v4866_v7 = vstv %s4836_s28  ;;  %v4867_v6 = vstv %s4838_s6  ;;  %s4890_s28 = sld [smem:[#allocation82_spill]]  ;;  %s4892_s6 = sld [smem:[#allocation83_spill]] }
 0x322   : > { %v1464_v31 = vmul.f32 %v4866_v7, %v3061_v37  ;;  %v1513_v3 = vmul.f32 %v4867_v6, %v3061_v37  ;;  %v4869_v51 = vstv %s4840_s10  ;;  %v4871_v26 = vstv %s4842_s14  ;;  %s4894_s10 = sld [smem:[#allocation84_spill]]  ;;  %s4896_s14 = sld [smem:[#allocation85_spill]] }
 0x323   : > { %v1562_v25 = vmul.f32 %v4869_v51, %v3061_v37  ;;  %v1611_v32 = vmul.f32 %v4871_v26, %v3061_v37  ;;  %v4873_v38 = vstv %s4844_s23  ;;  %v4875_v48 = vstv %s4846_s8  ;;  %s4897_s23 = sld [smem:[#allocation86_spill]]  ;;  %s4916_s8 = sld [smem:[#allocation87_spill]] }
 0x324   : > { %v1660_v19 = vmul.f32 %v4873_v38, %v3061_v37  ;;  %v1709_v16 = vmul.f32 %v4875_v48, %v3061_v37  ;;  %v4877_v20 = vstv %s4848_s0  ;;  %v4879_v52 = vstv %s4849_s3  ;;  %s4918_s0 = sld [smem:[#allocation88_spill]]  ;;  %s4920_s3 = sld [smem:[#allocation89_spill]] }
 0x325   : > { %v1758_v47 = vmul.f32 %v4877_v20, %v3061_v37  ;;  %v1807_v36 = vmul.f32 %v4879_v52, %v3061_v37  ;;  %v3568_v24 = vadd.f32 %v1464_v31, %v3376_v45  ;;  %v3571_v53 = vadd.f32 %v1513_v3, %v3379_v62 }
 0x326   : > { %v3574_v55 = vadd.f32 %v1562_v25, %v3382_v21  ;;  %v3577_v33 = vadd.f32 %v1611_v32, %v3385_v35  ;;  %v3580_v60 = vadd.f32 %v1660_v19, %v3388_v44  ;;  %v3583_v56 = vadd.f32 %v1709_v16, %v3391_v13 }
 0x327   : > { %v3586_v37 = vadd.f32 %v1758_v47, %v3394_v23  ;;  %v3589_v45 = vadd.f32 %v1807_v36, %v3397_v54  ;;  %v4882_v62 = vstv %s4868_s4  ;;  %v4883_v21 = vstv %s4870_s7 }
 0x328   : > { %v1078_v63 = vmul.f32 %v4882_v62, %v3095_v22  ;;  %v1126_v35 = vmul.f32 %v4883_v21, %v3095_v22  ;;  %v4885_v7 = vstv %s4872_s29  ;;  %v4887_v13 = vstv %s4874_s21 }
 0x329   : > { %v1175_v44 = vmul.f32 %v4885_v7, %v3095_v22  ;;  %v1224_v31 = vmul.f32 %v4887_v13, %v3095_v22  ;;  %v4889_v23 = vstv %s4876_s9  ;;  %v4891_v6 = vstv %s4878_s20 }
 0x32a   : > { %v1273_v54 = vmul.f32 %v4889_v23, %v3095_v22  ;;  %v1322_v3 = vmul.f32 %v4891_v6, %v3095_v22  ;;  %v4893_v51 = vstv %s4880_s2  ;;  %v4895_v26 = vstv %s4881_s5 }
 0x32b   : > { %v1371_v25 = vmul.f32 %v4893_v51, %v3095_v22  ;;  %v1420_v32 = vmul.f32 %v4895_v26, %v3095_v22  ;;  %v3616_v38 = vadd.f32 %v1078_v63, %v3424_v40  ;;  %v3619_v19 = vadd.f32 %v1126_v35, %v3427_v41 }
 0x32c   : > { %v3622_v48 = vadd.f32 %v1175_v44, %v3430_v43  ;;  %v3625_v16 = vadd.f32 %v1224_v31, %v3433_v42  ;;  %v3628_v20 = vadd.f32 %v1273_v54, %v3436_v50  ;;  %v3631_v47 = vadd.f32 %v1322_v3, %v3439_v46 }
 0x32d   : > { %v3634_v52 = vadd.f32 %v1371_v25, %v3442_v12  ;;  %v3637_v40 = vadd.f32 %v1420_v32, %v3445_v29  ;;  %v4898_v41 = vstv %s4884_s16  ;;  %v4899_v43 = vstv %s4886_s22 }
 0x32e   : > { %v1469_v36 = vmul.f32 %v4898_v41, %v3095_v22  ;;  %v1518_v42 = vmul.f32 %v4899_v43, %v3095_v22  ;;  %v4900_v62 = vstv %s4888_s26  ;;  %v4901_v46 = vstv %s4890_s28 }
 0x32f   : > { %v1567_v50 = vmul.f32 %v4900_v62, %v3095_v22  ;;  %v1616_v63 = vmul.f32 %v4901_v46, %v3095_v22  ;;  %v4902_v12 = vstv %s4892_s6  ;;  %v4903_v21 = vstv %s4894_s10 }
 0x330   : > { %v1665_v29 = vmul.f32 %v4902_v12, %v3095_v22  ;;  %v1714_v35 = vmul.f32 %v4903_v21, %v3095_v22  ;;  %v4904_v7 = vstv %s4896_s14  ;;  %v4905_v13 = vstv %s4897_s23 }
 0x331   : > { %v1763_v44 = vmul.f32 %v4904_v7, %v3095_v22  ;;  %v1812_v31 = vmul.f32 %v4905_v13, %v3095_v22  ;;  %v3664_v23 = vadd.f32 %v1469_v36, %v3472_v39  ;;  %v3667_v54 = vadd.f32 %v1518_v42, %v3475_v49 }
 0x332   : > { %v3670_v6 = vadd.f32 %v1567_v50, %v3478_v11  ;;  %v3673_v3 = vadd.f32 %v1616_v63, %v3481_v34  ;;  %v3676_v51 = vadd.f32 %v1665_v29, %v3484_v10  ;;  %v3679_v25 = vadd.f32 %v1714_v35, %v3487_v14 }
 0x333   : > { %v3682_v22 = vadd.f32 %v1763_v44, %v3490_v61  ;;  %v3685_v39 = vadd.f32 %v1812_v31, %v3493_v2  ;;  %v4906_v49 = vstv %s4868_s4  ;;  %v4907_v11 = vstv %s4870_s7  ;;  %s4922_s4 = sld [smem:[#allocation90_spill]]  ;;  %s4924_s7 = sld [smem:[#allocation91_spill]] }
 0x334   : > { %v1079_v26 = vmul.f32 %v4906_v49, %v3121_v17  ;;  %v1127_v34 = vmul.f32 %v4907_v11, %v3121_v17  ;;  %v4908_v32 = vstv %s4872_s29  ;;  %v4909_v14 = vstv %s4874_s21  ;;  %s4926_s29 = sld [smem:[#allocation92_spill]]  ;;  %s4928_s21 = sld [smem:[#allocation93_spill]] }
 0x335   : > { %v1176_v10 = vmul.f32 %v4908_v32, %v3121_v17  ;;  %v1225_v41 = vmul.f32 %v4909_v14, %v3121_v17  ;;  %v4910_v61 = vstv %s4876_s9  ;;  %v4911_v36 = vstv %s4878_s20  ;;  %s4929_s9 = sld [smem:[#allocation94_spill]]  ;;  %s4932_s20 = sld [smem:[#allocation95_spill]] }
 0x336   : > { %v1274_v2 = vmul.f32 %v4910_v61, %v3121_v17  ;;  %v1323_v43 = vmul.f32 %v4911_v36, %v3121_v17  ;;  %v4912_v42 = vstv %s4880_s2  ;;  %v4913_v50 = vstv %s4881_s5  ;;  %s4934_s2 = sld [smem:[#allocation96_spill]]  ;;  %s4936_s5 = sld [smem:[#allocation97_spill]] }
 0x337   : > { %v1372_v62 = vmul.f32 %v4912_v42, %v3121_v17  ;;  %v1421_v46 = vmul.f32 %v4913_v50, %v3121_v17  ;;  %v3712_v63 = vadd.f32 %v1079_v26, %v3520_v0  ;;  %v3715_v12 = vadd.f32 %v1127_v34, %v3523_v9 }
 0x338   : > { %v3718_v29 = vadd.f32 %v1176_v10, %v3526_v57  ;;  %v3721_v21 = vadd.f32 %v1225_v41, %v3529_v58  ;;  %v3724_v35 = vadd.f32 %v1274_v2, %v3532_v8  ;;  %v3727_v7 = vadd.f32 %v1323_v43, %v3535_v5 }
 0x339   : > { %v3730_v44 = vadd.f32 %v1372_v62, %v3538_v30  ;;  %v3733_v0 = vadd.f32 %v1421_v46, %v3541_v1  ;;  %v4914_v9 = vstv %s4884_s16  ;;  %v4915_v57 = vstv %s4886_s22  ;;  %s4938_s16 = sld [smem:[#allocation98_spill]]  ;;  %s4940_s22 = sld [smem:[#allocation99_spill]] }
 0x33a   : > { %v1470_v13 = vmul.f32 %v4914_v9, %v3121_v17  ;;  %v1519_v58 = vmul.f32 %v4915_v57, %v3121_v17  ;;  %v4917_v31 = vstv %s4888_s26  ;;  %v4919_v5 = vstv %s4890_s28  ;;  %s4942_s26 = sld [smem:[#allocation100_spill]]  ;;  %s4944_s28 = sld [smem:[#allocation101_spill]] }
 0x33b   : > { %v1568_v8 = vmul.f32 %v4917_v31, %v3121_v17  ;;  %v1617_v49 = vmul.f32 %v4919_v5, %v3121_v17  ;;  %v4921_v30 = vstv %s4892_s6  ;;  %v4923_v26 = vstv %s4894_s10  ;;  %s4945_s6 = sld [smem:[#allocation102_spill]]  ;;  %s4970_s10 = sld [smem:[#allocation107_spill]] }
 0x33c   : > { %v1666_v1 = vmul.f32 %v4921_v30, %v3121_v17  ;;  %v1715_v11 = vmul.f32 %v4923_v26, %v3121_v17  ;;  %v4925_v34 = vstv %s4896_s14  ;;  %v4927_v10 = vstv %s4897_s23  ;;  %s4971_s14 = sld [smem:[#allocation108_spill]]  ;;  %s4974_s23 = sld [smem:[#allocation109_spill]] }
 0x33d   : > { %v1764_v32 = vmul.f32 %v4925_v34, %v3121_v17  ;;  %v1813_v14 = vmul.f32 %v4927_v10, %v3121_v17  ;;  %v3760_v41 = vadd.f32 %v1470_v13, %v3568_v24  ;;  %v3763_v61 = vadd.f32 %v1519_v58, %v3571_v53 }
 0x33e   : > { %v3766_v2 = vadd.f32 %v1568_v8, %v3574_v55  ;;  %v3769_v36 = vadd.f32 %v1617_v49, %v3577_v33  ;;  %v3772_v43 = vadd.f32 %v1666_v1, %v3580_v60  ;;  %v3775_v42 = vadd.f32 %v1715_v11, %v3583_v56 }
 0x33f   : > { %v3778_v17 = vadd.f32 %v1764_v32, %v3586_v37  ;;  %v3781_v24 = vadd.f32 %v1813_v14, %v3589_v45  ;;  %v4930_v53 = vstv %s4916_s8  ;;  %v4931_v55 = vstv %s4918_s0 }
 0x340   : > { %v1084_v62 = vmul.f32 %v4930_v53, %v3123_v18  ;;  %v1132_v33 = vmul.f32 %v4931_v55, %v3123_v18  ;;  %v4933_v50 = vstv %s4920_s3  ;;  %v4935_v56 = vstv %s4922_s4 }
 0x341   : > { %v1181_v60 = vmul.f32 %v4933_v50, %v3123_v18  ;;  %v1230_v46 = vmul.f32 %v4935_v56, %v3123_v18  ;;  %v4937_v37 = vstv %s4924_s7  ;;  %v4939_v9 = vstv %s4926_s29 }
 0x342   : > { %v1279_v45 = vmul.f32 %v4937_v37, %v3123_v18  ;;  %v1328_v13 = vmul.f32 %v4939_v9, %v3123_v18  ;;  %v4941_v57 = vstv %s4928_s21  ;;  %v4943_v31 = vstv %s4929_s9 }
 0x343   : > { %v1377_v58 = vmul.f32 %v4941_v57, %v3123_v18  ;;  %v1426_v8 = vmul.f32 %v4943_v31, %v3123_v18  ;;  %v3808_v5 = vadd.f32 %v1084_v62, %v3616_v38  ;;  %v3811_v49 = vadd.f32 %v1132_v33, %v3619_v19 }
 0x344   : > { %v3814_v30 = vadd.f32 %v1181_v60, %v3622_v48  ;;  %v3817_v1 = vadd.f32 %v1230_v46, %v3625_v16  ;;  %v3820_v26 = vadd.f32 %v1279_v45, %v3628_v20  ;;  %v3823_v11 = vadd.f32 %v1328_v13, %v3631_v47 }
 0x345   : > { %v3826_v34 = vadd.f32 %v1377_v58, %v3634_v52  ;;  %v3829_v38 = vadd.f32 %v1426_v8, %v3637_v40  ;;  %v4946_v19 = vstv %s4932_s20  ;;  %v4947_v48 = vstv %s4934_s2 }
 0x346   : > { %v1475_v32 = vmul.f32 %v4946_v19, %v3123_v18  ;;  %v1524_v16 = vmul.f32 %v4947_v48, %v3123_v18  ;;  %v4948_v10 = vstv %s4936_s5  ;;  %v4949_v47 = vstv %s4938_s16 }
 0x347   : > { %v1573_v20 = vmul.f32 %v4948_v10, %v3123_v18  ;;  %v1622_v14 = vmul.f32 %v4949_v47, %v3123_v18  ;;  %v4950_v52 = vstv %s4940_s22  ;;  %v4951_v53 = vstv %s4942_s26 }
 0x348   : > { %v1671_v40 = vmul.f32 %v4950_v52, %v3123_v18  ;;  %v1720_v62 = vmul.f32 %v4951_v53, %v3123_v18  ;;  %v4952_v55 = vstv %s4944_s28  ;;  %v4953_v50 = vstv %s4945_s6 }
 0x349   : > { %v1769_v33 = vmul.f32 %v4952_v55, %v3123_v18  ;;  %v1818_v60 = vmul.f32 %v4953_v50, %v3123_v18  ;;  %v3856_v56 = vadd.f32 %v1475_v32, %v3664_v23  ;;  %v3859_v46 = vadd.f32 %v1524_v16, %v3667_v54 }
 0x34a   : > { %v3862_v37 = vadd.f32 %v1573_v20, %v3670_v6  ;;  %v3865_v45 = vadd.f32 %v1622_v14, %v3673_v3  ;;  %v3868_v9 = vadd.f32 %v1671_v40, %v3676_v51  ;;  %v3871_v13 = vadd.f32 %v1720_v62, %v3679_v25 }
 0x34b   : > { %v3874_v18 = vadd.f32 %v1769_v33, %v3682_v22  ;;  %v3877_v23 = vadd.f32 %v1818_v60, %v3685_v39  ;;  %v4954_v54 = vstv %s4916_s8  ;;  %v4955_v6 = vstv %s4918_s0  ;;  %s4976_s8 = sld [smem:[#allocation110_spill]]  ;;  %s4978_s0 = sld [smem:[#allocation111_spill]] }
 0x34c   : > { %v1085_v57 = vmul.f32 %v4954_v54, %v3149_v4  ;;  %v1133_v3 = vmul.f32 %v4955_v6, %v3149_v4  ;;  %v4956_v58 = vstv %s4920_s3  ;;  %v4957_v25 = vstv %s4922_s4  ;;  %s4980_s3 = sld [smem:[#allocation112_spill]]  ;;  %s4983_s4 = sld [smem:[#allocation113_spill]] }
 0x34d   : > { %v1182_v51 = vmul.f32 %v4956_v58, %v3149_v4  ;;  %v1231_v31 = vmul.f32 %v4957_v25, %v3149_v4  ;;  %v4958_v22 = vstv %s4924_s7  ;;  %v4959_v8 = vstv %s4926_s29  ;;  %s4985_s7 = sld [smem:[#allocation114_spill]]  ;;  %s4986_s29 = sld [smem:[#allocation115_spill]] }
 0x34e   : > { %v1280_v39 = vmul.f32 %v4958_v22, %v3149_v4  ;;  %v1329_v19 = vmul.f32 %v4959_v8, %v3149_v4  ;;  %v4960_v32 = vstv %s4928_s21  ;;  %v4961_v16 = vstv %s4929_s9  ;;  %s5020_s9 = sld [smem:[#allocation133_spill]] }
 0x34f   : > { %v1378_v48 = vmul.f32 %v4960_v32, %v3149_v4  ;;  %v1427_v10 = vmul.f32 %v4961_v16, %v3149_v4  ;;  %v3904_v20 = vadd.f32 %v1085_v57, %v3712_v63  ;;  %v3907_v47 = vadd.f32 %v1133_v3, %v3715_v12 }
 0x350   : > { %v3910_v14 = vadd.f32 %v1182_v51, %v3718_v29  ;;  %v3913_v52 = vadd.f32 %v1231_v31, %v3721_v21  ;;  %v3916_v40 = vadd.f32 %v1280_v39, %v3724_v35  ;;  %v3919_v53 = vadd.f32 %v1329_v19, %v3727_v7 }
 0x351   : > { %v3922_v62 = vadd.f32 %v1378_v48, %v3730_v44  ;;  %v3925_v63 = vadd.f32 %v1427_v10, %v3733_v0  ;;  %v4962_v12 = vstv %s4932_s20  ;;  %v4963_v29 = vstv %s4934_s2  ;;  %s5023_s2 = sld [smem:[#allocation123_spill]] }
 0x352   : > { %v1476_v55 = vmul.f32 %v4962_v12, %v3149_v4  ;;  %v1525_v21 = vmul.f32 %v4963_v29, %v3149_v4  ;;  %v4964_v33 = vstv %s4936_s5  ;;  %v4965_v7 = vstv %s4938_s16  ;;  %s5025_s5 = sld [smem:[#allocation124_spill]]  ;;  %s5027_s16 = sld [smem:[#allocation103_spill]] }
 0x353   : > { %v1574_v35 = vmul.f32 %v4964_v33, %v3149_v4  ;;  %v1623_v50 = vmul.f32 %v4965_v7, %v3149_v4  ;;  %v4966_v44 = vstv %s4940_s22  ;;  %v4967_v60 = vstv %s4942_s26  ;;  %s5028_s22 = sld [smem:[#allocation104_spill]]  ;;  %s5029_s26 = sld [smem:[#allocation105_spill]] }
 0x354   : > { %v1672_v0 = vmul.f32 %v4966_v44, %v3149_v4  ;;  %v1721_v54 = vmul.f32 %v4967_v60, %v3149_v4  ;;  %v4968_v57 = vstv %s4944_s28  ;;  %v4969_v3 = vstv %s4945_s6  ;;  %s5030_s28 = sld [smem:[#allocation106_spill]]  ;;  %s5031_s6 = sld [smem:[#allocation125_spill]] }
 0x355   : > { %v1770_v6 = vmul.f32 %v4968_v57, %v3149_v4  ;;  %v1819_v58 = vmul.f32 %v4969_v3, %v3149_v4  ;;  %v3952_v51 = vadd.f32 %v1476_v55, %v3760_v41  ;;  %v3955_v25 = vadd.f32 %v1525_v21, %v3763_v61 }
 0x356   : > { %v3958_v31 = vadd.f32 %v1574_v35, %v3766_v2  ;;  %v3961_v22 = vadd.f32 %v1623_v50, %v3769_v36  ;;  %v3964_v39 = vadd.f32 %v1672_v0, %v3772_v43  ;;  %v3967_v8 = vadd.f32 %v1721_v54, %v3775_v42 }
 0x357   : > { %v3970_v4 = vadd.f32 %v1770_v6, %v3778_v17  ;;  %v3973_v41 = vadd.f32 %v1819_v58, %v3781_v24  ;;  %v4972_v61 = vstv %s4719_s15  ;;  %v4973_v2 = vstv %s4720_s27 }
 0x358   : > { %v1090_v19 = vmul.f32 %v4972_v61, %v3199_v15  ;;  %v1138_v36 = vmul.f32 %v4973_v2, %v3199_v15  ;;  %v4975_v32 = vstv %s2777_s25  ;;  %v4977_v42 = vstv %s2779_s30 }
 0x359   : > { %v1187_v43 = vmul.f32 %v4975_v32, %v3199_v15  ;;  %v1236_v48 = vmul.f32 %v4977_v42, %v3199_v15  ;;  %v4979_v17 = vstv %s4722_s19  ;;  %v4981_v16 = vstv %s4723_s17 }
 0x35a   : > { %v1285_v24 = vmul.f32 %v4979_v17, %v3199_v15  ;;  %v1334_v10 = vmul.f32 %v4981_v16, %v3199_v15  ;;  %v4982_v12 = vstv %s4970_s10  ;;  %v4984_v29 = vstv %s4971_s14 }
 0x35b   : > { %v1383_v55 = vmul.f32 %v4982_v12, %v3199_v15  ;;  %v1432_v21 = vmul.f32 %v4984_v29, %v3199_v15  ;;  %v4000_v33 = vadd.f32 %v1090_v19, %v3808_v5  ;;  %v4003_v35 = vadd.f32 %v1138_v36, %v3811_v49 }
 0x35c   : > { %v4006_v7 = vadd.f32 %v1187_v43, %v3814_v30  ;;  %v4009_v50 = vadd.f32 %v1236_v48, %v3817_v1  ;;  %v4012_v44 = vadd.f32 %v1285_v24, %v3820_v26  ;;  %v4015_v0 = vadd.f32 %v1334_v10, %v3823_v11 }
 0x35d   : > { %v4018_v60 = vadd.f32 %v1383_v55, %v3826_v34  ;;  %v4021_v5 = vadd.f32 %v1432_v21, %v3829_v38  ;;  %v4987_v49 = vstv %s4974_s23  ;;  %v4988_v30 = vstv %s4976_s8 }
 0x35e   : > { %v1481_v54 = vmul.f32 %v4987_v49, %v3199_v15  ;;  %v1530_v1 = vmul.f32 %v4988_v30, %v3199_v15  ;;  %v4989_v57 = vstv %s4978_s0  ;;  %v4990_v11 = vstv %s4980_s3 }
 0x35f   : > { %v1579_v26 = vmul.f32 %v4989_v57, %v3199_v15  ;;  %v1628_v6 = vmul.f32 %v4990_v11, %v3199_v15  ;;  %v4991_v34 = vstv %s2817_s18  ;;  %v4992_v3 = vstv %s4983_s4 }
 0x360   : > { %v1677_v38 = vmul.f32 %v4991_v34, %v3199_v15  ;;  %v1726_v58 = vmul.f32 %v4992_v3, %v3199_v15  ;;  %v4993_v61 = vstv %s4985_s7  ;;  %v4994_v2 = vstv %s4986_s29 }
 0x361   : > { %v1775_v19 = vmul.f32 %v4993_v61, %v3199_v15  ;;  %v1824_v36 = vmul.f32 %v4994_v2, %v3199_v15  ;;  %v4048_v32 = vadd.f32 %v1481_v54, %v3856_v56  ;;  %v4051_v43 = vadd.f32 %v1530_v1, %v3859_v46 }
 0x362   : > { %v4054_v42 = vadd.f32 %v1579_v26, %v3862_v37  ;;  %v4057_v48 = vadd.f32 %v1628_v6, %v3865_v45  ;;  %v4060_v17 = vadd.f32 %v1677_v38, %v3868_v9  ;;  %v4063_v24 = vadd.f32 %v1726_v58, %v3871_v13 }
 0x363   : > { %v4066_v15 = vadd.f32 %v1775_v19, %v3874_v18  ;;  %v4069_v56 = vadd.f32 %v1824_v36, %v3877_v23  ;;  %v4995_v46 = vstv %s4719_s15  ;;  %v4996_v37 = vstv %s4720_s27  ;;  %s5010_s15 = sld [smem:[#allocation117_spill]] }
 0x364   : > { %v1091_v16 = vmul.f32 %v4995_v46, %v3225_v27  ;;  %v1139_v45 = vmul.f32 %v4996_v37, %v3225_v27  ;;  %v4997_v10 = vstv %s2777_s25  ;;  %v4998_v13 = vstv %s2779_s30  ;;  %s5003_s25 = sld [smem:[#allocation6_spill]]  ;;  %s5008_s30 = sld [smem:[#allocation116_spill]] }
 0x365   : > { %v1188_v9 = vmul.f32 %v4997_v10, %v3225_v27  ;;  %v1237_v12 = vmul.f32 %v4998_v13, %v3225_v27  ;;  %v4999_v18 = vstv %s4722_s19  ;;  %v5000_v55 = vstv %s4723_s17  ;;  %s5012_s17 = sld [smem:[#allocation118_spill]]  ;;  %s5015_s19 = sld [smem:[#allocation119_spill]] }
 0x366   : > { %v1286_v23 = vmul.f32 %v4999_v18, %v3225_v27  ;;  %v1335_v29 = vmul.f32 %v5000_v55, %v3225_v27  ;;  %v5001_v21 = vstv %s4970_s10  ;;  %v5002_v54 = vstv %s4971_s14 }
 0x367   : > { %v1384_v49 = vmul.f32 %v5001_v21, %v3225_v27  ;;  %v1433_v30 = vmul.f32 %v5002_v54, %v3225_v27  ;;  %v4096_v1 = vadd.f32 %v1091_v16, %v3904_v20  ;;  %v4099_v57 = vadd.f32 %v1139_v45, %v3907_v47 }
 0x368   : > { %v4102_v26 = vadd.f32 %v1188_v9, %v3910_v14  ;;  %v4105_v11 = vadd.f32 %v1237_v12, %v3913_v52  ;;  %v4108_v6 = vadd.f32 %v1286_v23, %v3916_v40  ;;  %v4111_v34 = vadd.f32 %v1335_v29, %v3919_v53 }
 0x369   : > { %v4114_v38 = vadd.f32 %v1384_v49, %v3922_v62  ;;  %v4117_v20 = vadd.f32 %v1433_v30, %v3925_v63  ;;  %v5004_v47 = vstv %s4974_s23  ;;  %v5005_v14 = vstv %s4976_s8 }
 0x36a   : > { %v1482_v3 = vmul.f32 %v5004_v47, %v3225_v27  ;;  %v1531_v58 = vmul.f32 %v5005_v14, %v3225_v27  ;;  %v5006_v52 = vstv %s4978_s0  ;;  %v5007_v61 = vstv %s4980_s3  ;;  %s2113_s27 = sshll.u32 %s5003_s25, 8 }
 0x36b   : > { %v1580_v40 = vmul.f32 %v5006_v52, %v3225_v27  ;;  %v1629_v53 = vmul.f32 %v5007_v61, %v3225_v27  ;;  %v5009_v62 = vstv %s2817_s18  ;;  %v5011_v63 = vstv %s4983_s4  ;;  %s4183_s20 = scalar_lea.vmem %s5020_s9, %s2113_s27 }
 0x36c   : > { %v1678_v19 = vmul.f32 %v5009_v62, %v3225_v27  ;;  %v1727_v2 = vmul.f32 %v5011_v63, %v3225_v27  ;;  %v5013_v36 = vstv %s4985_s7  ;;  %v5014_v16 = vstv %s4986_s29 }
 0x36d   : > { %v1776_v46 = vmul.f32 %v5013_v36, %v3225_v27  ;;  %v1825_v37 = vmul.f32 %v5014_v16, %v3225_v27  ;;  %v4145_v45 = vadd.f32 %v1482_v3, %v3952_v51  ;;  %v4148_v10 = vadd.f32 %v1531_v58, %v3955_v25 }
 0x36e   : > { %v4151_v9 = vadd.f32 %v1580_v40, %v3958_v31  ;;  %v4154_v13 = vadd.f32 %v1629_v53, %v3961_v22  ;;  %v4157_v12 = vadd.f32 %v1678_v19, %v3964_v39  ;;  %v4160_v27 = vadd.f32 %v1727_v2, %v3967_v8 }
 0x36f   : > { %v4163_v18 = vadd.f32 %v1776_v46, %v3970_v4  ;;  %v4166_v51 = vadd.f32 %v1825_v37, %v3973_v41  ;;  %v5016_v25 = vstv %s2833_s11  ;;  %v5017_v31 = vstv %s5008_s30 }
 0x370   : > { %v1096_v23 = vmul.f32 %v5016_v25, %v3227_v28  ;;  %v1144_v55 = vmul.f32 %v5017_v31, %v3227_v28  ;;  %v5018_v22 = vstv %s5010_s15  ;;  %v5019_v39 = vstv %s5012_s17 }
 0x371   : > { %v1193_v29 = vmul.f32 %v5018_v22, %v3227_v28  ;;  %v1242_v21 = vmul.f32 %v5019_v39, %v3227_v28  ;;  %v5021_v8 = vstv %s5015_s19  ;;  %v5022_v41 = vstv %s4735_s12 }
 0x372   : > { %v1291_v4 = vmul.f32 %v5021_v8, %v3227_v28  ;;  %v1340_v49 = vmul.f32 %v5022_v41, %v3227_v28  ;;  %v5024_v54 = vstv %s4736_s24  ;;  %v5026_v47 = vstv %s4737_s13 }
 0x373   : > { %v1389_v30 = vmul.f32 %v5024_v54, %v3227_v28  ;;  %v1438_v3 = vmul.f32 %v5026_v47, %v3227_v28  ;;  %v1098_v14 = vadd.f32 %v1096_v23, %v4000_v33  ;;  %v1146_v58 = vadd.f32 %v1144_v55, %v4003_v35 }
 0x374   : > { %v1195_v52 = vadd.f32 %v1193_v29, %v4006_v7  ;;  %v1244_v40 = vadd.f32 %v1242_v21, %v4009_v50  ;;  %v1293_v61 = vadd.f32 %v1291_v4, %v4012_v44  ;;  %v1342_v53 = vadd.f32 %v1340_v49, %v4015_v0 }
 0x375   : > { %v1391_v62 = vadd.f32 %v1389_v30, %v4018_v60  ;;  %v1440_v33 = vadd.f32 %v1438_v3, %v4021_v5  ;;  %1100 = vst [vmem:[%s4183_s20] sm:$0xff] %v1098_v14  ;;  %1968 = vst [vmem:[%s4183_s20 + $0x10] sm:$0xff] %v1146_v58  ;;  %v5032_v35 = vstv %s5023_s2  ;;  %v5033_v50 = vstv %s5025_s5 }
 0x376   : > { %1978 = vst [vmem:[%s4183_s20 + $0x20] sm:$0xff] %v1195_v52  ;;  %1988 = vst [vmem:[%s4183_s20 + $0x30] sm:$0xff] %v1244_v40  ;;  %v1487_v7 = vmul.f32 %v5032_v35, %v3227_v28  ;;  %v1536_v44 = vmul.f32 %v5033_v50, %v3227_v28  ;;  %v5034_v19 = vstv %s2873_s1  ;;  %v5035_v63 = vstv %s5027_s16 }
 0x377   : > { %v1585_v0 = vmul.f32 %v5034_v19, %v3227_v28  ;;  %v1634_v60 = vmul.f32 %v5035_v63, %v3227_v28  ;;  %1998 = vst [vmem:[%s4183_s20 + $0x40] sm:$0xff] %v1293_v61  ;;  %2008 = vst [vmem:[%s4183_s20 + $0x50] sm:$0xff] %v1342_v53  ;;  %v5036_v5 = vstv %s5028_s22  ;;  %v5037_v36 = vstv %s5029_s26 }
 0x378   : > { %2018 = vst [vmem:[%s4183_s20 + $0x60] sm:$0xff] %v1391_v62  ;;  %2028 = vst [vmem:[%s4183_s20 + $0x70] sm:$0xff] %v1440_v33  ;;  %v1683_v2 = vmul.f32 %v5036_v5, %v3227_v28  ;;  %v1732_v46 = vmul.f32 %v5037_v36, %v3227_v28  ;;  %v5038_v16 = vstv %s5030_s28  ;;  %v5039_v25 = vstv %s5031_s6 }
 0x379   : > { %v1781_v37 = vmul.f32 %v5038_v16, %v3227_v28  ;;  %v1830_v23 = vmul.f32 %v5039_v25, %v3227_v28  ;;  %v1489_v31 = vadd.f32 %v1487_v7, %v4048_v32  ;;  %v1538_v55 = vadd.f32 %v1536_v44, %v4051_v43 }
 0x37a   : > { %v1587_v22 = vadd.f32 %v1585_v0, %v4054_v42  ;;  %v1636_v29 = vadd.f32 %v1634_v60, %v4057_v48  ;;  %v1685_v39 = vadd.f32 %v1683_v2, %v4060_v17  ;;  %v1734_v21 = vadd.f32 %v1732_v46, %v4063_v24 }
 0x37b   : > { %v1783_v28 = vadd.f32 %v1781_v37, %v4066_v15  ;;  %v1832_v32 = vadd.f32 %v1830_v23, %v4069_v56  ;;  %2038 = vst [vmem:[%s4183_s20 + $0x80] sm:$0xff] %v1489_v31  ;;  %2048 = vst [vmem:[%s4183_s20 + $0x90] sm:$0xff] %v1538_v55  ;;  %v5040_v43 = vstv %s2833_s11  ;;  %v5041_v48 = vstv %s5008_s30 }
 0x37c   : > { %2058 = vst [vmem:[%s4183_s20 + $0xa0] sm:$0xff] %v1587_v22  ;;  %2068 = vst [vmem:[%s4183_s20 + $0xb0] sm:$0xff] %v1636_v29  ;;  %v1097_v42 = vmul.f32 %v5040_v43, %v3253_v59  ;;  %v1145_v17 = vmul.f32 %v5041_v48, %v3253_v59  ;;  %v5042_v8 = vstv %s5010_s15  ;;  %v5043_v4 = vstv %s5012_s17 }
 0x37d   : > { %v1194_v24 = vmul.f32 %v5042_v8, %v3253_v59  ;;  %v1243_v15 = vmul.f32 %v5043_v4, %v3253_v59  ;;  %2078 = vst [vmem:[%s4183_s20 + $0xc0] sm:$0xff] %v1685_v39  ;;  %2088 = vst [vmem:[%s4183_s20 + $0xd0] sm:$0xff] %v1734_v21  ;;  %v5044_v56 = vstv %s5015_s19  ;;  %v5045_v49 = vstv %s4735_s12 }
 0x37e   : > { %2098 = vst [vmem:[%s4183_s20 + $0xe0] sm:$0xff] %v1783_v28  ;;  %2108 = vst [vmem:[%s4183_s20 + $0xf0] sm:$0xff] %v1832_v32  ;;  %v1292_v41 = vmul.f32 %v5044_v56, %v3253_v59  ;;  %v1341_v54 = vmul.f32 %v5045_v49, %v3253_v59  ;;  %v5046_v30 = vstv %s4736_s24  ;;  %v5047_v3 = vstv %s4737_s13 }
 0x37f   : > { %v1390_v47 = vmul.f32 %v5046_v30, %v3253_v59  ;;  %v1439_v14 = vmul.f32 %v5047_v3, %v3253_v59  ;;  %v1099_v58 = vadd.f32 %v1097_v42, %v4096_v1  ;;  %v1147_v52 = vadd.f32 %v1145_v17, %v4099_v57 }
 0x380   : > { %v1196_v40 = vadd.f32 %v1194_v24, %v4102_v26  ;;  %v1245_v61 = vadd.f32 %v1243_v15, %v4105_v11  ;;  %v1294_v53 = vadd.f32 %v1292_v41, %v4108_v6  ;;  %v1343_v62 = vadd.f32 %v1341_v54, %v4111_v34 }
 0x381   : > { %v1392_v33 = vadd.f32 %v1390_v47, %v4114_v38  ;;  %v1441_v1 = vadd.f32 %v1439_v14, %v4117_v20  ;;  %1101 = vst [vmem:[%s4183_s20 + $0x8] sm:$0xff] %v1099_v58  ;;  %1969 = vst [vmem:[%s4183_s20 + $0x18] sm:$0xff] %v1147_v52  ;;  %v5048_v57 = vmov %v5032_v35  ;;  %v5049_v11 = vmov %v5033_v50 }
 0x382   : > { %1979 = vst [vmem:[%s4183_s20 + $0x28] sm:$0xff] %v1196_v40  ;;  %1989 = vst [vmem:[%s4183_s20 + $0x38] sm:$0xff] %v1245_v61  ;;  %v1488_v26 = vmul.f32 %v5048_v57, %v3253_v59  ;;  %v1537_v6 = vmul.f32 %v5049_v11, %v3253_v59  ;;  %v5050_v35 = vmov %v5034_v19  ;;  %v5051_v7 = vmov %v5035_v63 }
 0x383   : > { %v1586_v34 = vmul.f32 %v5050_v35, %v3253_v59  ;;  %v1635_v38 = vmul.f32 %v5051_v7, %v3253_v59  ;;  %1999 = vst [vmem:[%s4183_s20 + $0x48] sm:$0xff] %v1294_v53  ;;  %2009 = vst [vmem:[%s4183_s20 + $0x58] sm:$0xff] %v1343_v62  ;;  %v5052_v20 = vmov %v5036_v5  ;;  %v5053_v44 = vmov %v5037_v36 }
 0x384   : > { %2019 = vst [vmem:[%s4183_s20 + $0x68] sm:$0xff] %v1392_v33  ;;  %2029 = vst [vmem:[%s4183_s20 + $0x78] sm:$0xff] %v1441_v1  ;;  %v1684_v50 = vmul.f32 %v5052_v20, %v3253_v59  ;;  %v1733_v19 = vmul.f32 %v5053_v44, %v3253_v59  ;;  %v5054_v0 = vmov %v5038_v16  ;;  %v5055_v60 = vmov %v5039_v25 }
 0x385   : > { %v1782_v63 = vmul.f32 %v5054_v0, %v3253_v59  ;;  %v1831_v5 = vmul.f32 %v5055_v60, %v3253_v59  ;;  %v1490_v2 = vadd.f32 %v1488_v26, %v4145_v45  ;;  %v1539_v36 = vadd.f32 %v1537_v6, %v4148_v10 }
 0x386   : > { %v1588_v46 = vadd.f32 %v1586_v34, %v4151_v9  ;;  %v1637_v16 = vadd.f32 %v1635_v38, %v4154_v13  ;;  %v1686_v37 = vadd.f32 %v1684_v50, %v4157_v12  ;;  %v1735_v25 = vadd.f32 %v1733_v19, %v4160_v27 }
 0x387   : > { %v1784_v23 = vadd.f32 %v1782_v63, %v4163_v18  ;;  %v1833_v31 = vadd.f32 %v1831_v5, %v4166_v51  ;;  %2039 = vst [vmem:[%s4183_s20 + $0x88] sm:$0xff] %v1490_v2  ;;  %2049 = vst [vmem:[%s4183_s20 + $0x98] sm:$0xff] %v1539_v36 }
 0x388   : > { %2059 = vst [vmem:[%s4183_s20 + $0xa8] sm:$0xff] %v1588_v46  ;;  %2069 = vst [vmem:[%s4183_s20 + $0xb8] sm:$0xff] %v1637_v16 }
 0x389   : > { %2079 = vst [vmem:[%s4183_s20 + $0xc8] sm:$0xff] %v1686_v37  ;;  %2089 = vst [vmem:[%s4183_s20 + $0xd8] sm:$0xff] %v1735_v25 }
 0x38a   : > { %2099 = vst [vmem:[%s4183_s20 + $0xe8] sm:$0xff] %v1784_v23  ;;  %2109 = vst [vmem:[%s4183_s20 + $0xf8] sm:$0xff] %v1833_v31 }
 0x38b PF: > { %s5056_s1 = sld [smem:[#allocation5_spill]] }
 0x391   : > { %s18_s24 = sadd.s32 1, %s5056_s1  }
 0x392   : > { %p15_p1 = scmp.ge.s32.totalorder %s18_s24, 4  }
 0x394   :  { %17 = sbr.rel (!%p15_p1) target bundleno = 10 (0xa), region = 98 }
 0x39b   :  { %1858 = vsyncpa [#allocation3], 1 }
 0x39c   :  { %1860 = vsyncpa [#allocation3 + $0x1], 1 }

</bundles_post_ra>
